<compile_context>
chip_gen: v7x
topology: tpu7x:2x2x1
jax: 0.10.0
libtpu: 0.0.40
codegen_flags: <defaults>
</compile_context>

<pallas_src>
import jax
import jax.numpy as jnp
import numpy as np
from jax.experimental import pallas as pl
from jax.experimental.pallas import tpu as pltpu

Z_DIM = 100
H1, H2, H3, OUT = 128, 512, 1024, 3
K_PAD = 128    # layer-1 contraction dim padded to a full lane tile
OUT_PAD = 8    # output padded to one sublane-aligned chunk (sliced in wrapper)


def _round_up(x, m):
    return ((x + m - 1) // m) * m


def _generator_kernel(z_ref,
                      w1_ref, b1_ref,
                      w2_ref, b2_ref,
                      w3_ref, b3_ref,
                      w4_ref, b4_ref,
                      o_ref):
    cd = w1_ref.dtype  # compute dtype fed to the MXU (bf16 or f32)

    # Layer 1: Linear(128(pad) -> 128) + ReLU.  z already in compute dtype.
    h = jnp.dot(z_ref[...], w1_ref[...], preferred_element_type=jnp.float32)
    h = jnp.maximum(h + b1_ref[...], 0.0).astype(cd)
    # Layer 2: Linear(128 -> 512) + ReLU
    h = jnp.dot(h, w2_ref[...], preferred_element_type=jnp.float32)
    h = jnp.maximum(h + b2_ref[...], 0.0).astype(cd)
    # Layer 3: Linear(512 -> 1024) + ReLU (dominant matmul)
    h = jnp.dot(h, w3_ref[...], preferred_element_type=jnp.float32)
    h = jnp.maximum(h + b3_ref[...], 0.0).astype(cd)
    # Layer 4: Linear(1024 -> 8(pad)), no activation; padded cols are zero.
    y = jnp.dot(h, w4_ref[...], preferred_element_type=jnp.float32) + b4_ref[...]
    o_ref[...] = y.astype(o_ref.dtype)


def _vmem_limit_bytes(tb, compute_dtype):
    """Rough per-step VMEM footprint -> explicit scoped-VMEM limit."""
    itemsize = jnp.dtype(compute_dtype).itemsize
    # double-buffered streaming tiles: z (compute dtype) + out (f32)
    stream = 2 * tb * K_PAD * itemsize + 2 * tb * OUT_PAD * 4
    # grid-invariant weights/biases (assume double-buffered to be safe)
    w_bytes = (K_PAD * H1 + H1 * H2 + H2 * H3 + H3 * OUT_PAD) * itemsize
    b_bytes = (H1 + H2 + H3 + OUT_PAD) * 4
    # intermediate activations: f32 accumulators + compute-dtype copies
    act = tb * (H1 + H2 + H3) * (4 + itemsize)
    est = stream + 2 * (w_bytes + b_bytes) + act
    # generous headroom, but stay safely under v7x's 64 MiB physical VMEM
    return int(min(48 * 1024 * 1024, max(32 * 1024 * 1024, (est * 3) // 2)))


def generator_forward(z, params, *, tile_b=1024, compute_dtype=jnp.bfloat16):
    """Fused Generator MLP forward.

    z: (B, Z_DIM) float32.
    params: dict of w1..w4 stored (in_features, out_features), b1..b4 (1, out).
    tile_b: max batch tile (multiple of 8).
    compute_dtype: dtype fed to the MXU (bf16 recommended on v5e/v6e/v7x);
                   accumulation inside each matmul is always float32
                   (activations are re-cast to compute_dtype between layers).
    """
    assert tile_b % 8 == 0, "tile_b must be a multiple of 8"
    B = z.shape[0]
    B8 = _round_up(max(B, 1), 8)  # keep every tile (8,128)-aligned

    # --- choose grid / batch tile ---
    if B8 <= tile_b:
        # Split into >=2 grid steps when there is enough work so both
        # TensorCores on v7x participate ("parallel" grid axis); on single-TC
        # v5e/v6e this costs at most one extra ~0.35us pipeline step.
        if B8 >= 16:
            tb = _round_up((B8 + 1) // 2, 8)
        else:
            tb = B8
    else:
        tb = tile_b
    B_tot = _round_up(B8, tb)
    grid = (B_tot // tb,)

    # --- prepare operands (pads/casts are cheap XLA ops outside the kernel) ---
    # z: pad K 100->128 and batch to B_tot, cast to compute dtype (halves the
    # per-tile input DMA vs shipping f32 and casting in-kernel).
    z_p = jnp.pad(z, ((0, B_tot - B), (0, K_PAD - Z_DIM))).astype(compute_dtype)
    w1 = jnp.pad(params["w1"], ((0, K_PAD - Z_DIM), (0, 0))).astype(compute_dtype)
    w2 = params["w2"].astype(compute_dtype)
    w3 = params["w3"].astype(compute_dtype)
    w4 = jnp.pad(params["w4"], ((0, 0), (0, OUT_PAD - OUT))).astype(compute_dtype)
    b1, b2, b3 = params["b1"], params["b2"], params["b3"]           # f32
    b4 = jnp.pad(params["b4"], ((0, 0), (0, OUT_PAD - OUT)))        # f32

    def full_spec(arr):
        # Whole-array block, same block every grid step (grid-invariant;
        # Mosaic keeps it resident across steps).
        return pl.BlockSpec(arr.shape, lambda i: (0, 0))

    out_padded = pl.pallas_call(
        _generator_kernel,
        out_shape=jax.ShapeDtypeStruct((B_tot, OUT_PAD), jnp.float32),
        grid_spec=pltpu.PrefetchScalarGridSpec(
            num_scalar_prefetch=0,
            grid=grid,
            in_specs=[
                pl.BlockSpec((tb, K_PAD), lambda i: (i, 0)),   # z tile
                full_spec(w1), full_spec(b1),
                full_spec(w2), full_spec(b2),
                full_spec(w3), full_spec(b3),
                full_spec(w4), full_spec(b4),
            ],
            out_specs=pl.BlockSpec((tb, OUT_PAD), lambda i: (i, 0)),
        ),
        compiler_params=pltpu.CompilerParams(
            dimension_semantics=("parallel",),
            vmem_limit_bytes=_vmem_limit_bytes(tb, compute_dtype)),
    )(z_p, w1, b1, w2, b2, w3, b3, w4, b4)

    return out_padded[:B, :OUT]


def init_params(key):
    """Deterministic init matching nn.Linear's default U(-1/sqrt(fan_in), ...)."""
    dims = [(Z_DIM, H1), (H1, H2), (H2, H3), (H3, OUT)]
    params = {}
    for idx, (fan_in, fan_out) in enumerate(dims, start=1):
        key, kw, kb = jax.random.split(key, 3)
        bound = 1.0 / np.sqrt(fan_in)
        params[f"w{idx}"] = jax.random.uniform(
            kw, (fan_in, fan_out), jnp.float32, -bound, bound)
        params[f"b{idx}"] = jax.random.uniform(
            kb, (1, fan_out), jnp.float32, -bound, bound)
    return params


def generator_forward_ref(z, params):
    """Plain-JAX f32 reference for correctness checking."""
    h = jnp.maximum(z @ params["w1"] + params["b1"], 0.0)
    h = jnp.maximum(h @ params["w2"] + params["b2"], 0.0)
    h = jnp.maximum(h @ params["w3"] + params["b3"], 0.0)
    return h @ params["w4"] + params["b4"]


if __name__ == "__main__":
    key = jax.random.PRNGKey(0)
    key, kz = jax.random.split(key)
    params = init_params(key)

    B = 64
    z = jax.random.normal(kz, (B, Z_DIM), jnp.float32)
    ref = generator_forward_ref(z, params)

    # 1) f32 compute path (grid splits into 2 'parallel' steps) -> exact match.
    out_f32 = jax.block_until_ready(
        generator_forward(z, params, compute_dtype=jnp.float32))
    np.testing.assert_allclose(np.asarray(out_f32), np.asarray(ref),
                               rtol=1e-5, atol=1e-5)
    assert out_f32.shape == (B, OUT) and out_f32.dtype == jnp.float32

    # 2) default bf16 compute path (fast path on v5e/v6e/v7x) -> loose tol.
    #    Note: accumulation is f32 within each matmul only; activations are
    #    re-quantized to bf16 between layers, so error compounds slightly.
    out_bf16 = jax.block_until_ready(generator_forward(z, params))
    np.testing.assert_allclose(np.asarray(out_bf16), np.asarray(ref),
                               rtol=5e-2, atol=5e-2)
    assert out_bf16.shape == (B, OUT) and out_bf16.dtype == jnp.float32

    # 3) tiled path with batch padding (B=48 > tile_b=32 -> 2 steps, pad to 64).
    out_tiled = jax.block_until_ready(
        generator_forward(z[:48], params, tile_b=32,
                          compute_dtype=jnp.float32))
    np.testing.assert_allclose(np.asarray(out_tiled), np.asarray(ref[:48]),
                               rtol=1e-5, atol=1e-5)

    # 4) non-multiple-of-8 batch (padded to 16 rows inside the wrapper).
    out_small = jax.block_until_ready(
        generator_forward(z[:10], params, compute_dtype=jnp.float32))
    np.testing.assert_allclose(np.asarray(out_small), np.asarray(ref[:10]),
                               rtol=1e-5, atol=1e-5)

    print("KERNEL_OK")
</pallas_src>

<mosaic_0001>
module attributes {stable_mosaic.version = 11 : i64} {
  func.func @_generator_kernel(%arg0: i32, %arg1: memref<32x128xf32, #tpu.memory_space<vmem>>, %arg2: memref<128x128xf32, #tpu.memory_space<vmem>>, %arg3: memref<1x128xf32, #tpu.memory_space<vmem>>, %arg4: memref<128x512xf32, #tpu.memory_space<vmem>>, %arg5: memref<1x512xf32, #tpu.memory_space<vmem>>, %arg6: memref<512x1024xf32, #tpu.memory_space<vmem>>, %arg7: memref<1x1024xf32, #tpu.memory_space<vmem>>, %arg8: memref<1024x8xf32, #tpu.memory_space<vmem>>, %arg9: memref<1x8xf32, #tpu.memory_space<vmem>>, %arg10: memref<32x8xf32, #tpu.memory_space<vmem>>) attributes {dimension_semantics = [#tpu.dimension_semantics<parallel>], iteration_bounds = array<i64: 2>, scalar_prefetch = 0 : i64, scratch_operands = 0 : i64, tpu.core_type = #tpu.core_type<tc>, window_params = [{transform_indices = @transform_0, window_bounds = array<i64: 32, 128>}, {pipeline_mode = #tpu.pipeline_mode<synchronous>, transform_indices = @transform_1, window_bounds = array<i64: 128, 128>}, {pipeline_mode = #tpu.pipeline_mode<synchronous>, transform_indices = @transform_2, window_bounds = array<i64: 1, 128>}, {pipeline_mode = #tpu.pipeline_mode<synchronous>, transform_indices = @transform_3, window_bounds = array<i64: 128, 512>}, {pipeline_mode = #tpu.pipeline_mode<synchronous>, transform_indices = @transform_4, window_bounds = array<i64: 1, 512>}, {pipeline_mode = #tpu.pipeline_mode<synchronous>, transform_indices = @transform_5, window_bounds = array<i64: 512, 1024>}, {pipeline_mode = #tpu.pipeline_mode<synchronous>, transform_indices = @transform_6, window_bounds = array<i64: 1, 1024>}, {pipeline_mode = #tpu.pipeline_mode<synchronous>, transform_indices = @transform_7, window_bounds = array<i64: 1024, 8>}, {pipeline_mode = #tpu.pipeline_mode<synchronous>, transform_indices = @transform_8, window_bounds = array<i64: 1, 8>}, {transform_indices = @transform_9, window_bounds = array<i64: 32, 8>}]} {
    %c0 = arith.constant 0 : index
    %c0_0 = arith.constant 0 : index
    %0 = vector.load %arg1[%c0, %c0_0] : memref<32x128xf32, #tpu.memory_space<vmem>>, vector<32x128xf32>
    %c0_1 = arith.constant 0 : index
    %c0_2 = arith.constant 0 : index
    %1 = vector.load %arg2[%c0_1, %c0_2] : memref<128x128xf32, #tpu.memory_space<vmem>>, vector<128x128xf32>
    %cst = arith.constant dense<0.000000e+00> : vector<32x128xf32>
    %2 = tpu.matmul %0, %1, %cst {dimension_numbers = #tpu.dot_dimension_numbers<[1], [0], [0], [1], [0, 0, 1, 1], [], []>} : vector<32x128xf32>, vector<128x128xf32>, vector<32x128xf32> -> vector<32x128xf32>
    %c0_3 = arith.constant 0 : index
    %c0_4 = arith.constant 0 : index
    %3 = vector.load %arg3[%c0_3, %c0_4] : memref<1x128xf32, #tpu.memory_space<vmem>>, vector<1x128xf32>
    %4 = vector.broadcast %3 : vector<1x128xf32> to vector<32x128xf32>
    %5 = arith.addf %2, %4 : vector<32x128xf32>
    %cst_5 = arith.constant 0.000000e+00 : f32
    %6 = vector.broadcast %cst_5 : f32 to vector<32x128xf32>
    %7 = arith.maximumf %5, %6 : vector<32x128xf32>
    %c0_6 = arith.constant 0 : index
    %c0_7 = arith.constant 0 : index
    %8 = vector.load %arg4[%c0_6, %c0_7] : memref<128x512xf32, #tpu.memory_space<vmem>>, vector<128x512xf32>
    %cst_8 = arith.constant dense<0.000000e+00> : vector<32x512xf32>
    %9 = tpu.matmul %7, %8, %cst_8 {dimension_numbers = #tpu.dot_dimension_numbers<[1], [0], [0], [1], [0, 0, 1, 1], [], []>} : vector<32x128xf32>, vector<128x512xf32>, vector<32x512xf32> -> vector<32x512xf32>
    %c0_9 = arith.constant 0 : index
    %c0_10 = arith.constant 0 : index
    %10 = vector.load %arg5[%c0_9, %c0_10] : memref<1x512xf32, #tpu.memory_space<vmem>>, vector<1x512xf32>
    %11 = vector.broadcast %10 : vector<1x512xf32> to vector<32x512xf32>
    %12 = arith.addf %9, %11 : vector<32x512xf32>
    %cst_11 = arith.constant 0.000000e+00 : f32
    %13 = vector.broadcast %cst_11 : f32 to vector<32x512xf32>
    %14 = arith.maximumf %12, %13 : vector<32x512xf32>
    %c0_12 = arith.constant 0 : index
    %c0_13 = arith.constant 0 : index
    %15 = vector.load %arg6[%c0_12, %c0_13] : memref<512x1024xf32, #tpu.memory_space<vmem>>, vector<512x1024xf32>
    %cst_14 = arith.constant dense<0.000000e+00> : vector<32x1024xf32>
    %16 = tpu.matmul %14, %15, %cst_14 {dimension_numbers = #tpu.dot_dimension_numbers<[1], [0], [0], [1], [0, 0, 1, 1], [], []>} : vector<32x512xf32>, vector<512x1024xf32>, vector<32x1024xf32> -> vector<32x1024xf32>
    %c0_15 = arith.constant 0 : index
    %c0_16 = arith.constant 0 : index
    %17 = vector.load %arg7[%c0_15, %c0_16] : memref<1x1024xf32, #tpu.memory_space<vmem>>, vector<1x1024xf32>
    %18 = vector.broadcast %17 : vector<1x1024xf32> to vector<32x1024xf32>
    %19 = arith.addf %16, %18 : vector<32x1024xf32>
    %cst_17 = arith.constant 0.000000e+00 : f32
    %20 = vector.broadcast %cst_17 : f32 to vector<32x1024xf32>
    %21 = arith.maximumf %19, %20 : vector<32x1024xf32>
    %c0_18 = arith.constant 0 : index
    %c0_19 = arith.constant 0 : index
    %22 = vector.load %arg8[%c0_18, %c0_19] : memref<1024x8xf32, #tpu.memory_space<vmem>>, vector<1024x8xf32>
    %cst_20 = arith.constant dense<0.000000e+00> : vector<32x8xf32>
    %23 = tpu.matmul %21, %22, %cst_20 {dimension_numbers = #tpu.dot_dimension_numbers<[1], [0], [0], [1], [0, 0, 1, 1], [], []>} : vector<32x1024xf32>, vector<1024x8xf32>, vector<32x8xf32> -> vector<32x8xf32>
    %c0_21 = arith.constant 0 : index
    %c0_22 = arith.constant 0 : index
    %24 = vector.load %arg9[%c0_21, %c0_22] : memref<1x8xf32, #tpu.memory_space<vmem>>, vector<1x8xf32>
    %25 = vector.broadcast %24 : vector<1x8xf32> to vector<32x8xf32>
    %26 = arith.addf %23, %25 : vector<32x8xf32>
    %c0_23 = arith.constant 0 : index
    %c0_24 = arith.constant 0 : index
    %27 = vector.load %arg10[%c0_23, %c0_24] : memref<32x8xf32, #tpu.memory_space<vmem>>, vector<32x8xf32>
    tpu.vector_store %arg10[%c0_23, %c0_24], %26 {strides = array<i32>} : memref<32x8xf32, #tpu.memory_space<vmem>>, vector<32x8xf32>,
    return
  }
  func.func @transform_0(%arg0: i32) -> (i32, i32) {
    %c0_i32 = arith.constant 0 : i32
    %c0_i32_0 = arith.constant 0 : i32
    return %arg0, %c0_i32 : i32, i32
  }
  func.func @transform_1(%arg0: i32) -> (i32, i32) {
    %c0_i32 = arith.constant 0 : i32
    %c0_i32_0 = arith.constant 0 : i32
    %c0_i32_1 = arith.constant 0 : i32
    return %c0_i32, %c0_i32_0 : i32, i32
  }
  func.func @transform_2(%arg0: i32) -> (i32, i32) {
    %c0_i32 = arith.constant 0 : i32
    %c0_i32_0 = arith.constant 0 : i32
    %c0_i32_1 = arith.constant 0 : i32
    return %c0_i32, %c0_i32_0 : i32, i32
  }
  func.func @transform_3(%arg0: i32) -> (i32, i32) {
    %c0_i32 = arith.constant 0 : i32
    %c0_i32_0 = arith.constant 0 : i32
    %c0_i32_1 = arith.constant 0 : i32
    return %c0_i32, %c0_i32_0 : i32, i32
  }
  func.func @transform_4(%arg0: i32) -> (i32, i32) {
    %c0_i32 = arith.constant 0 : i32
    %c0_i32_0 = arith.constant 0 : i32
    %c0_i32_1 = arith.constant 0 : i32
    return %c0_i32, %c0_i32_0 : i32, i32
  }
  func.func @transform_5(%arg0: i32) -> (i32, i32) {
    %c0_i32 = arith.constant 0 : i32
    %c0_i32_0 = arith.constant 0 : i32
    %c0_i32_1 = arith.constant 0 : i32
    return %c0_i32, %c0_i32_0 : i32, i32
  }
  func.func @transform_6(%arg0: i32) -> (i32, i32) {
    %c0_i32 = arith.constant 0 : i32
    %c0_i32_0 = arith.constant 0 : i32
    %c0_i32_1 = arith.constant 0 : i32
    return %c0_i32, %c0_i32_0 : i32, i32
  }
  func.func @transform_7(%arg0: i32) -> (i32, i32) {
    %c0_i32 = arith.constant 0 : i32
    %c0_i32_0 = arith.constant 0 : i32
    %c0_i32_1 = arith.constant 0 : i32
    return %c0_i32, %c0_i32_0 : i32, i32
  }
  func.func @transform_8(%arg0: i32) -> (i32, i32) {
    %c0_i32 = arith.constant 0 : i32
    %c0_i32_0 = arith.constant 0 : i32
    %c0_i32_1 = arith.constant 0 : i32
    return %c0_i32, %c0_i32_0 : i32, i32
  }
  func.func @transform_9(%arg0: i32) -> (i32, i32) {
    %c0_i32 = arith.constant 0 : i32
    %c0_i32_0 = arith.constant 0 : i32
    return %arg0, %c0_i32 : i32, i32
  }
}

</mosaic_0001>

<bundles_post_ra>
// kernel: tpu_custom_call.1
= control target key start
LH: loop header
LB: loop body
LE: loop exit
PB: predicated region body
PF: predicated region fallthrough
CT: control target
= control target key end

     0   :  { %s5302_s0 = inlined_call_operand.hbm [shape: f32[64,128], index: 0, kind: input, shape index: {}]   ;;  %s5303_s1 = inlined_call_operand.hbm [shape: f32[128,128], index: 1, kind: input, shape index: {}]   ;;  %s5304_s2 = inlined_call_operand.hbm [shape: f32[1,128], index: 2, kind: input, shape index: {}]   ;;  %s5305_s3 = inlined_call_operand.hbm [shape: f32[128,512], index: 3, kind: input, shape index: {}]   ;;  %s5306_s4 = inlined_call_operand.hbm [shape: f32[1,512], index: 4, kind: input, shape index: {}]   ;;  %s5307_s5 = inlined_call_operand.hbm [shape: f32[512,1024], index: 5, kind: input, shape index: {}]   ;;  %s5308_s6 = inlined_call_operand.hbm [shape: f32[1,1024], index: 6, kind: input, shape index: {}]   ;;  %s5309_s7 = inlined_call_operand.vmem [shape: f32[1024,8], index: 7, kind: input, shape index: {}]   ;;  %s5310_s8 = inlined_call_operand.hbm [shape: f32[1,8], index: 8, kind: input, shape index: {}]   ;;  %s5311_s9 = inlined_call_operand.vmem [shape: f32[64,8], index: 9, kind: output, shape index: {}]  }
   0x1   :  { %5318 = sst [smem:[#allocation20_spill]] %s5303_s1 }
   0x2   :  { %5319 = sst [smem:[#allocation21_spill]] %s5305_s3 }
   0x3   :  { %5320 = sst [smem:[#allocation22_spill]] %s5311_s9 }
   0x4   :  { %14 = vsyncpa [#allocation3], 0 }
   0x5   :  { %16 = vsyncpa [#allocation3 + $0x1], 0 }
   0x6   :  { %17 = vsyncpa [#allocation5], 0 }
   0x7   :  { %18 = vsyncpa [#allocation8], 0 }
   0x8   :  { %19 = vsyncpa [#allocation11], 0 }
   0x9   :  { %20 = vsyncpa [#allocation14], 0  ;;  %s4297_s30 = smov 0   ;;  %s4299_s10 = smov 0  }
   0xa   :  { %s4301_s11 = smov 0   ;;  %s4303_s12 = smov 0  }
   0xb LB: > { %s4232_s13 = smov [#allocation4]   ;;  %s5312_s15 = sadd.s32 4294967295, %s4230_s12   ;;  %s4230_s12 = sphi %s4303_s12, %s5339_s12   ;;  %s4226_s11 = sphi %s4301_s11, %s5338_s11   ;;  %s4222_s10 = sphi %s4299_s10, %s5337_s10   ;;  %s4218_s30 = sphi %s4297_s30, %s5336_s30  }
   0xc   : > { %s263_s14 = sshll.u32 %s4232_s13, 4  ;;  %p2759_p0 = scmp.ge.s32.totalorder %s4230_s12, 1  ;;  %s4326_s14 = int_to_ptr.vmem [resolvable:$true] %s263_s14 }
   0xd   : > { %p4321_p1 = scmp.eq.s32.totalorder %s5312_s15, 0  ;;  %p251_p2 = scmp.lt.s32.totalorder %s4230_s12, 3 }
   0xe   : > { %s4233_s18 = smov [#allocation7]   ;;  %s4234_s21 = smov [#allocation10]  }
   0xf   : > { %s5321_s16 = scalar_select %p4321_p1, 1, 0 }
  0x10   : > { %p4328_p3 = pnand %p2759_p0, %p251_p2  ;;  %s287_s19 = sshll.u32 %s4233_s18, 4  ;;  %s4340_s19 = int_to_ptr.vmem [resolvable:$true] %s287_s19 }
  0x11   : > { %s4342_s22 = sshll.u32 %s4234_s21, 4  ;;  %s5324_s1 = sld [smem:[#allocation20_spill]]  ;;  %s312_s22 = int_to_ptr.vmem [resolvable:$true] %s4342_s22 }
  0x12   : > { %s5322_s17 = scalar_select %p4328_p3, 1, 0 }
  0x13   : > { %p3867_p4 = pneg %p4328_p3 }
  0x15   : > { %p4336_p5 = pnand %p3867_p4, %p4321_p1 }
  0x17   : > { %s3954_s25 = scalar_lea.hbm %s5324_s1, 2048  ;;  %p4352_p7 = pneg %p4336_p5 }
  0x18   : > { %p3955_p6 = scmp.ne.s32.totalorder %s5324_s1, %s3954_s25  ;;  %p3961_p10 = scmp.lt.u32.totalorder %s3954_s25, %s5324_s1 }
  0x1a   : > { %p3957_p8 = pnand %p4352_p7, %p3955_p6 }
  0x1c   : > { %p3958_p9 = pneg %p3957_p8 }
  0x1e   : > { %p3963_p11 = pnand %p3961_p10, %p3958_p9 }
  0x20   : > { %3966 = shalt.err (!%p3963_p11)
}
  0x21   : > { %s3967_s18 = scalar_lea.vmem %s4326_s14, 2048  ;;  %p3975_p2 = scmp.lt.s32.totalorder %s4326_s14, %s4326_s14 }
  0x22   : > { %p3968_p12 = scmp.ne.s32.totalorder %s4326_s14, %s3967_s18  ;;  %p3976_p4 = scmp.lt.s32.totalorder %s3967_s18, %s3967_s18 }
  0x24   : > { %p3970_p13 = pnand %p3968_p12, %p4352_p7  ;;  %p3977_p6 = por %p3976_p4, %p3975_p2 }
  0x26   : > { %p3971_p0 = pneg %p3970_p13 }
  0x28   : > { %p3978_p8 = pnand %p3977_p6, %p3971_p0 }
  0x2a   : > { %3981 = shalt.err (!%p3978_p8)
}
  0x2b   : > { %s5313_s21 = smov 128   ;;  %s5317_s23 = smov 8  }
  0x2c   : > { %3870 = dma.hbm_to_vmem [thread:$0]  (!%p4336_p5), %s5324_s1, 2048, %s4326_s14, [#allocation5], %s5313_s21, %s5313_s21, %s5317_s23  }
  0x2d   : > { %s5326_s3 = sld [smem:[#allocation21_spill]] }
  0x33   : > { %s3982_s29 = scalar_lea.hbm %s5326_s3, 8192 }
  0x34   : > { %p3983_p9 = scmp.ne.s32.totalorder %s5326_s3, %s3982_s29  ;;  %p3989_p12 = scmp.lt.u32.totalorder %s3982_s29, %s5326_s3 }
  0x36   : > { %p3985_p10 = pnand %p3983_p9, %p4352_p7 }
  0x38   : > { %p3986_p11 = pneg %p3985_p10 }
  0x3a   : > { %p3991_p13 = pnand %p3989_p12, %p3986_p11 }
  0x3c   : > { %3994 = shalt.err (!%p3991_p13)
}
  0x3d   : > { %s3995_s14 = scalar_lea.vmem %s4340_s19, 8192  ;;  %p4003_p6 = scmp.lt.s32.totalorder %s4340_s19, %s4340_s19 }
  0x3e   : > { %p3996_p0 = scmp.ne.s32.totalorder %s4340_s19, %s3995_s14  ;;  %p4004_p8 = scmp.lt.s32.totalorder %s3995_s14, %s3995_s14 }
  0x40   : > { %p3998_p2 = pnand %p3996_p0, %p4352_p7  ;;  %p4005_p9 = por %p4004_p8, %p4003_p6 }
  0x42   : > { %p3999_p4 = pneg %p3998_p2 }
  0x44   : > { %p4006_p10 = pnand %p4005_p9, %p3999_p4 }
  0x46   : > { %4009 = shalt.err (!%p4006_p10)
}
  0x47   : > { %s4237_s24 = smov 512   ;;  %s4238_s9 = smov 32  }
  0x48   : > { %3876 = dma.hbm_to_vmem [thread:$0]  (!%p4336_p5), %s5326_s3, 8192, %s4340_s19, [#allocation8], %s4237_s24, %s4237_s24, %s4238_s9  }
  0x49   : > { %s4010_s29 = scalar_lea.hbm %s5307_s5, 65536 }
  0x4a   : > { %p4011_p11 = scmp.ne.s32.totalorder %s5307_s5, %s4010_s29  ;;  %p4017_p0 = scmp.lt.u32.totalorder %s4010_s29, %s5307_s5 }
  0x4c   : > { %p4013_p12 = pnand %p4011_p11, %p4352_p7 }
  0x4e   : > { %p4014_p13 = pneg %p4013_p12 }
  0x50   : > { %p4019_p2 = pnand %p4017_p0, %p4014_p13 }
  0x52   : > { %4022 = shalt.err (!%p4019_p2)
}
  0x53   : > { %s4023_s15 = scalar_lea.vmem %s312_s22, 65536  ;;  %p4031_p9 = scmp.lt.s32.totalorder %s312_s22, %s312_s22 }
  0x54   : > { %p4024_p4 = scmp.ne.s32.totalorder %s312_s22, %s4023_s15  ;;  %p4032_p10 = scmp.lt.s32.totalorder %s4023_s15, %s4023_s15 }
  0x56   : > { %p4026_p6 = pnand %p4024_p4, %p4352_p7  ;;  %p4033_p3 = por %p4032_p10, %p4031_p9 }
  0x58   : > { %p4027_p8 = pneg %p4026_p6 }
  0x5a   : > { %p4034_p1 = pnand %p4033_p3, %p4027_p8 }
  0x5c   : > { %4037 = shalt.err (!%p4034_p1)
}
  0x5d   : > { %s4239_s19 = smov 1024   ;;  %s4240_s24 = smov 64  }
  0x5e   : > { %3882 = dma.hbm_to_vmem [thread:$0]  (!%p4336_p5), %s5307_s5, 65536, %s312_s22, [#allocation11], %s4239_s19, %s4239_s19, %s4240_s24  }
  0x5f   : > { %s4241_s25 = smov [#allocation6]   ;;  %s4242_s27 = smov [#allocation9]  }
  0x60   : > { %s277_s26 = sshll.u32 %s4241_s25, 4  ;;  %s301_s29 = sshll.u32 %s4242_s27, 4  ;;  %s278_s26 = int_to_ptr.vmem [resolvable:$true] %s277_s26  ;;  %s302_s29 = int_to_ptr.vmem [resolvable:$true] %s301_s29 }
  0x61   : > { %s4038_s14 = scalar_lea.hbm %s5304_s2, 16 }
  0x62   : > { %p4039_p1 = scmp.ne.s32.totalorder %s5304_s2, %s4038_s14  ;;  %p4045_p12 = scmp.lt.u32.totalorder %s4038_s14, %s5304_s2 }
  0x64   : > { %p4041_p3 = pnand %p4039_p1, %p4352_p7 }
  0x66   : > { %p4042_p11 = pneg %p4041_p3 }
  0x68   : > { %p4047_p13 = pnand %p4045_p12, %p4042_p11 }
  0x6a   : > { %4050 = shalt.err (!%p4047_p13)
}
  0x6b   : > { %s4051_s22 = scalar_lea.vmem %s278_s26, 16  ;;  %s4058_s19 = scalar_lea.vmem %s278_s26, 32 }
  0x6c   : > { %p4052_p0 = scmp.ne.s32.totalorder %s278_s26, %s4051_s22  ;;  %p4059_p6 = scmp.lt.s32.totalorder %s278_s26, %s278_s26 }
  0x6d   : > { %p4060_p8 = scmp.lt.s32.totalorder %s4058_s19, %s4051_s22 }
  0x6e   : > { %p4054_p2 = pnand %p4052_p0, %p4352_p7 }
  0x6f   : > { %p4061_p9 = por %p4060_p8, %p4059_p6 }
  0x70   : > { %p4055_p4 = pneg %p4054_p2 }
  0x72   : > { %p4062_p10 = pnand %p4061_p9, %p4055_p4 }
  0x74   : > { %4065 = shalt.err (!%p4062_p10)
}
  0x75   : > { %3873 = dma.hbm_to_vmem [thread:$0]  (!%p4336_p5), %s5304_s2, 16, %s278_s26, [#allocation5]  }
  0x76   : > { %s4066_s21 = scalar_lea.hbm %s5306_s4, 64 }
  0x77   : > { %p4067_p1 = scmp.ne.s32.totalorder %s5306_s4, %s4066_s21  ;;  %p4073_p12 = scmp.lt.u32.totalorder %s4066_s21, %s5306_s4 }
  0x79   : > { %p4069_p3 = pnand %p4067_p1, %p4352_p7 }
  0x7b   : > { %p4070_p11 = pneg %p4069_p3 }
  0x7d   : > { %p4075_p13 = pnand %p4073_p12, %p4070_p11 }
  0x7f   : > { %4078 = shalt.err (!%p4075_p13)
}
  0x80   : > { %s4079_s18 = scalar_lea.vmem %s302_s29, 64  ;;  %p4087_p6 = scmp.lt.s32.totalorder %s302_s29, %s302_s29 }
  0x81   : > { %p4080_p0 = scmp.ne.s32.totalorder %s302_s29, %s4079_s18  ;;  %p4088_p8 = scmp.lt.s32.totalorder %s4079_s18, %s4079_s18 }
  0x83   : > { %p4082_p2 = pnand %p4080_p0, %p4352_p7  ;;  %p4089_p9 = por %p4088_p8, %p4087_p6 }
  0x85   : > { %p4083_p4 = pneg %p4082_p2 }
  0x87   : > { %p4090_p10 = pnand %p4089_p9, %p4083_p4 }
  0x89   : > { %4093 = shalt.err (!%p4090_p10)
}
  0x8a   : > { %3879 = dma.hbm_to_vmem [thread:$0]  (!%p4336_p5), %s5306_s4, 64, %s302_s29, [#allocation8]  }
  0x8b   : > { %s4243_s15 = smov [#allocation12]   ;;  %s4244_s19 = smov [#allocation13]  }
  0x8c   : > { %s325_s22 = sshll.u32 %s4243_s15, 4  ;;  %s339_s23 = sshll.u32 %s4244_s19, 4  ;;  %s326_s22 = int_to_ptr.vmem [resolvable:$true] %s325_s22  ;;  %s340_s23 = int_to_ptr.vmem [resolvable:$true] %s339_s23 }
  0x8d   : > { %s4094_s3 = scalar_lea.hbm %s5308_s6, 128 }
  0x8e   : > { %p4095_p1 = scmp.ne.s32.totalorder %s5308_s6, %s4094_s3  ;;  %p4101_p12 = scmp.lt.u32.totalorder %s4094_s3, %s5308_s6 }
  0x90   : > { %p4097_p3 = pnand %p4095_p1, %p4352_p7 }
  0x92   : > { %p4098_p11 = pneg %p4097_p3 }
  0x94   : > { %p4103_p13 = pnand %p4101_p12, %p4098_p11 }
  0x96   : > { %4106 = shalt.err (!%p4103_p13)
}
  0x97   : > { %s4107_s29 = scalar_lea.vmem %s326_s22, 128  ;;  %p4115_p6 = scmp.lt.s32.totalorder %s326_s22, %s326_s22 }
  0x98   : > { %p4108_p0 = scmp.ne.s32.totalorder %s326_s22, %s4107_s29  ;;  %p4116_p8 = scmp.lt.s32.totalorder %s4107_s29, %s4107_s29 }
  0x9a   : > { %p4110_p2 = pnand %p4108_p0, %p4352_p7  ;;  %p4117_p9 = por %p4116_p8, %p4115_p6 }
  0x9c   : > { %p4111_p4 = pneg %p4110_p2 }
  0x9e   : > { %p4118_p10 = pnand %p4117_p9, %p4111_p4 }
  0xa0   : > { %4121 = shalt.err (!%p4118_p10)
}
  0xa1   : > { %3885 = dma.hbm_to_vmem [thread:$0]  (!%p4336_p5), %s5308_s6, 128, %s326_s22, [#allocation11]  }
  0xa2   : > { %s4122_s15 = scalar_lea.hbm %s5310_s8, 16 }
  0xa3   : > { %p4123_p1 = scmp.ne.s32.totalorder %s5310_s8, %s4122_s15  ;;  %p4129_p12 = scmp.lt.u32.totalorder %s4122_s15, %s5310_s8 }
  0xa5   : > { %p4125_p3 = pnand %p4123_p1, %p4352_p7 }
  0xa7   : > { %p4126_p11 = pneg %p4125_p3 }
  0xa9   : > { %p4131_p13 = pnand %p4129_p12, %p4126_p11 }
  0xab   : > { %4134 = shalt.err (!%p4131_p13)
}
  0xac   : > { %s4135_s21 = scalar_lea.vmem %s340_s23, 16  ;;  %s4142_s22 = scalar_lea.vmem %s340_s23, 32 }
  0xad   : > { %p4136_p0 = scmp.ne.s32.totalorder %s340_s23, %s4135_s21  ;;  %p4143_p6 = scmp.lt.s32.totalorder %s340_s23, %s340_s23 }
  0xae   : > { %p4144_p8 = scmp.lt.s32.totalorder %s4142_s22, %s4135_s21 }
  0xaf   : > { %p4138_p2 = pnand %p4136_p0, %p4352_p7 }
  0xb0   : > { %p4145_p9 = por %p4144_p8, %p4143_p6 }
  0xb1   : > { %p4139_p4 = pneg %p4138_p2 }
  0xb3   : > { %p4146_p10 = pnand %p4145_p9, %p4139_p4 }
  0xb5   : > { %4149 = shalt.err (!%p4146_p10)
}
  0xb6   : > { %3888 = dma.hbm_to_vmem [thread:$0]  (!%p4336_p5), %s5310_s8, 16, %s340_s23, [#allocation14]  }
  0xb7   : > { %s4491_s28 = sadd.s32 1, %s4230_s12   ;;  %s33_s27 = sadd.s32 1, %s4226_s11 }
  0xb8   : > { %s30_s20 = ssub.s32 %s4230_s12, %s4491_s28  ;;  %p40_p1 = scmp.ne.s32.totalorder %s4226_s11, %s4222_s10 }
  0xb9   : > { %p31_p7 = scmp.eq.s32.totalorder %s30_s20, 0  ;;  %p41_p3 = scmp.eq.s32.totalorder %s4230_s12, 0 }
  0xba   : > { %p46_p11 = scmp.ne.s32.totalorder %s4222_s10, %s4218_s30  ;;  %p5327_p13 = scmp.ne.s32.totalorder %s5321_s16, 0 }
  0xbb   : > { %s4502_s29 = scalar_select %p31_p7, %s4226_s11, %s33_s27  }
  0xbc   : > { %p42_p12 = por %p41_p3, %p40_p1  ;;  %p4506_p0 = por %p5327_p13, %p46_p11 }
  0xbd   : > { %p3900_p2 = scmp.lt.s32.totalorder %s4230_s12, 2  ;;  %s350_s18 = sand.u32 1, %s4226_s11  }
  0xbe   : > { %s2768_s23 = sshll.u32 %s350_s18, 5  ;;  %s2786_s26 = sshll.u32 %s4230_s12, 9 }
  0xbf   : > { %s4516_s19 = scalar_lea.hbm %s5302_s0, %s2786_s26  ;;  %s354_s30 = scalar_lea.vmem [#allocation2], %s2768_s23 }
  0xc0   : > { %s361_s24 = sshll.u32 %s354_s30, 4  ;;  %p4520_p5 = pnand %p3900_p2, %p42_p12  ;;  %s4518_s24 = int_to_ptr.vmem [resolvable:$true] %s361_s24 }
  0xc1   : > { %s4524_s3 = scalar_lea.sflag [#allocation3], %s350_s18  ;;  %s4150_s21 = scalar_lea.hbm %s4516_s19, 512 }
  0xc2   : > { %p4151_p4 = scmp.ne.s32.totalorder %s4516_s19, %s4150_s21  ;;  %p4152_p6 = pneg %p4520_p5 }
  0xc3   : > { %s4155_s25 = scalar_lea.hbm %s5302_s0, 1024  ;;  %p4156_p10 = scmp.lt.u32.totalorder %s4516_s19, %s5302_s0 }
  0xc4   : > { %p4153_p8 = pnand %p4152_p6, %p4151_p4  ;;  %p4157_p7 = scmp.lt.u32.totalorder %s4155_s25, %s4150_s21 }
  0xc5   : > { %p4159_p3 = scmp.lt.u32.totalorder %s4150_s21, %s4516_s19 }
  0xc6   : > { %p4154_p9 = pneg %p4153_p8  ;;  %p4158_p1 = por %p4157_p7, %p4156_p10 }
  0xc8   : > { %p4160_p11 = por %p4159_p3, %p4158_p1 }
  0xca   : > { %p4161_p12 = pnand %p4160_p11, %p4154_p9 }
  0xcc   : > { %4164 = shalt.err (!%p4161_p12)
}
  0xcd   : > { %s4165_s18 = scalar_lea.vmem %s4518_s24, 512  ;;  %s4245_s23 = smov [#allocation2]  }
  0xce   : > { %p4166_p13 = scmp.ne.s32.totalorder %s4518_s24, %s4165_s18  ;;  %s4170_s26 = sshll.u32 %s4245_s23, 4  ;;  %s4171_s26 = int_to_ptr.vmem [resolvable:$false] %s4170_s26 }
  0xcf   : > { %s4172_s14 = scalar_lea.vmem %s4171_s26, 1024  ;;  %p4173_p8 = scmp.lt.s32.totalorder %s4518_s24, %s4171_s26 }
  0xd0   : > { %p4168_p2 = pnand %p4166_p13, %p4152_p6  ;;  %p4174_p10 = scmp.lt.s32.totalorder %s4172_s14, %s4165_s18 }
  0xd2   : > { %p4169_p4 = pneg %p4168_p2  ;;  %p4175_p7 = por %p4174_p10, %p4173_p8 }
  0xd4   : > { %p4176_p1 = pnand %p4175_p7, %p4169_p4 }
  0xd6   : > { %4179 = shalt.err (!%p4176_p1)
}
  0xd7   : > { %s5330_s15 = smov 8   ;;  %s5331_s30 = smov 128  }
  0xd8   : > { %3892 = dma.hbm_to_vmem [thread:$0]  (!%p4520_p5), %s4516_s19, 512, %s4518_s24, %s4524_s3, %s5331_s30, %s5331_s30, %s5330_s15  }
  0xd9   : > { %p5332_p6 = scmp.ne.s32.totalorder %s5322_s17, 0 }
  0xda   : > { %s375_s21 = sand.u32 (!%p5332_p6), 1, %s4222_s10  }
  0xdb   : > { %373 = sbr.rel (%p5332_p6) target bundleno = 1371 (0x55b), region = 56  ;;  %s2772_s22 = sshll.u32 (!%p5332_p6), %s375_s21, 5 }
  0xdc   : > { %s376_s9 = scalar_lea.sflag (!%p5332_p6), [#allocation3], %s375_s21  ;;  %s4558_s25 = scalar_lea.vmem (!%p5332_p6), [#allocation2], %s2772_s22 }
  0xe2   : > { %4197 = dma.done.wait (%p4506_p0), %s376_s9, 512  }
  0xe3   : > { %4199 = vsyncadd (%p4506_p0), %s376_s9, 4294966784  ;;  %p5333_p9 = scmp.ne.s32.totalorder %s5321_s16, 0 }
  0xe5   : > { %4201 = dma.done.wait (%p5333_p9), [#allocation5], 2064  }
  0xe6   : > { %4203 = vsyncadd (%p5333_p9), [#allocation5], 4294965232 }
  0xe7   : > { %4205 = dma.done.wait (%p5333_p9), [#allocation8], 8256  }
  0xe8   : > { %4207 = vsyncadd (%p5333_p9), [#allocation8], 4294959040 }
  0xe9   : > { %4209 = dma.done.wait (%p5333_p9), [#allocation11], 65664  }
  0xea   : > { %4211 = vsyncadd (%p5333_p9), [#allocation11], 4294901632 }
  0xeb   : > { %4213 = dma.done.wait (%p5333_p9), [#allocation14], 16  }
  0xec   : > { %4215 = vsyncadd (%p5333_p9), [#allocation14], 4294967280  ;;  %v453_v0 = vld [vmem:[#allocation4] sm:$0xff]  ;;  %v454_v1 = vld [vmem:[#allocation4 + $0x8] sm:$0xff]  ;;  %s5334_s18 = sadd.s32 4294967295, %s4230_s12   ;;  %s5335_s30 = sld [smem:[#allocation22_spill]] }
  0xed   : > { %v455_v2 = vld [vmem:[#allocation4 + $0x10] sm:$0xff]  ;;  %v3021_v3 = vpack.c.bf16 %v454_v1, %v453_v0  ;;  %v456_v4 = vld [vmem:[#allocation4 + $0x18] sm:$0xff]  ;;  %v457_v6 = vld [vmem:[#allocation4 + $0x20] sm:$0xff]  ;;  %s2780_s23 = sshll.u32 %s5334_s18, 2  ;;  %vm2618_vm0 = vcmask 64512  }
  0xee   : > { %v3025_v5 = vpack.c.bf16 %v456_v4, %v455_v2  ;;  %v458_v7 = vld [vmem:[#allocation4 + $0x28] sm:$0xff]  ;;  %v449_v9 = vld [vmem:[%s4558_s25] sm:$0xff]  ;;  %v459_v10 = vld [vmem:[#allocation4 + $0x30] sm:$0xff]  ;;  %p444_p0 = scmp.lt.s32.totalorder %s2780_s23, 7 }
  0xef   : > { %3022 = vmatprep.subr.bf16.mxu0 %v3021_v3  ;;  %v3029_v8 = vpack.c.bf16 %v458_v7, %v457_v6  ;;  %v460_v11 = vld [vmem:[#allocation4 + $0x38] sm:$0xff]  ;;  %3015 = vmatprep.mubr.f32.mxu0 %v449_v9  ;;  %v566_v12 = vld [vmem:[#allocation7 + $0x8] sm:$0xff]  ;;  %v565_v15 = vld [vmem:[#allocation7] sm:$0xff] }
  0xf0   : > { %3024 = vmatpush3.bf16.msra.mxu0 %v3021_v3  ;;  %v570_v13 = vld [vmem:[#allocation7 + $0x28] sm:$0xff]  ;;  %v569_v16 = vld [vmem:[#allocation7 + $0x20] sm:$0xff]  ;;  %v3033_v17 = vpack.c.bf16 %v460_v11, %v459_v10  ;;  %v464_v34 = vld [vmem:[#allocation4 + $0x58] sm:$0xff]  ;;  %s5341_s23 = smov (!%p444_p0, %s2780_s23), 7 }
  0xf1   : > { %3026 = vmatprep.subr.bf16.mxu0 %v3025_v5  ;;  %v3053_v14 = vpack.c.bf16 %v570_v13, %v566_v12  ;;  %v3055_v18 = vpack.c.bf16 %v569_v16, %v565_v15  ;;  %v574_v19 = vld [vmem:[#allocation7 + $0x48] sm:$0xff]  ;;  %v461_v21 = vld [vmem:[#allocation4 + $0x40] sm:$0xff]  ;;  %v468_v54 = vld [vmem:[#allocation4 + $0x78] sm:$0xff]  ;;  %s2781_s26 = sshll.u32 %s5341_s23, 3 }
  0xf2   : > { %v578_v20 = vld [vmem:[#allocation7 + $0x68] sm:$0xff]  ;;  %v573_v24 = vld [vmem:[#allocation7 + $0x40] sm:$0xff]  ;;  %v568_v62 = vld [vmem:[#allocation7 + $0x18] sm:$0xff]  ;;  %s447_s21 = scalar_lea.vmem %s5335_s30, %s2781_s26 }
  0xf3   : > { %v462_v22 = vld [vmem:[#allocation4 + $0x48] sm:$0xff]  ;;  %3054 = vmatprep.subr.bf16.mxu1 %v3053_v14  ;;  %v3057_v23 = vpack.c.bf16 %v578_v20, %v574_v19  ;;  %v463_v33 = vld [vmem:[#allocation4 + $0x50] sm:$0xff]  ;;  %v465_v44 = vld [vmem:[#allocation4 + $0x60] sm:$0xff] }
  0xf4   : > { %3028 = vmatpush3.bf16.msra.mxu0 %v3025_v5  ;;  %3056 = vmatpush1.bf16.msra.mxu1 %v3055_v18  ;;  %v577_v25 = vld [vmem:[#allocation7 + $0x60] sm:$0xff]  ;;  %v582_v27 = vld [vmem:[#allocation7 + $0x88] sm:$0xff]  ;;  %v3037_v29 = vpack.c.bf16 %v462_v22, %v461_v21  ;;  %v3041_v41 = vpack.c.bf16 %v464_v34, %v463_v33  ;;  %v572_v63 = vld [vmem:[#allocation7 + $0x38] sm:$0xff] }
  0xf5   : > { %3030 = vmatprep.subr.bf16.mxu0 %v3029_v8  ;;  %3058 = vmatprep.subr.bf16.mxu1 %v3057_v23  ;;  %v3059_v26 = vpack.c.bf16 %v577_v25, %v573_v24  ;;  %v586_v28 = vld [vmem:[#allocation7 + $0xa8] sm:$0xff]  ;;  %v581_v31 = vld [vmem:[#allocation7 + $0x80] sm:$0xff]  ;;  %v3085_v4 = vpack.c.bf16 %v572_v63, %v568_v62  ;;  %v567_v5 = vld [vmem:[#allocation7 + $0x10] sm:$0xff] }
  0xf6   : > { %v3061_v30 = vpack.c.bf16 %v586_v28, %v582_v27  ;;  %v585_v32 = vld [vmem:[#allocation7 + $0xa0] sm:$0xff]  ;;  %v590_v35 = vld [vmem:[#allocation7 + $0xc8] sm:$0xff]  ;;  %v571_v6 = vld [vmem:[#allocation7 + $0x30] sm:$0xff] }
  0xf7   : > { %v3063_v36 = vpack.c.bf16 %v585_v32, %v581_v31  ;;  %v594_v37 = vld [vmem:[#allocation7 + $0xe8] sm:$0xff]  ;;  %v589_v39 = vld [vmem:[#allocation7 + $0xc0] sm:$0xff]  ;;  %v576_v7 = vld [vmem:[#allocation7 + $0x58] sm:$0xff]  ;;  %v3087_v11 = vpack.c.bf16 %v571_v6, %v567_v5 }
  0xf8   : > { %3032 = vmatpush3.bf16.msra.mxu0 %v3029_v8  ;;  %3060 = vmatpush1.bf16.msra.mxu1 %v3059_v26  ;;  %v3065_v38 = vpack.c.bf16 %v594_v37, %v590_v35  ;;  %v593_v40 = vld [vmem:[#allocation7 + $0xe0] sm:$0xff]  ;;  %v598_v42 = vld [vmem:[#allocation7 + $0x108] sm:$0xff]  ;;  %v580_v8 = vld [vmem:[#allocation7 + $0x78] sm:$0xff] }
  0xf9   : > { %3034 = vmatprep.subr.bf16.mxu0 %v3033_v17  ;;  %3062 = vmatprep.subr.bf16.mxu1 %v3061_v30  ;;  %v602_v43 = vld [vmem:[#allocation7 + $0x128] sm:$0xff]  ;;  %v3067_v46 = vpack.c.bf16 %v593_v40, %v589_v39  ;;  %v597_v48 = vld [vmem:[#allocation7 + $0x100] sm:$0xff]  ;;  %v3089_v13 = vpack.c.bf16 %v580_v8, %v576_v7  ;;  %v575_v14 = vld [vmem:[#allocation7 + $0x50] sm:$0xff] }
  0xfa   : > { %v466_v45 = vld [vmem:[#allocation4 + $0x68] sm:$0xff]  ;;  %v3069_v47 = vpack.c.bf16 %v602_v43, %v598_v42  ;;  %v467_v53 = vld [vmem:[#allocation4 + $0x70] sm:$0xff]  ;;  %v584_v16 = vld [vmem:[#allocation7 + $0x98] sm:$0xff] }
  0xfb   : > { %v601_v49 = vld [vmem:[#allocation7 + $0x120] sm:$0xff]  ;;  %v3045_v50 = vpack.c.bf16 %v466_v45, %v465_v44  ;;  %v606_v51 = vld [vmem:[#allocation7 + $0x148] sm:$0xff]  ;;  %v3049_v59 = vpack.c.bf16 %v468_v54, %v467_v53  ;;  %v579_v15 = vld [vmem:[#allocation7 + $0x70] sm:$0xff] }
  0xfc   : > { %3036 = vmatpush3.bf16.msra.mxu0 %v3033_v17  ;;  %3064 = vmatpush1.bf16.msra.mxu1 %v3063_v36  ;;  %v610_v52 = vld [vmem:[#allocation7 + $0x168] sm:$0xff]  ;;  %v3071_v55 = vpack.c.bf16 %v601_v49, %v597_v48  ;;  %v605_v57 = vld [vmem:[#allocation7 + $0x140] sm:$0xff]  ;;  %v588_v17 = vld [vmem:[#allocation7 + $0xb8] sm:$0xff]  ;;  %v3091_v19 = vpack.c.bf16 %v579_v15, %v575_v14 }
  0xfd   : > { %3038 = vmatprep.subr.bf16.mxu0 %v3037_v29  ;;  %3066 = vmatprep.subr.bf16.mxu1 %v3065_v38  ;;  %v3073_v56 = vpack.c.bf16 %v610_v52, %v606_v51  ;;  %v609_v58 = vld [vmem:[#allocation7 + $0x160] sm:$0xff]  ;;  %v614_v60 = vld [vmem:[#allocation7 + $0x188] sm:$0xff]  ;;  %v452_v18 = vld [vmem:[%s4558_s25 + $0x18] sm:$0xff]  ;;  %v3093_v20 = vpack.c.bf16 %v588_v17, %v584_v16 }
  0xfe   : > { %v618_v61 = vld [vmem:[#allocation7 + $0x1a8] sm:$0xff]  ;;  %v3075_v0 = vpack.c.bf16 %v609_v58, %v605_v57  ;;  %v613_v2 = vld [vmem:[#allocation7 + $0x180] sm:$0xff]  ;;  %v583_v21 = vld [vmem:[#allocation7 + $0x90] sm:$0xff] }
  0xff   : > { %v3077_v1 = vpack.c.bf16 %v618_v61, %v614_v60  ;;  %v617_v3 = vld [vmem:[#allocation7 + $0x1a0] sm:$0xff]  ;;  %v451_v12 = vld [vmem:[%s4558_s25 + $0x10] sm:$0xff]  ;;  %v592_v23 = vld [vmem:[#allocation7 + $0xd8] sm:$0xff]  ;;  %v4246_v60 = vmov 0.0  }
 0x100   : > { %3040 = vmatpush3.bf16.msra.mxu0 %v3037_v29  ;;  %3068 = vmatpush1.bf16.msra.mxu1 %v3067_v46  ;;  %v3079_v9 = vpack.c.bf16 %v617_v3, %v613_v2  ;;  %v450_v10 = vld [vmem:[%s4558_s25 + $0x8] sm:$0xff]  ;;  %v587_v22 = vld [vmem:[#allocation7 + $0xb0] sm:$0xff]  ;;  %v596_v24 = vld [vmem:[#allocation7 + $0xf8] sm:$0xff] }
 0x101   : > { %3042 = vmatprep.subr.bf16.mxu0 %v3041_v41  ;;  %3070 = vmatprep.subr.bf16.mxu1 %v3069_v47  ;;  %v3095_v25 = vpack.c.bf16 %v587_v22, %v583_v21  ;;  %v3097_v26 = vpack.c.bf16 %v596_v24, %v592_v23  ;;  %v591_v27 = vld [vmem:[#allocation7 + $0xd0] sm:$0xff]  ;;  %v600_v29 = vld [vmem:[#allocation7 + $0x118] sm:$0xff]  ;;  %v622_v48 = vld [vmem:[#allocation7 + $0x1c8] sm:$0xff] }
 0x102   : > { %v595_v28 = vld [vmem:[#allocation7 + $0xf0] sm:$0xff]  ;;  %v604_v30 = vld [vmem:[#allocation7 + $0x138] sm:$0xff]  ;;  %v626_v49 = vld [vmem:[#allocation7 + $0x1e8] sm:$0xff]  ;;  %715 = vmatprep.mubr.f32.mxu1 %v4246_v60 }
 0x103   : > { %v3099_v31 = vpack.c.bf16 %v595_v28, %v591_v27  ;;  %v3101_v32 = vpack.c.bf16 %v604_v30, %v600_v29  ;;  %v599_v33 = vld [vmem:[#allocation7 + $0x110] sm:$0xff]  ;;  %v608_v35 = vld [vmem:[#allocation7 + $0x158] sm:$0xff]  ;;  %v3081_v51 = vpack.c.bf16 %v626_v49, %v622_v48  ;;  %v621_v53 = vld [vmem:[#allocation7 + $0x1c0] sm:$0xff] }
 0x104   : > { %3044 = vmatpush3.bf16.msra.mxu0 %v3041_v41  ;;  %3072 = vmatpush1.bf16.msra.mxu1 %v3071_v55  ;;  %v603_v34 = vld [vmem:[#allocation7 + $0x130] sm:$0xff]  ;;  %v612_v36 = vld [vmem:[#allocation7 + $0x178] sm:$0xff]  ;;  %v625_v55 = vld [vmem:[#allocation7 + $0x1e0] sm:$0xff] }
 0x105   : > { %3046 = vmatprep.subr.bf16.mxu0 %v3045_v50  ;;  %3074 = vmatprep.subr.bf16.mxu1 %v3073_v56  ;;  %v3103_v37 = vpack.c.bf16 %v603_v34, %v599_v33  ;;  %v3105_v38 = vpack.c.bf16 %v612_v36, %v608_v35  ;;  %v607_v39 = vld [vmem:[#allocation7 + $0x150] sm:$0xff]  ;;  %v616_v41 = vld [vmem:[#allocation7 + $0x198] sm:$0xff]  ;;  %v3083_v58 = vpack.c.bf16 %v625_v55, %v621_v53  ;;  %v845_v5 = vld [vmem:[#allocation10] sm:$0xff] }
 0x106   : > { %v611_v40 = vld [vmem:[#allocation7 + $0x170] sm:$0xff]  ;;  %v620_v42 = vld [vmem:[#allocation7 + $0x1b8] sm:$0xff]  ;;  %v853_v6 = vld [vmem:[#allocation10 + $0x40] sm:$0xff] }
 0x107   : > { %v3107_v43 = vpack.c.bf16 %v611_v40, %v607_v39  ;;  %v3109_v44 = vpack.c.bf16 %v620_v42, %v616_v41  ;;  %v615_v45 = vld [vmem:[#allocation7 + $0x190] sm:$0xff]  ;;  %v628_v52 = vld [vmem:[#allocation7 + $0x1f8] sm:$0xff]  ;;  %v869_v21 = vld [vmem:[#allocation10 + $0xc0] sm:$0xff] }
 0x108   : > { %3048 = vmatpush3.bf16.msra.mxu0 %v3045_v50  ;;  %3076 = vmatpush1.bf16.msra.mxu1 %v3075_v0  ;;  %v619_v46 = vld [vmem:[#allocation7 + $0x1b0] sm:$0xff]  ;;  %v624_v50 = vld [vmem:[#allocation7 + $0x1d8] sm:$0xff]  ;;  %v877_v35 = vld [vmem:[#allocation10 + $0x100] sm:$0xff] }
 0x109   : > { %3050 = vmatprep.subr.bf16.mxu0 %v3049_v59  ;;  %3078 = vmatprep.subr.bf16.mxu1 %v3077_v1  ;;  %v3111_v47 = vpack.c.bf16 %v619_v46, %v615_v45  ;;  %v3113_v54 = vpack.c.bf16 %v628_v52, %v624_v50  ;;  %v623_v56 = vld [vmem:[#allocation7 + $0x1d0] sm:$0xff]  ;;  %v848_v63 = vld [vmem:[#allocation10 + $0x18] sm:$0xff]  ;;  %v885_v36 = vld [vmem:[#allocation10 + $0x140] sm:$0xff] }
 0x10a   : > { %v627_v57 = vld [vmem:[#allocation7 + $0x1f0] sm:$0xff]  ;;  %v856_v1 = vld [vmem:[#allocation10 + $0x58] sm:$0xff]  ;;  %v893_v49 = vld [vmem:[#allocation10 + $0x180] sm:$0xff] }
 0x10b   : > { %v846_v61 = vld [vmem:[#allocation10 + $0x8] sm:$0xff]  ;;  %v3245_v2 = vpack.c.bf16 %v856_v1, %v848_v63  ;;  %v2782_v3 = vld [vmem:[#allocation6] ss:$0 sm:$0xff]  ;;  %v847_v8 = vld [vmem:[#allocation10 + $0x10] sm:$0xff] }
 0x10c   : > { %3052 = vmatpush3.bf16.msra.mxu0 %v3049_v59  ;;  %3080 = vmatpush1.bf16.msra.mxu1 %v3079_v9  ;;  %v3115_v59 = vpack.c.bf16 %v627_v57, %v623_v56  ;;  %v854_v62 = vld [vmem:[#allocation10 + $0x48] sm:$0xff]  ;;  %v855_v9 = vld [vmem:[#allocation10 + $0x50] sm:$0xff]  ;;  %v872_v14 = vld [vmem:[#allocation10 + $0xd8] sm:$0xff] }
 0x10d   : > { %3086 = vmatprep.subr.bf16.mxu0 %v3085_v4  ;;  %3082 = vmatprep.subr.bf16.mxu1 %v3081_v51  ;;  %v3117_v0 = vpack.c.bf16 %v854_v62, %v846_v61  ;;  %v878_v27 = vld [vmem:[#allocation10 + $0x108] sm:$0xff]  ;;  %v880_v30 = vld [vmem:[#allocation10 + $0x118] sm:$0xff]  ;;  %v879_v39 = vld [vmem:[#allocation10 + $0x110] sm:$0xff] }
 0x10e   : > { %v886_v29 = vld [vmem:[#allocation10 + $0x148] sm:$0xff]  ;;  %v887_v40 = vld [vmem:[#allocation10 + $0x150] sm:$0xff]  ;;  %v896_v45 = vld [vmem:[#allocation10 + $0x198] sm:$0xff] }
 0x10f   : > { %3016 = vmatmul.mubr.f32.vlgmr.msra.gmra.mrb[0].mxu0 %v450_v10  ;;  %v862_v10 = vld [vmem:[#allocation10 + $0x88] sm:$0xff]  ;;  %v904_v46 = vld [vmem:[#allocation10 + $0x1d8] sm:$0xff]  ;;  %v3255_v48 = vpack.c.bf16 %v887_v40, %v879_v39  ;;  %v901_v50 = vld [vmem:[#allocation10 + $0x1c0] sm:$0xff] }
 0x110   : > { %3018 = vmatprep.mubr.f32.mxu0 %v451_v12  ;;  %3088 = vmatpush1.bf16.msra.mxu0 %v3087_v11  ;;  %v870_v12 = vld [vmem:[#allocation10 + $0xc8] sm:$0xff]  ;;  %v3257_v52 = vpack.c.bf16 %v904_v46, %v896_v45  ;;  %v895_v53 = vld [vmem:[#allocation10 + $0x190] sm:$0xff]  ;;  %v3131_v61 = vpack.c.bf16 %v901_v50, %v893_v49  ;;  %v909_v63 = vld [vmem:[#allocation10 + $0x200] sm:$0xff] }
 0x111   : > { %3090 = vmatprep.subr.bf16.mxu0 %v3089_v13  ;;  %3084 = vmatpush1.bf16.msra.mxu1 %v3083_v58  ;;  %v864_v13 = vld [vmem:[#allocation10 + $0x98] sm:$0xff]  ;;  %v3121_v23 = vpack.c.bf16 %v870_v12, %v862_v10  ;;  %v894_v41 = vld [vmem:[#allocation10 + $0x188] sm:$0xff]  ;;  %v925_v10 = vld [vmem:[#allocation10 + $0x280] sm:$0xff] }
 0x112   : > { %3118 = vmatprep.subr.bf16.mxu1 %v3117_v0  ;;  %v3249_v24 = vpack.c.bf16 %v872_v14, %v864_v13  ;;  %v910_v55 = vld [vmem:[#allocation10 + $0x208] sm:$0xff]  ;;  %v912_v58 = vld [vmem:[#allocation10 + $0x218] sm:$0xff]  ;;  %v917_v0 = vld [vmem:[#allocation10 + $0x240] sm:$0xff] }
 0x113   : > { %3019 = vmatmul.mubr.f32.gmra.mrb[2].mxu0 %v452_v18  ;;  %v3119_v18 = vpack.c.bf16 %v853_v6, %v845_v5  ;;  %v918_v57 = vld [vmem:[#allocation10 + $0x248] sm:$0xff]  ;;  %v927_v14 = vld [vmem:[#allocation10 + $0x290] sm:$0xff]  ;;  %v973_v46 = vld [vmem:[#allocation10 + $0x400] sm:$0xff] }
 0x114   : > { %3092 = vmatpush1.bf16.msra.mxu0 %v3091_v19  ;;  %804 = vmatprep.mubr.f32.mxu0 %v4246_v60  ;;  %v3247_v19 = vpack.c.bf16 %v855_v9, %v847_v8  ;;  %v3133_v1 = vpack.c.bf16 %v918_v57, %v910_v55  ;;  %v926_v5 = vld [vmem:[#allocation10 + $0x288] sm:$0xff]  ;;  %v936_v8 = vld [vmem:[#allocation10 + $0x2d8] sm:$0xff]  ;;  %v967_v39 = vld [vmem:[#allocation10 + $0x3d0] sm:$0xff] }
 0x115   : > { %3094 = vmatprep.subr.bf16.mxu0 %v3093_v20  ;;  %v861_v20 = vld [vmem:[#allocation10 + $0x80] sm:$0xff]  ;;  %v934_v6 = vld [vmem:[#allocation10 + $0x2c8] sm:$0xff]  ;;  %v975_v50 = vld [vmem:[#allocation10 + $0x410] sm:$0xff] }
 0x116   : > { %v3123_v33 = vpack.c.bf16 %v869_v21, %v861_v20  ;;  %v3137_v12 = vpack.c.bf16 %v934_v6, %v926_v5  ;;  %v974_v40 = vld [vmem:[#allocation10 + $0x408] sm:$0xff]  ;;  %v1000_v55 = vld [vmem:[#allocation10 + $0x4d8] sm:$0xff] }
 0x118   : > { %3096 = vmatpush1.bf16.msra.mxu0 %v3095_v25  ;;  %v863_v25 = vld [vmem:[#allocation10 + $0x90] sm:$0xff] }
 0x119   : > { %3098 = vmatprep.subr.bf16.mxu0 %v3097_v26  ;;  %v871_v26 = vld [vmem:[#allocation10 + $0xd0] sm:$0xff] }
 0x11a   : > { %v3251_v34 = vpack.c.bf16 %v871_v26, %v863_v25  ;;  %v943_v26 = vld [vmem:[#allocation10 + $0x310] sm:$0xff] }
 0x11c   : > { %3100 = vmatpush1.bf16.msra.mxu0 %v3099_v31  ;;  %v888_v31 = vld [vmem:[#allocation10 + $0x158] sm:$0xff] }
 0x11d   : > { %3102 = vmatprep.subr.bf16.mxu0 %v3101_v32 }
 0x120   : > { %3104 = vmatpush1.bf16.msra.mxu0 %v3103_v37  ;;  %v3125_v37 = vpack.c.bf16 %v886_v29, %v878_v27  ;;  %v951_v27 = vld [vmem:[#allocation10 + $0x350] sm:$0xff]  ;;  %v966_v29 = vld [vmem:[#allocation10 + $0x3c8] sm:$0xff] }
 0x121   : > { %3106 = vmatprep.subr.bf16.mxu0 %v3105_v38  ;;  %v3253_v38 = vpack.c.bf16 %v888_v31, %v880_v30  ;;  %v960_v30 = vld [vmem:[#allocation10 + $0x398] sm:$0xff] }
 0x122   : > { %v968_v31 = vld [vmem:[#allocation10 + $0x3d8] sm:$0xff] }
 0x124   : > { %3108 = vmatpush1.bf16.msra.mxu0 %v3107_v43 }
 0x125   : > { %3110 = vmatprep.subr.bf16.mxu0 %v3109_v44  ;;  %v902_v44 = vld [vmem:[#allocation10 + $0x1c8] sm:$0xff] }
 0x126   : > { %v3129_v51 = vpack.c.bf16 %v902_v44, %v894_v41  ;;  %v982_v41 = vld [vmem:[#allocation10 + $0x448] sm:$0xff] }
 0x128   : > { %3112 = vmatpush1.bf16.msra.mxu0 %v3111_v47  ;;  %v3127_v47 = vpack.c.bf16 %v885_v36, %v877_v35  ;;  %v965_v35 = vld [vmem:[#allocation10 + $0x3c0] sm:$0xff] }
 0x129   : > { %3114 = vmatprep.subr.bf16.mxu0 %v3113_v54  ;;  %v903_v54 = vld [vmem:[#allocation10 + $0x1d0] sm:$0xff] }
 0x12a   : > { %v3259_v62 = vpack.c.bf16 %v903_v54, %v895_v53  ;;  %v998_v53 = vld [vmem:[#allocation10 + $0x4c8] sm:$0xff]  ;;  %v992_v54 = vld [vmem:[#allocation10 + $0x498] sm:$0xff] }
 0x12c   : > { %3116 = vmatpush1.bf16.msra.mxu0 %v3115_v59  ;;  %v920_v59 = vld [vmem:[#allocation10 + $0x258] sm:$0xff] }
 0x12d   : > { %3246 = vmatprep.subr.bf16.mxu0 %v3245_v2  ;;  %v3261_v2 = vpack.c.bf16 %v920_v59, %v912_v58  ;;  %v989_v58 = vld [vmem:[#allocation10 + $0x480] sm:$0xff] }
 0x12e   : > { %v997_v59 = vld [vmem:[#allocation10 + $0x4c0] sm:$0xff] }
 0x12f   : > { %v3155_v5 = vpack.c.bf16 %v997_v59, %v989_v58  ;;  %v1071_v58 = vld [vmem:[#allocation10 + $0x710] sm:$0xff] }
 0x130   : > { %v1079_v59 = vld [vmem:[#allocation10 + $0x750] sm:$0xff] }
 0x1e2   : > { %v3017_v4 = vpop.f32.mrb[0].mxu0 }
 0x1e3   : > { %v542_v7 = vpop.f32.mrb[1].mxu0  ;;  %v548_v15 = vadd.f32 %v3017_v4, %v2782_v3  ;;  %v919_v4 = vld [vmem:[#allocation10 + $0x250] sm:$0xff] }
 0x1e4   : > { %v543_v11 = vadd.f32 %v2782_v3, %v542_v7  ;;  %v928_v7 = vld [vmem:[#allocation10 + $0x298] sm:$0xff] }
 0x1e5   : > { %v562_v32 = vmax.f32 %v548_v15, 0.0  ;;  %v3265_v13 = vpack.c.bf16 %v936_v8, %v928_v7  ;;  %v935_v15 = vld [vmem:[#allocation10 + $0x2d0] sm:$0xff]  ;;  %v1005_v7 = vld [vmem:[#allocation10 + $0x500] sm:$0xff] }
 0x1e6   : > { %v561_v16 = vmax.f32 %v543_v11, 0.0  ;;  %v3020_v17 = vpop.f32.mrb[2].mxu0  ;;  %v933_v11 = vld [vmem:[#allocation10 + $0x2c0] sm:$0xff]  ;;  %v3267_v21 = vpack.c.bf16 %v935_v15, %v927_v14  ;;  %v1024_v14 = vld [vmem:[#allocation10 + $0x598] sm:$0xff] }
 0x1e7   : > { %v552_v22 = vpop.f32.mrb[3].mxu0  ;;  %v558_v42 = vadd.f32 %v3020_v17, %v2782_v3  ;;  %v950_v17 = vld [vmem:[#allocation10 + $0x348] sm:$0xff]  ;;  %v3139_v20 = vpack.c.bf16 %v933_v11, %v925_v10  ;;  %v1013_v8 = vld [vmem:[#allocation10 + $0x540] sm:$0xff]  ;;  %v1007_v10 = vld [vmem:[#allocation10 + $0x510] sm:$0xff] }
 0x1e8   : > { %716 = vmatmul.mubr.f32.vlgmr.msra.gmra.mrb[0].mxu1 %v561_v16  ;;  %805 = vmatmul.mubr.f32.vlgmr.msra.gmra.mrb[4].mxu0 %v561_v16  ;;  %v553_v28 = vadd.f32 %v2782_v3, %v552_v22  ;;  %v911_v3 = vld [vmem:[#allocation10 + $0x210] sm:$0xff]  ;;  %v942_v16 = vld [vmem:[#allocation10 + $0x308] sm:$0xff]  ;;  %v941_v22 = vld [vmem:[#allocation10 + $0x300] sm:$0xff] }
 0x1e9   : > { %721 = vmatprep.mubr.f32.mxu1 %v4246_v60  ;;  %810 = vmatprep.mubr.f32.mxu0 %v4246_v60  ;;  %v564_v56 = vmax.f32 %v558_v42, 0.0  ;;  %v3263_v9 = vpack.c.bf16 %v919_v4, %v911_v3  ;;  %v976_v42 = vld [vmem:[#allocation10 + $0x418] sm:$0xff]  ;;  %v1015_v11 = vld [vmem:[#allocation10 + $0x550] sm:$0xff] }
 0x1ea   : > { %3120 = vmatpush1.bf16.msra.mxu1 %v3119_v18  ;;  %3248 = vmatpush1.bf16.msra.mxu0 %v3247_v19  ;;  %v563_v43 = vmax.f32 %v553_v28, 0.0  ;;  %v944_v18 = vld [vmem:[#allocation10 + $0x318] sm:$0xff]  ;;  %v958_v28 = vld [vmem:[#allocation10 + $0x388] sm:$0xff] }
 0x1eb   : > { %3122 = vmatprep.subr.bf16.mxu1 %v3121_v23  ;;  %3250 = vmatprep.subr.bf16.mxu0 %v3249_v24  ;;  %v952_v19 = vld [vmem:[#allocation10 + $0x358] sm:$0xff]  ;;  %v949_v23 = vld [vmem:[#allocation10 + $0x340] sm:$0xff]  ;;  %v3141_v24 = vpack.c.bf16 %v950_v17, %v942_v16  ;;  %v3145_v36 = vpack.c.bf16 %v966_v29, %v958_v28  ;;  %v3159_v16 = vpack.c.bf16 %v1013_v8, %v1005_v7  ;;  %v1087_v8 = vld [vmem:[#allocation10 + $0x790] sm:$0xff] }
 0x1ec   : > { %722 = vmatmul.mubr.f32.gmra.mrb[2].mxu1 %v562_v32  ;;  %811 = vmatmul.mubr.f32.gmra.mrb[6].mxu0 %v562_v32  ;;  %v3269_v25 = vpack.c.bf16 %v952_v19, %v944_v18  ;;  %v3143_v32 = vpack.c.bf16 %v949_v23, %v941_v22  ;;  %v1008_v3 = vld [vmem:[#allocation10 + $0x518] sm:$0xff]  ;;  %v3287_v17 = vpack.c.bf16 %v1015_v11, %v1007_v10  ;;  %v1021_v18 = vld [vmem:[#allocation10 + $0x580] sm:$0xff]  ;;  %v1023_v22 = vld [vmem:[#allocation10 + $0x590] sm:$0xff] }
 0x1ed   : > { %727 = vmatprep.mubr.f32.mxu1 %v4246_v60  ;;  %816 = vmatprep.mubr.f32.mxu0 %v4246_v60  ;;  %v1016_v4 = vld [vmem:[#allocation10 + $0x558] sm:$0xff]  ;;  %v1029_v19 = vld [vmem:[#allocation10 + $0x5c0] sm:$0xff]  ;;  %v1031_v23 = vld [vmem:[#allocation10 + $0x5d0] sm:$0xff] }
 0x1ee   : > { %3124 = vmatpush1.bf16.msra.mxu1 %v3123_v33  ;;  %3252 = vmatpush1.bf16.msra.mxu0 %v3251_v34  ;;  %v3271_v33 = vpack.c.bf16 %v951_v27, %v943_v26  ;;  %v957_v34 = vld [vmem:[#allocation10 + $0x380] sm:$0xff]  ;;  %v1032_v15 = vld [vmem:[#allocation10 + $0x5d8] sm:$0xff]  ;;  %v3163_v28 = vpack.c.bf16 %v1029_v19, %v1021_v18  ;;  %v3291_v29 = vpack.c.bf16 %v1031_v23, %v1023_v22  ;;  %v1102_v10 = vld [vmem:[#allocation10 + $0x808] sm:$0xff] }
 0x1ef   : > { %3126 = vmatprep.subr.bf16.mxu1 %v3125_v37  ;;  %3254 = vmatprep.subr.bf16.mxu0 %v3253_v38  ;;  %v3273_v37 = vpack.c.bf16 %v968_v31, %v960_v30  ;;  %v959_v38 = vld [vmem:[#allocation10 + $0x390] sm:$0xff]  ;;  %v3147_v44 = vpack.c.bf16 %v965_v35, %v957_v34  ;;  %v1040_v26 = vld [vmem:[#allocation10 + $0x618] sm:$0xff]  ;;  %v1037_v30 = vld [vmem:[#allocation10 + $0x600] sm:$0xff] }
 0x1f0   : > { %728 = vmatmul.mubr.f32.gmra.mrb[4].mxu1 %v563_v43  ;;  %817 = vmatmul.mubr.f32.gmra.mrb[8].mxu0 %v563_v43  ;;  %v984_v43 = vld [vmem:[#allocation10 + $0x458] sm:$0xff]  ;;  %v3275_v45 = vpack.c.bf16 %v967_v39, %v959_v38  ;;  %v1045_v31 = vld [vmem:[#allocation10 + $0x640] sm:$0xff]  ;;  %v1039_v34 = vld [vmem:[#allocation10 + $0x610] sm:$0xff] }
 0x1f1   : > { %733 = vmatprep.mubr.f32.mxu1 %v4246_v60  ;;  %822 = vmatprep.mubr.f32.mxu0 %v4246_v60  ;;  %v3135_v60 = vpack.c.bf16 %v917_v0, %v909_v63  ;;  %v3277_v49 = vpack.c.bf16 %v984_v43, %v976_v42  ;;  %v991_v63 = vld [vmem:[#allocation10 + $0x490] sm:$0xff]  ;;  %v1048_v27 = vld [vmem:[#allocation10 + $0x658] sm:$0xff]  ;;  %v1053_v42 = vld [vmem:[#allocation10 + $0x680] sm:$0xff] }
 0x1f2   : > { %3128 = vmatpush1.bf16.msra.mxu1 %v3127_v47  ;;  %3256 = vmatpush1.bf16.msra.mxu0 %v3255_v48  ;;  %v981_v47 = vld [vmem:[#allocation10 + $0x440] sm:$0xff]  ;;  %v3149_v48 = vpack.c.bf16 %v982_v41, %v974_v40  ;;  %v999_v0 = vld [vmem:[#allocation10 + $0x4d0] sm:$0xff]  ;;  %v1056_v38 = vld [vmem:[#allocation10 + $0x698] sm:$0xff]  ;;  %v3167_v40 = vpack.c.bf16 %v1045_v31, %v1037_v30 }
 0x1f3   : > { %3130 = vmatprep.subr.bf16.mxu1 %v3129_v51  ;;  %3258 = vmatprep.subr.bf16.mxu0 %v3257_v52  ;;  %v983_v51 = vld [vmem:[#allocation10 + $0x450] sm:$0xff]  ;;  %v990_v52 = vld [vmem:[#allocation10 + $0x488] sm:$0xff]  ;;  %v3283_v6 = vpack.c.bf16 %v999_v0, %v991_v63  ;;  %v1064_v39 = vld [vmem:[#allocation10 + $0x6d8] sm:$0xff] }
 0x1f4   : > { %734 = vmatmul.mubr.f32.gmra.mrb[6].mxu1 %v564_v56  ;;  %823 = vmatmul.mubr.f32.gmra.mrb[10].mxu0 %v564_v56  ;;  %v3151_v56 = vpack.c.bf16 %v981_v47, %v973_v46  ;;  %v3279_v57 = vpack.c.bf16 %v983_v51, %v975_v50  ;;  %v1047_v35 = vld [vmem:[#allocation10 + $0x650] sm:$0xff]  ;;  %v1061_v43 = vld [vmem:[#allocation10 + $0x6c0] sm:$0xff]  ;;  %v1072_v50 = vld [vmem:[#allocation10 + $0x718] sm:$0xff] }
 0x1f5   : > { %v3295_v41 = vpack.c.bf16 %v1047_v35, %v1039_v34  ;;  %v1055_v46 = vld [vmem:[#allocation10 + $0x690] sm:$0xff]  ;;  %v1080_v51 = vld [vmem:[#allocation10 + $0x758] sm:$0xff]  ;;  %v1086_v63 = vld [vmem:[#allocation10 + $0x788] sm:$0xff] }
 0x1f6   : > { %3132 = vmatpush1.bf16.msra.mxu1 %v3131_v61  ;;  %3260 = vmatpush1.bf16.msra.mxu0 %v3259_v62  ;;  %v3153_v61 = vpack.c.bf16 %v998_v53, %v990_v52  ;;  %v3281_v62 = vpack.c.bf16 %v1000_v55, %v992_v54  ;;  %v1063_v47 = vld [vmem:[#allocation10 + $0x6d0] sm:$0xff]  ;;  %v3171_v52 = vpack.c.bf16 %v1061_v43, %v1053_v42  ;;  %v1069_v54 = vld [vmem:[#allocation10 + $0x700] sm:$0xff]  ;;  %v1094_v0 = vld [vmem:[#allocation10 + $0x7c8] sm:$0xff] }
 0x1f7   : > { %3134 = vmatprep.subr.bf16.mxu1 %v3133_v1  ;;  %3262 = vmatprep.subr.bf16.mxu0 %v3261_v2  ;;  %v1006_v1 = vld [vmem:[#allocation10 + $0x508] sm:$0xff]  ;;  %v3299_v53 = vpack.c.bf16 %v1063_v47, %v1055_v46  ;;  %v4595_v19 = vld [vmem:[#allocation9] sm:$0xf]  ;;  %v1103_v30 = vld [vmem:[#allocation10 + $0x810] sm:$0xff] }
 0x1f8   : > { %v1014_v2 = vld [vmem:[#allocation10 + $0x548] sm:$0xff]  ;;  %v1111_v31 = vld [vmem:[#allocation10 + $0x850] sm:$0xff]  ;;  %v1120_v35 = vld [vmem:[#allocation10 + $0x898] sm:$0xff] }
 0x1f9   : > { %v1110_v11 = vld [vmem:[#allocation10 + $0x848] sm:$0xff]  ;;  %v1117_v42 = vld [vmem:[#allocation10 + $0x880] sm:$0xff] }
 0x1fa   : > { %3136 = vmatpush1.bf16.msra.mxu1 %v3135_v60  ;;  %3264 = vmatpush1.bf16.msra.mxu0 %v3263_v9  ;;  %v3157_v60 = vpack.c.bf16 %v1014_v2, %v1006_v1  ;;  %v3285_v9 = vpack.c.bf16 %v1016_v4, %v1008_v3  ;;  %v1088_v1 = vld [vmem:[#allocation10 + $0x798] sm:$0xff]  ;;  %v3177_v2 = vpack.c.bf16 %v1094_v0, %v1086_v63  ;;  %v1085_v4 = vld [vmem:[#allocation10 + $0x780] sm:$0xff]  ;;  %v1126_v34 = vld [vmem:[#allocation10 + $0x8c8] sm:$0xff] }
 0x1fb   : > { %3138 = vmatprep.subr.bf16.mxu1 %v3137_v12  ;;  %3266 = vmatprep.subr.bf16.mxu0 %v3265_v13  ;;  %v1022_v12 = vld [vmem:[#allocation10 + $0x588] sm:$0xff]  ;;  %v1096_v3 = vld [vmem:[#allocation10 + $0x7d8] sm:$0xff]  ;;  %v1125_v43 = vld [vmem:[#allocation10 + $0x8c0] sm:$0xff] }
 0x1fc   : > { %v1030_v13 = vld [vmem:[#allocation10 + $0x5c8] sm:$0xff]  ;;  %v1133_v63 = vld [vmem:[#allocation10 + $0x900] sm:$0xff] }
 0x1fd   : > { %v1141_v0 = vld [vmem:[#allocation10 + $0x940] sm:$0xff] }
 0x1fe   : > { %3140 = vmatpush1.bf16.msra.mxu1 %v3139_v20  ;;  %3268 = vmatpush1.bf16.msra.mxu0 %v3267_v21  ;;  %v3161_v20 = vpack.c.bf16 %v1030_v13, %v1022_v12  ;;  %v3289_v21 = vpack.c.bf16 %v1032_v15, %v1024_v14  ;;  %v1104_v12 = vld [vmem:[#allocation10 + $0x818] sm:$0xff]  ;;  %v3181_v13 = vpack.c.bf16 %v1110_v11, %v1102_v10  ;;  %v1158_v11 = vld [vmem:[#allocation10 + $0x9c8] sm:$0xff] }
 0x1ff   : > { %3142 = vmatprep.subr.bf16.mxu1 %v3141_v24  ;;  %3270 = vmatprep.subr.bf16.mxu0 %v3269_v25  ;;  %v1038_v24 = vld [vmem:[#allocation10 + $0x608] sm:$0xff]  ;;  %v1112_v14 = vld [vmem:[#allocation10 + $0x858] sm:$0xff] }
 0x200   : > { %v1046_v25 = vld [vmem:[#allocation10 + $0x648] sm:$0xff]  ;;  %v3309_v15 = vpack.c.bf16 %v1112_v14, %v1104_v12  ;;  %v1152_v12 = vld [vmem:[#allocation10 + $0x998] sm:$0xff] }
 0x202   : > { %3144 = vmatpush1.bf16.msra.mxu1 %v3143_v32  ;;  %3272 = vmatpush1.bf16.msra.mxu0 %v3271_v33  ;;  %v3165_v32 = vpack.c.bf16 %v1046_v25, %v1038_v24  ;;  %v3293_v33 = vpack.c.bf16 %v1048_v27, %v1040_v26  ;;  %v1101_v25 = vld [vmem:[#allocation10 + $0x800] sm:$0xff] }
 0x203   : > { %3146 = vmatprep.subr.bf16.mxu1 %v3145_v36  ;;  %3274 = vmatprep.subr.bf16.mxu0 %v3273_v37  ;;  %v1054_v36 = vld [vmem:[#allocation10 + $0x688] sm:$0xff]  ;;  %v1109_v26 = vld [vmem:[#allocation10 + $0x840] sm:$0xff] }
 0x204   : > { %v1062_v37 = vld [vmem:[#allocation10 + $0x6c8] sm:$0xff] }
 0x206   : > { %3148 = vmatpush1.bf16.msra.mxu1 %v3147_v44  ;;  %3276 = vmatpush1.bf16.msra.mxu0 %v3275_v45  ;;  %v3169_v44 = vpack.c.bf16 %v1062_v37, %v1054_v36  ;;  %v3297_v45 = vpack.c.bf16 %v1064_v39, %v1056_v38  ;;  %v1128_v36 = vld [vmem:[#allocation10 + $0x8d8] sm:$0xff] }
 0x207   : > { %3150 = vmatprep.subr.bf16.mxu1 %v3149_v48  ;;  %3278 = vmatprep.subr.bf16.mxu0 %v3277_v49  ;;  %v1070_v48 = vld [vmem:[#allocation10 + $0x708] sm:$0xff] }
 0x208   : > { %v1078_v49 = vld [vmem:[#allocation10 + $0x748] sm:$0xff] }
 0x209   : > { %v3173_v55 = vpack.c.bf16 %v1078_v49, %v1070_v48  ;;  %v3313_v49 = vpack.c.bf16 %v1128_v36, %v1120_v35  ;;  %v1151_v35 = vld [vmem:[#allocation10 + $0x990] sm:$0xff] }
 0x20a   : > { %3152 = vmatpush1.bf16.msra.mxu1 %v3151_v56  ;;  %3280 = vmatpush1.bf16.msra.mxu0 %v3279_v57  ;;  %v3301_v56 = vpack.c.bf16 %v1080_v51, %v1072_v50  ;;  %v1077_v57 = vld [vmem:[#allocation10 + $0x740] sm:$0xff]  ;;  %v1119_v50 = vld [vmem:[#allocation10 + $0x890] sm:$0xff] }
 0x20b   : > { %3154 = vmatprep.subr.bf16.mxu1 %v3153_v61  ;;  %3282 = vmatprep.subr.bf16.mxu0 %v3281_v62  ;;  %v3175_v61 = vpack.c.bf16 %v1077_v57, %v1069_v54  ;;  %v3303_v62 = vpack.c.bf16 %v1079_v59, %v1071_v58  ;;  %v1127_v51 = vld [vmem:[#allocation10 + $0x8d0] sm:$0xff]  ;;  %v1142_v54 = vld [vmem:[#allocation10 + $0x948] sm:$0xff] }
 0x20c   : > { %v1159_v36 = vld [vmem:[#allocation10 + $0x9d0] sm:$0xff] }
 0x20e   : > { %3156 = vmatpush1.bf16.msra.mxu1 %v3155_v5  ;;  %3284 = vmatpush1.bf16.msra.mxu0 %v3283_v6  ;;  %v1093_v5 = vld [vmem:[#allocation10 + $0x7c0] sm:$0xff]  ;;  %v3305_v6 = vpack.c.bf16 %v1096_v3, %v1088_v1 }
 0x20f   : > { %3158 = vmatprep.subr.bf16.mxu1 %v3157_v60  ;;  %3286 = vmatprep.subr.bf16.mxu0 %v3285_v9  ;;  %v3179_v7 = vpack.c.bf16 %v1093_v5, %v1085_v4  ;;  %v1095_v60 = vld [vmem:[#allocation10 + $0x7d0] sm:$0xff] }
 0x210   : > { %v3307_v9 = vpack.c.bf16 %v1095_v60, %v1087_v8  ;;  %v1143_v8 = vld [vmem:[#allocation10 + $0x950] sm:$0xff]  ;;  %v1150_v60 = vld [vmem:[#allocation10 + $0x988] sm:$0xff] }
 0x212   : > { %3160 = vmatpush1.bf16.msra.mxu1 %v3159_v16  ;;  %3288 = vmatpush1.bf16.msra.mxu0 %v3287_v17  ;;  %v631_v16 = vlaneseq }
 0x213   : > { %3162 = vmatprep.subr.bf16.mxu1 %v3161_v20  ;;  %3290 = vmatprep.subr.bf16.mxu0 %v3289_v21 }
 0x214   : > { %v4592_v17 = vshrl.u32 %v631_v16, 7 }
 0x216   : > { %3164 = vmatpush1.bf16.msra.mxu1 %v3163_v28  ;;  %3292 = vmatpush1.bf16.msra.mxu0 %v3291_v29  ;;  %v633_v18 = vsub.s32 0, %v4592_v17  ;;  %v637_v20 = vsub.s32 1, %v4592_v17  ;;  %v645_v57 = vsub.s32 3, %v4592_v17 }
 0x217   : > { %3166 = vmatprep.subr.bf16.mxu1 %v3165_v32  ;;  %3294 = vmatprep.subr.bf16.mxu0 %v3293_v33  ;;  %v1118_v32 = vld [vmem:[#allocation10 + $0x888] sm:$0xff] }
 0x218   : > { %v4601_v21 = vrot.slane %v4595_v19, %v633_v18  ;;  %v4606_v22 = vrot.slane %v4595_v19, %v637_v20  ;;  %v3185_v48 = vpack.c.bf16 %v1126_v34, %v1118_v32  ;;  %v4644_v14 = vrot.slane %v4595_v19, %v645_v57  ;;  %v1157_v34 = vld [vmem:[#allocation10 + $0x9c0] sm:$0xff] }
 0x219   : > { %v3193_v32 = vpack.c.bf16 %v1158_v11, %v1150_v60  ;;  %v1198_v60 = vld [vmem:[#allocation10 + $0xb08] sm:$0xff]  ;;  %v1200_v11 = vld [vmem:[#allocation10 + $0xb18] sm:$0xff] }
 0x21a   : > { %3168 = vmatpush1.bf16.msra.mxu1 %v3167_v40  ;;  %3296 = vmatpush1.bf16.msra.mxu0 %v3295_v41  ;;  %v3183_v40 = vpack.c.bf16 %v1109_v26, %v1101_v25  ;;  %v3311_v41 = vpack.c.bf16 %v1111_v31, %v1103_v30  ;;  %v3191_v25 = vpack.c.bf16 %v1141_v0, %v1133_v63 }
 0x21b   : > { %3170 = vmatprep.subr.bf16.mxu1 %v3169_v44  ;;  %3298 = vmatprep.subr.bf16.mxu0 %v3297_v45 }
 0x21e   : > { %3172 = vmatpush1.bf16.msra.mxu1 %v3171_v52  ;;  %3300 = vmatpush1.bf16.msra.mxu0 %v3299_v53  ;;  %v1134_v52 = vld [vmem:[#allocation10 + $0x908] sm:$0xff] }
 0x21f   : > { %3174 = vmatprep.subr.bf16.mxu1 %v3173_v55  ;;  %3302 = vmatprep.subr.bf16.mxu0 %v3301_v56  ;;  %v1136_v55 = vld [vmem:[#allocation10 + $0x918] sm:$0xff]  ;;  %v3189_v5 = vpack.c.bf16 %v1142_v54, %v1134_v52  ;;  %v1175_v52 = vld [vmem:[#allocation10 + $0xa50] sm:$0xff] }
 0x220   : > { %v1144_v56 = vld [vmem:[#allocation10 + $0x958] sm:$0xff] }
 0x222   : > { %3176 = vmatpush1.bf16.msra.mxu1 %v3175_v61  ;;  %3304 = vmatpush1.bf16.msra.mxu0 %v3303_v62  ;;  %v3187_v61 = vpack.c.bf16 %v1125_v43, %v1117_v42  ;;  %v3315_v62 = vpack.c.bf16 %v1127_v51, %v1119_v50  ;;  %v1174_v43 = vld [vmem:[#allocation10 + $0xa48] sm:$0xff]  ;;  %v1165_v50 = vld [vmem:[#allocation10 + $0xa00] sm:$0xff] }
 0x223   : > { %3178 = vmatprep.subr.bf16.mxu1 %v3177_v2  ;;  %3306 = vmatprep.subr.bf16.mxu0 %v3305_v6  ;;  %v3317_v6 = vpack.c.bf16 %v1144_v56, %v1136_v55  ;;  %v1173_v51 = vld [vmem:[#allocation10 + $0xa40] sm:$0xff]  ;;  %v1190_v56 = vld [vmem:[#allocation10 + $0xac8] sm:$0xff] }
 0x224   : > { %v3199_v63 = vpack.c.bf16 %v1173_v51, %v1165_v50  ;;  %v1230_v50 = vld [vmem:[#allocation10 + $0xc08] sm:$0xff] }
 0x225   : > { %v1238_v51 = vld [vmem:[#allocation10 + $0xc48] sm:$0xff] }
 0x226   : > { %3180 = vmatpush1.bf16.msra.mxu1 %v3179_v7  ;;  %3308 = vmatpush1.bf16.msra.mxu0 %v3307_v9  ;;  %v1135_v7 = vld [vmem:[#allocation10 + $0x910] sm:$0xff] }
 0x227   : > { %3182 = vmatprep.subr.bf16.mxu1 %v3181_v13  ;;  %3310 = vmatprep.subr.bf16.mxu0 %v3309_v15  ;;  %v1160_v13 = vld [vmem:[#allocation10 + $0x9d8] sm:$0xff]  ;;  %v3319_v26 = vpack.c.bf16 %v1143_v8, %v1135_v7  ;;  %v1183_v7 = vld [vmem:[#allocation10 + $0xa90] sm:$0xff] }
 0x228   : > { %v1191_v8 = vld [vmem:[#allocation10 + $0xad0] sm:$0xff] }
 0x2bb   : > { %v717_v23 = vpop.f32.mrb[0].mxu1  ;;  %v4608_v24 = vpop.f32.mrb[4].mxu0 }
 0x2bc   : > { %v718_v27 = vadd.f32 %v717_v23, %v4601_v21  ;;  %v719_v28 = vpop.f32.mrb[1].mxu1  ;;  %v4611_v29 = vpop.f32.mrb[5].mxu0 }
 0x2bd   : > { %v720_v33 = vadd.f32 %v719_v28, %v4606_v22 }
 0x2be   : > { %v4618_v44 = vmax.f32 %v718_v27, 0.0  ;;  %v1149_v27 = vld [vmem:[#allocation10 + $0x980] sm:$0xff] }
 0x2bf   : > { %v4614_v37 = vmax.f32 %v720_v33, 0.0  ;;  %v723_v38 = vpop.f32.mrb[2].mxu1  ;;  %v4616_v39 = vpop.f32.mrb[6].mxu0  ;;  %v3321_v33 = vpack.c.bf16 %v1160_v13, %v1152_v12  ;;  %v1208_v12 = vld [vmem:[#allocation10 + $0xb58] sm:$0xff] }
 0x2c0   : > { %v724_v45 = vadd.f32 %v723_v38, %v4601_v21  ;;  %v725_v46 = vpop.f32.mrb[3].mxu1  ;;  %v4621_v47 = vpop.f32.mrb[7].mxu0 }
 0x2c1   : > { %v726_v53 = vadd.f32 %v725_v46, %v4606_v22  ;;  %1463 = vmatprep.mubr.f32.mxu1 %v4614_v37  ;;  %1641 = vmatprep.mubr.f32.mxu0 %v4614_v37  ;;  %v1176_v46 = vld [vmem:[#allocation10 + $0xa58] sm:$0xff] }
 0x2c2   : > { %1464 = vmatmul.mubr.f32.vlgmr.msra.gmra.mrb[8].mxu1 %v4618_v44  ;;  %1642 = vmatmul.mubr.f32.vlgmr.msra.gmra.mrb[12].mxu0 %v4618_v44  ;;  %v4633_v2 = vmax.f32 %v724_v45, 0.0  ;;  %v1168_v45 = vld [vmem:[#allocation10 + $0xa18] sm:$0xff] }
 0x2c3   : > { %v4629_v58 = vmax.f32 %v726_v53, 0.0  ;;  %3184 = vmatpush1.bf16.msra.mxu1 %v3183_v40  ;;  %3312 = vmatpush1.bf16.msra.mxu0 %v3311_v41  ;;  %v729_v59 = vpop.f32.mrb[4].mxu1  ;;  %v4631_v1 = vpop.f32.mrb[8].mxu0  ;;  %v1166_v41 = vld [vmem:[#allocation10 + $0xa08] sm:$0xff]  ;;  %v3325_v55 = vpack.c.bf16 %v1176_v46, %v1168_v45 }
 0x2c4   : > { %v730_v3 = vadd.f32 %v729_v59, %v4601_v21  ;;  %v731_v4 = vpop.f32.mrb[5].mxu1  ;;  %3186 = vmatprep.subr.bf16.mxu1 %v3185_v48  ;;  %3314 = vmatprep.subr.bf16.mxu0 %v3313_v49  ;;  %v4636_v9 = vpop.f32.mrb[9].mxu0  ;;  %v3323_v49 = vpack.c.bf16 %v1159_v36, %v1151_v35  ;;  %v1182_v53 = vld [vmem:[#allocation10 + $0xa88] sm:$0xff]  ;;  %v3197_v54 = vpack.c.bf16 %v1174_v43, %v1166_v41  ;;  %v1184_v59 = vld [vmem:[#allocation10 + $0xa98] sm:$0xff]  ;;  %v1221_v43 = vld [vmem:[#allocation10 + $0xbc0] sm:$0xff] }
 0x2c5   : > { %v732_v10 = vadd.f32 %v731_v4, %v4606_v22  ;;  %1469 = vmatprep.mubr.f32.mxu1 %v4629_v58  ;;  %1647 = vmatprep.mubr.f32.mxu0 %v4629_v58  ;;  %v1189_v4 = vld [vmem:[#allocation10 + $0xac0] sm:$0xff]  ;;  %v1216_v35 = vld [vmem:[#allocation10 + $0xb98] sm:$0xff] }
 0x2c6   : > { %v4646_v15 = vmax.f32 %v730_v3, 0.0  ;;  %1470 = vmatmul.mubr.f32.gmra.mrb[10].mxu1 %v4633_v2  ;;  %1648 = vmatmul.mubr.f32.gmra.mrb[14].mxu0 %v4633_v2  ;;  %v1181_v3 = vld [vmem:[#allocation10 + $0xa80] sm:$0xff]  ;;  %v1224_v36 = vld [vmem:[#allocation10 + $0xbd8] sm:$0xff] }
 0x2c7   : > { %v4650_v16 = vmax.f32 %v732_v10, 0.0  ;;  %3188 = vmatpush1.bf16.msra.mxu1 %v3187_v61  ;;  %3316 = vmatpush1.bf16.msra.mxu0 %v3315_v62  ;;  %v735_v23 = vpop.f32.mrb[6].mxu1  ;;  %v4652_v28 = vpop.f32.mrb[10].mxu0  ;;  %v1192_v61 = vld [vmem:[#allocation10 + $0xad8] sm:$0xff]  ;;  %v1206_v10 = vld [vmem:[#allocation10 + $0xb48] sm:$0xff]  ;;  %v3203_v13 = vpack.c.bf16 %v1189_v4, %v1181_v3  ;;  %v3337_v46 = vpack.c.bf16 %v1224_v36, %v1216_v35 }
 0x2c8   : > { %v736_v30 = vadd.f32 %v735_v23, %v4601_v21  ;;  %v737_v31 = vpop.f32.mrb[7].mxu1  ;;  %3190 = vmatprep.subr.bf16.mxu1 %v3189_v5  ;;  %3318 = vmatprep.subr.bf16.mxu0 %v3317_v6  ;;  %v4655_v38 = vpop.f32.mrb[11].mxu0  ;;  %v809_v21 = vadd.f32 %v4611_v29, %v4644_v14  ;;  %v1167_v29 = vld [vmem:[#allocation10 + $0xa10] sm:$0xff]  ;;  %v3201_v5 = vpack.c.bf16 %v1190_v56, %v1182_v53  ;;  %v1237_v56 = vld [vmem:[#allocation10 + $0xc40] sm:$0xff]  ;;  %v1246_v3 = vld [vmem:[#allocation10 + $0xc88] sm:$0xff] }
 0x2c9   : > { %v738_v40 = vadd.f32 %v737_v31, %v4606_v22  ;;  %1475 = vmatprep.mubr.f32.mxu1 %v4650_v16  ;;  %1653 = vmatprep.mubr.f32.mxu0 %v4650_v16  ;;  %v3195_v22 = vpack.c.bf16 %v1157_v34, %v1149_v27  ;;  %v3327_v0 = vpack.c.bf16 %v1175_v52, %v1167_v29  ;;  %v1199_v31 = vld [vmem:[#allocation10 + $0xb10] sm:$0xff]  ;;  %v1222_v34 = vld [vmem:[#allocation10 + $0xbc8] sm:$0xff]  ;;  %v1232_v29 = vld [vmem:[#allocation10 + $0xc18] sm:$0xff] }
 0x2ca   : > { %v4662_v42 = vmax.f32 %v736_v30, 0.0  ;;  %1476 = vmatmul.mubr.f32.gmra.mrb[12].mxu1 %v4646_v15  ;;  %1654 = vmatmul.mubr.f32.gmra.mrb[16].mxu0 %v4646_v15  ;;  %v4670_v62 = vmax.f32 %v809_v21, 0.0  ;;  %v3329_v6 = vpack.c.bf16 %v1192_v61, %v1184_v59  ;;  %v3331_v23 = vpack.c.bf16 %v1191_v8, %v1183_v7  ;;  %v1213_v21 = vld [vmem:[#allocation10 + $0xb80] sm:$0xff]  ;;  %v1240_v52 = vld [vmem:[#allocation10 + $0xc58] sm:$0xff]  ;;  %v1254_v4 = vld [vmem:[#allocation10 + $0xcc8] sm:$0xff] }
 0x2cb   : > { %v4666_v48 = vmax.f32 %v738_v40, 0.0  ;;  %3192 = vmatpush1.bf16.msra.mxu1 %v3191_v25  ;;  %3320 = vmatpush1.bf16.msra.mxu0 %v3319_v26  ;;  %v1197_v25 = vld [vmem:[#allocation10 + $0xb00] sm:$0xff]  ;;  %v3205_v27 = vpack.c.bf16 %v1206_v10, %v1198_v60  ;;  %v3333_v30 = vpack.c.bf16 %v1208_v12, %v1200_v11  ;;  %v3211_v53 = vpack.c.bf16 %v1221_v43, %v1213_v21  ;;  %v1278_v21 = vld [vmem:[#allocation10 + $0xd88] sm:$0xff] }
 0x2cc   : > { %3194 = vmatprep.subr.bf16.mxu1 %v3193_v32  ;;  %3322 = vmatprep.subr.bf16.mxu0 %v3321_v33  ;;  %v1205_v26 = vld [vmem:[#allocation10 + $0xb40] sm:$0xff]  ;;  %v1207_v32 = vld [vmem:[#allocation10 + $0xb50] sm:$0xff]  ;;  %v1214_v33 = vld [vmem:[#allocation10 + $0xb88] sm:$0xff]  ;;  %v3213_v59 = vpack.c.bf16 %v1238_v51, %v1230_v50  ;;  %v3341_v61 = vpack.c.bf16 %v1240_v52, %v1232_v29  ;;  %v3217_v11 = vpack.c.bf16 %v1254_v4, %v1246_v3 }
 0x2cd   : > { %1481 = vmatprep.mubr.f32.mxu1 %v4666_v48  ;;  %1659 = vmatprep.mubr.f32.mxu0 %v4666_v48  ;;  %v3207_v40 = vpack.c.bf16 %v1205_v26, %v1197_v25  ;;  %v3335_v41 = vpack.c.bf16 %v1207_v32, %v1199_v31  ;;  %v3209_v45 = vpack.c.bf16 %v1222_v34, %v1214_v33  ;;  %v1245_v60 = vld [vmem:[#allocation10 + $0xc80] sm:$0xff]  ;;  %v1262_v25 = vld [vmem:[#allocation10 + $0xd08] sm:$0xff] }
 0x2ce   : > { %1482 = vmatmul.mubr.f32.gmra.mrb[14].mxu1 %v4662_v42  ;;  %1660 = vmatmul.mubr.f32.gmra.mrb[18].mxu0 %v4662_v42  ;;  %v1253_v10 = vld [vmem:[#allocation10 + $0xcc0] sm:$0xff]  ;;  %v1270_v26 = vld [vmem:[#allocation10 + $0xd48] sm:$0xff] }
 0x2cf   : > { %3196 = vmatpush1.bf16.msra.mxu1 %v3195_v22  ;;  %3324 = vmatpush1.bf16.msra.mxu0 %v3323_v49  ;;  %v1215_v22 = vld [vmem:[#allocation10 + $0xb90] sm:$0xff]  ;;  %v3219_v31 = vpack.c.bf16 %v1253_v10, %v1245_v60  ;;  %v1261_v33 = vld [vmem:[#allocation10 + $0xd00] sm:$0xff]  ;;  %v3221_v35 = vpack.c.bf16 %v1270_v26, %v1262_v25  ;;  %v1286_v43 = vld [vmem:[#allocation10 + $0xdc8] sm:$0xff] }
 0x2d0   : > { %1552 = vmatprep.mubr.f32.mxu1 %v4670_v62  ;;  %1730 = vmatprep.mubr.f32.mxu0 %v4670_v62  ;;  %v1223_v49 = vld [vmem:[#allocation10 + $0xbd0] sm:$0xff]  ;;  %v1269_v34 = vld [vmem:[#allocation10 + $0xd40] sm:$0xff]  ;;  %v3225_v29 = vpack.c.bf16 %v1286_v43, %v1278_v21  ;;  %v1310_v60 = vld [vmem:[#allocation10 + $0xe88] sm:$0xff] }
 0x2d1   : > { %3198 = vmatprep.subr.bf16.mxu1 %v3197_v54  ;;  %3326 = vmatprep.subr.bf16.mxu0 %v3325_v55  ;;  %v3339_v54 = vpack.c.bf16 %v1223_v49, %v1215_v22  ;;  %v1229_v55 = vld [vmem:[#allocation10 + $0xc00] sm:$0xff]  ;;  %v3223_v22 = vpack.c.bf16 %v1269_v34, %v1261_v33  ;;  %v1318_v10 = vld [vmem:[#allocation10 + $0xec8] sm:$0xff] }
 0x2d2   : > { %v3215_v7 = vpack.c.bf16 %v1237_v56, %v1229_v55  ;;  %v1277_v50 = vld [vmem:[#allocation10 + $0xd80] sm:$0xff]  ;;  %v1294_v55 = vld [vmem:[#allocation10 + $0xe08] sm:$0xff] }
 0x2d3   : > { %3200 = vmatpush1.bf16.msra.mxu1 %v3199_v63  ;;  %3328 = vmatpush1.bf16.msra.mxu0 %v3327_v0  ;;  %v1231_v63 = vld [vmem:[#allocation10 + $0xc10] sm:$0xff]  ;;  %v1285_v51 = vld [vmem:[#allocation10 + $0xdc0] sm:$0xff]  ;;  %v1302_v56 = vld [vmem:[#allocation10 + $0xe48] sm:$0xff] }
 0x2d4   : > { %3202 = vmatprep.subr.bf16.mxu1 %v3201_v5  ;;  %3330 = vmatprep.subr.bf16.mxu0 %v3329_v6  ;;  %v1239_v0 = vld [vmem:[#allocation10 + $0xc50] sm:$0xff]  ;;  %v1248_v5 = vld [vmem:[#allocation10 + $0xc98] sm:$0xff]  ;;  %v1293_v3 = vld [vmem:[#allocation10 + $0xe00] sm:$0xff] }
 0x2d5   : > { %v1256_v6 = vld [vmem:[#allocation10 + $0xcd8] sm:$0xff]  ;;  %v3343_v8 = vpack.c.bf16 %v1239_v0, %v1231_v63  ;;  %v3227_v63 = vpack.c.bf16 %v1285_v51, %v1277_v50  ;;  %v1301_v4 = vld [vmem:[#allocation10 + $0xe40] sm:$0xff]  ;;  %v1326_v33 = vld [vmem:[#allocation10 + $0xf08] sm:$0xff] }
 0x2d6   : > { %v3345_v12 = vpack.c.bf16 %v1256_v6, %v1248_v5  ;;  %v3229_v5 = vpack.c.bf16 %v1302_v56, %v1294_v55  ;;  %v1309_v25 = vld [vmem:[#allocation10 + $0xe80] sm:$0xff]  ;;  %v1334_v34 = vld [vmem:[#allocation10 + $0xf48] sm:$0xff]  ;;  %v1335_v50 = vld [vmem:[#allocation10 + $0xf50] sm:$0xff] }
 0x2d7   : > { %3204 = vmatpush1.bf16.msra.mxu1 %v3203_v13  ;;  %3332 = vmatpush1.bf16.msra.mxu0 %v3331_v23  ;;  %v1247_v13 = vld [vmem:[#allocation10 + $0xc90] sm:$0xff]  ;;  %v1317_v26 = vld [vmem:[#allocation10 + $0xec0] sm:$0xff]  ;;  %v1342_v51 = vld [vmem:[#allocation10 + $0xf88] sm:$0xff] }
 0x2d8   : > { %3206 = vmatprep.subr.bf16.mxu1 %v3205_v27  ;;  %3334 = vmatprep.subr.bf16.mxu0 %v3333_v30  ;;  %v1255_v23 = vld [vmem:[#allocation10 + $0xcd0] sm:$0xff]  ;;  %v1264_v27 = vld [vmem:[#allocation10 + $0xd18] sm:$0xff]  ;;  %v1325_v21 = vld [vmem:[#allocation10 + $0xf00] sm:$0xff] }
 0x2d9   : > { %v1272_v30 = vld [vmem:[#allocation10 + $0xd58] sm:$0xff]  ;;  %v3347_v32 = vpack.c.bf16 %v1255_v23, %v1247_v13  ;;  %v3231_v13 = vpack.c.bf16 %v1301_v4, %v1293_v3  ;;  %v1333_v43 = vld [vmem:[#allocation10 + $0xf40] sm:$0xff]  ;;  %v1343_v3 = vld [vmem:[#allocation10 + $0xf90] sm:$0xff] }
 0x2da   : > { %v3349_v36 = vpack.c.bf16 %v1272_v30, %v1264_v27  ;;  %v3233_v27 = vpack.c.bf16 %v1318_v10, %v1310_v60  ;;  %v1341_v56 = vld [vmem:[#allocation10 + $0xf80] sm:$0xff]  ;;  %v1351_v4 = vld [vmem:[#allocation10 + $0xfd0] sm:$0xff] }
 0x2db   : > { %3208 = vmatpush1.bf16.msra.mxu1 %v3207_v40  ;;  %3336 = vmatpush1.bf16.msra.mxu0 %v3335_v41  ;;  %v1263_v40 = vld [vmem:[#allocation10 + $0xd10] sm:$0xff]  ;;  %v3371_v10 = vpack.c.bf16 %v1351_v4, %v1343_v3 }
 0x2dc   : > { %3210 = vmatprep.subr.bf16.mxu1 %v3209_v45  ;;  %3338 = vmatprep.subr.bf16.mxu0 %v3337_v46  ;;  %v1271_v41 = vld [vmem:[#allocation10 + $0xd50] sm:$0xff]  ;;  %v1280_v45 = vld [vmem:[#allocation10 + $0xd98] sm:$0xff] }
 0x2dd   : > { %v1288_v46 = vld [vmem:[#allocation10 + $0xdd8] sm:$0xff]  ;;  %v3351_v49 = vpack.c.bf16 %v1271_v41, %v1263_v40  ;;  %v3235_v40 = vpack.c.bf16 %v1317_v26, %v1309_v25  ;;  %v815_v25 = vadd.f32 %v4621_v47, %v4644_v14  ;;  %v851_v26 = vld [vmem:[#allocation10 + $0x30] sm:$0xff] }
 0x2de   : > { %v3353_v52 = vpack.c.bf16 %v1288_v46, %v1280_v45  ;;  %v641_v45 = vsub.s32 2, %v4592_v17  ;;  %v3237_v46 = vpack.c.bf16 %v1334_v34, %v1326_v33  ;;  %v876_v33 = vld [vmem:[#allocation10 + $0xf8] sm:$0xff]  ;;  %v883_v4 = vld [vmem:[#allocation10 + $0x130] sm:$0xff] }
 0x2df   : > { %3212 = vmatpush1.bf16.msra.mxu1 %v3211_v53  ;;  %3340 = vmatpush1.bf16.msra.mxu0 %v3339_v54  ;;  %v1279_v53 = vld [vmem:[#allocation10 + $0xd90] sm:$0xff]  ;;  %v4690_v47 = vmax.f32 %v815_v25, 0.0 }
 0x2e0   : > { %3214 = vmatprep.subr.bf16.mxu1 %v3213_v59  ;;  %3342 = vmatprep.subr.bf16.mxu0 %v3341_v61  ;;  %v1287_v54 = vld [vmem:[#allocation10 + $0xdd0] sm:$0xff]  ;;  %v1296_v59 = vld [vmem:[#allocation10 + $0xe18] sm:$0xff] }
 0x2e1   : > { %v1304_v61 = vld [vmem:[#allocation10 + $0xe58] sm:$0xff]  ;;  %v3355_v0 = vpack.c.bf16 %v1287_v54, %v1279_v53  ;;  %v3239_v54 = vpack.c.bf16 %v1333_v43, %v1325_v21  ;;  %v821_v21 = vadd.f32 %v4636_v9, %v4644_v14  ;;  %v899_v25 = vld [vmem:[#allocation10 + $0x1b0] sm:$0xff] }
 0x2e2   : > { %v3357_v6 = vpack.c.bf16 %v1304_v61, %v1296_v59  ;;  %v1352_v53 = vld [vmem:[#allocation10 + $0xfd8] sm:$0xff]  ;;  %v1349_v59 = vld [vmem:[#allocation10 + $0xfc0] sm:$0xff]  ;;  %v4680_v61 = vrot.slane %v4595_v19, %v641_v45 }
 0x2e3   : > { %3216 = vmatpush1.bf16.msra.mxu1 %v3215_v7  ;;  %3344 = vmatpush1.bf16.msra.mxu0 %v3343_v8  ;;  %v1295_v7 = vld [vmem:[#allocation10 + $0xe10] sm:$0xff]  ;;  %v3243_v60 = vpack.c.bf16 %v1349_v59, %v1341_v56  ;;  %v889_v56 = vld [vmem:[#allocation10 + $0x160] sm:$0xff]  ;;  %v4702_v59 = vmax.f32 %v821_v21, 0.0 }
 0x2e4   : > { %3218 = vmatprep.subr.bf16.mxu1 %v3217_v11  ;;  %3346 = vmatprep.subr.bf16.mxu0 %v3345_v12  ;;  %v1303_v8 = vld [vmem:[#allocation10 + $0xe50] sm:$0xff]  ;;  %v1312_v11 = vld [vmem:[#allocation10 + $0xe98] sm:$0xff]  ;;  %v819_v9 = vadd.f32 %v4631_v1, %v4680_v61  ;;  %v906_v1 = vld [vmem:[#allocation10 + $0x1e8] sm:$0xff] }
 0x2e5   : > { %v1320_v12 = vld [vmem:[#allocation10 + $0xed8] sm:$0xff]  ;;  %v3359_v23 = vpack.c.bf16 %v1303_v8, %v1295_v7  ;;  %v923_v21 = vld [vmem:[#allocation10 + $0x270] sm:$0xff] }
 0x2e6   : > { %v3361_v30 = vpack.c.bf16 %v1320_v12, %v1312_v11  ;;  %v852_v7 = vld [vmem:[#allocation10 + $0x38] sm:$0xff]  ;;  %v807_v11 = vadd.f32 %v4608_v24, %v4680_v61  ;;  %v813_v24 = vadd.f32 %v4616_v39, %v4680_v61  ;;  %v890_v39 = vld [vmem:[#allocation10 + $0x168] sm:$0xff] }
 0x2e7   : > { %3220 = vmatpush1.bf16.msra.mxu1 %v3219_v31  ;;  %3348 = vmatpush1.bf16.msra.mxu0 %v3347_v32  ;;  %v1311_v31 = vld [vmem:[#allocation10 + $0xe90] sm:$0xff]  ;;  %v860_v8 = vld [vmem:[#allocation10 + $0x78] sm:$0xff] }
 0x2e8   : > { %3222 = vmatprep.subr.bf16.mxu1 %v3221_v35  ;;  %3350 = vmatprep.subr.bf16.mxu0 %v3349_v36  ;;  %v1319_v32 = vld [vmem:[#allocation10 + $0xed0] sm:$0xff]  ;;  %v1328_v35 = vld [vmem:[#allocation10 + $0xf18] sm:$0xff]  ;;  %v3501_v12 = vpack.c.bf16 %v860_v8, %v852_v7  ;;  %v4686_v34 = vmax.f32 %v807_v11, 0.0  ;;  %v897_v11 = vld [vmem:[#allocation10 + $0x1a0] sm:$0xff] }
 0x2e9   : > { %v1336_v36 = vld [vmem:[#allocation10 + $0xf58] sm:$0xff]  ;;  %v3363_v41 = vpack.c.bf16 %v1319_v32, %v1311_v31  ;;  %v874_v31 = vld [vmem:[#allocation10 + $0xe8] sm:$0xff] }
 0x2ea   : > { %v868_v32 = vld [vmem:[#allocation10 + $0xb8] sm:$0xff] }
 0x2eb   : > { %3224 = vmatpush1.bf16.msra.mxu1 %v3223_v22  ;;  %3352 = vmatpush1.bf16.msra.mxu0 %v3351_v49  ;;  %v3365_v22 = vpack.c.bf16 %v1336_v36, %v1328_v35  ;;  %v1327_v49 = vld [vmem:[#allocation10 + $0xf10] sm:$0xff]  ;;  %v900_v7 = vld [vmem:[#allocation10 + $0x1b8] sm:$0xff] }
 0x2ec   : > { %3226 = vmatprep.subr.bf16.mxu1 %v3225_v29  ;;  %3354 = vmatprep.subr.bf16.mxu0 %v3353_v52  ;;  %v1350_v29 = vld [vmem:[#allocation10 + $0xfc8] sm:$0xff]  ;;  %v1344_v52 = vld [vmem:[#allocation10 + $0xf98] sm:$0xff]  ;;  %v3367_v55 = vpack.c.bf16 %v1335_v50, %v1327_v49  ;;  %v875_v49 = vld [vmem:[#allocation10 + $0xf0] sm:$0xff] }
 0x2ed   : > { %v882_v50 = vld [vmem:[#allocation10 + $0x128] sm:$0xff]  ;;  %v908_v8 = vld [vmem:[#allocation10 + $0x1f8] sm:$0xff] }
 0x2ef   : > { %3228 = vmatpush1.bf16.msra.mxu1 %v3227_v63  ;;  %3356 = vmatpush1.bf16.msra.mxu0 %v3355_v0  ;;  %v3241_v63 = vpack.c.bf16 %v1350_v29, %v1342_v51  ;;  %v3369_v0 = vpack.c.bf16 %v1352_v53, %v1344_v52  ;;  %v884_v51 = vld [vmem:[#allocation10 + $0x138] sm:$0xff]  ;;  %v4698_v52 = vmax.f32 %v813_v24, 0.0  ;;  %v913_v24 = vld [vmem:[#allocation10 + $0x220] sm:$0xff] }
 0x2f0   : > { %3230 = vmatprep.subr.bf16.mxu1 %v3229_v5  ;;  %3358 = vmatprep.subr.bf16.mxu0 %v3357_v6  ;;  %v850_v5 = vld [vmem:[#allocation10 + $0x28] sm:$0xff]  ;;  %v892_v29 = vld [vmem:[#allocation10 + $0x178] sm:$0xff] }
 0x2f1   : > { %v858_v6 = vld [vmem:[#allocation10 + $0x68] sm:$0xff]  ;;  %v3509_v3 = vpack.c.bf16 %v892_v29, %v884_v51  ;;  %v929_v51 = vld [vmem:[#allocation10 + $0x2a0] sm:$0xff] }
 0x2f2   : > { %v3373_v19 = vpack.c.bf16 %v858_v6, %v850_v5  ;;  %v891_v5 = vld [vmem:[#allocation10 + $0x170] sm:$0xff]  ;;  %v898_v6 = vld [vmem:[#allocation10 + $0x1a8] sm:$0xff]  ;;  %v937_v29 = vld [vmem:[#allocation10 + $0x2e0] sm:$0xff] }
 0x2f3   : > { %3232 = vmatpush1.bf16.msra.mxu1 %v3231_v13  ;;  %3360 = vmatpush1.bf16.msra.mxu0 %v3359_v23  ;;  %v849_v13 = vld [vmem:[#allocation10 + $0x20] sm:$0xff] }
 0x2f4   : > { %3234 = vmatprep.subr.bf16.mxu1 %v3233_v27  ;;  %3362 = vmatprep.subr.bf16.mxu0 %v3361_v30  ;;  %v857_v23 = vld [vmem:[#allocation10 + $0x60] sm:$0xff]  ;;  %v859_v27 = vld [vmem:[#allocation10 + $0x70] sm:$0xff]  ;;  %v866_v30 = vld [vmem:[#allocation10 + $0xa8] sm:$0xff] }
 0x2f5   : > { %v3375_v35 = vpack.c.bf16 %v857_v23, %v849_v13  ;;  %v3503_v36 = vpack.c.bf16 %v859_v27, %v851_v26  ;;  %v3377_v43 = vpack.c.bf16 %v874_v31, %v866_v30  ;;  %v3385_v13 = vpack.c.bf16 %v906_v1, %v898_v6  ;;  %v907_v26 = vld [vmem:[#allocation10 + $0x1f0] sm:$0xff]  ;;  %v914_v27 = vld [vmem:[#allocation10 + $0x228] sm:$0xff]  ;;  %v924_v30 = vld [vmem:[#allocation10 + $0x278] sm:$0xff] }
 0x2f6   : > { %v3513_v23 = vpack.c.bf16 %v908_v8, %v900_v7  ;;  %v953_v6 = vld [vmem:[#allocation10 + $0x360] sm:$0xff]  ;;  %v947_v8 = vld [vmem:[#allocation10 + $0x330] sm:$0xff] }
 0x2f7   : > { %3236 = vmatpush1.bf16.msra.mxu1 %v3235_v40  ;;  %3364 = vmatpush1.bf16.msra.mxu0 %v3363_v41  ;;  %v865_v40 = vld [vmem:[#allocation10 + $0xa0] sm:$0xff] }
 0x2f8   : > { %3238 = vmatprep.subr.bf16.mxu1 %v3237_v46  ;;  %3366 = vmatprep.subr.bf16.mxu0 %v3365_v22  ;;  %v873_v41 = vld [vmem:[#allocation10 + $0xe0] sm:$0xff]  ;;  %v3505_v46 = vpack.c.bf16 %v876_v33, %v868_v32  ;;  %v867_v22 = vld [vmem:[#allocation10 + $0xb0] sm:$0xff]  ;;  %v3515_v33 = vpack.c.bf16 %v907_v26, %v899_v25 }
 0x2f9   : > { %v3379_v53 = vpack.c.bf16 %v873_v41, %v865_v40  ;;  %v915_v41 = vld [vmem:[#allocation10 + $0x230] sm:$0xff]  ;;  %v961_v25 = vld [vmem:[#allocation10 + $0x3a0] sm:$0xff] }
 0x2fa   : > { %v969_v26 = vld [vmem:[#allocation10 + $0x3e0] sm:$0xff] }
 0x2fb   : > { %3240 = vmatpush1.bf16.msra.mxu1 %v3239_v54  ;;  %3368 = vmatpush1.bf16.msra.mxu0 %v3367_v55  ;;  %v3507_v54 = vpack.c.bf16 %v875_v49, %v867_v22  ;;  %v881_v55 = vld [vmem:[#allocation10 + $0x120] sm:$0xff]  ;;  %v932_v22 = vld [vmem:[#allocation10 + $0x2b8] sm:$0xff] }
 0x2fc   : > { %3242 = vmatprep.subr.bf16.mxu1 %v3241_v63  ;;  %3370 = vmatprep.subr.bf16.mxu0 %v3369_v0  ;;  %v827_v63 = vadd.f32 %v4655_v38, %v4644_v14  ;;  %v3381_v0 = vpack.c.bf16 %v890_v39, %v882_v50  ;;  %v825_v14 = vadd.f32 %v4652_v28, %v4680_v61  ;;  %v922_v28 = vld [vmem:[#allocation10 + $0x268] sm:$0xff]  ;;  %v916_v61 = vld [vmem:[#allocation10 + $0x238] sm:$0xff] }
 0x2fd   : > { %v3383_v38 = vpack.c.bf16 %v889_v56, %v881_v55  ;;  %v3517_v40 = vpack.c.bf16 %v924_v30, %v916_v61  ;;  %v940_v49 = vld [vmem:[#allocation10 + $0x2f8] sm:$0xff]  ;;  %v3519_v39 = vpack.c.bf16 %v923_v21, %v915_v41  ;;  %v939_v55 = vld [vmem:[#allocation10 + $0x2f0] sm:$0xff]  ;;  %v946_v56 = vld [vmem:[#allocation10 + $0x328] sm:$0xff] }
 0x2fe   : > { %v4720_v31 = vmax.f32 %v825_v14, 0.0  ;;  %v955_v14 = vld [vmem:[#allocation10 + $0x370] sm:$0xff]  ;;  %v977_v41 = vld [vmem:[#allocation10 + $0x420] sm:$0xff] }
 0x2ff   : > { %3244 = vmatpush1.bf16.msra.mxu1 %v3243_v60  ;;  %3372 = vmatpush1.bf16.msra.mxu0 %v3371_v10  ;;  %v4710_v60 = vmax.f32 %v819_v9, 0.0  ;;  %v3511_v10 = vpack.c.bf16 %v891_v5, %v883_v4  ;;  %v3395_v4 = vpack.c.bf16 %v937_v29, %v929_v51  ;;  %v945_v5 = vld [vmem:[#allocation10 + $0x320] sm:$0xff]  ;;  %v963_v61 = vld [vmem:[#allocation10 + $0x3b0] sm:$0xff]  ;;  %v996_v51 = vld [vmem:[#allocation10 + $0x4b8] sm:$0xff] }
 0x300   : > { %3374 = vmatprep.subr.bf16.mxu1 %v3373_v19  ;;  %3502 = vmatprep.subr.bf16.mxu0 %v3501_v12  ;;  %v905_v19 = vld [vmem:[#allocation10 + $0x1e0] sm:$0xff]  ;;  %v4714_v12 = vmax.f32 %v827_v63, 0.0  ;;  %v954_v63 = vld [vmem:[#allocation10 + $0x368] sm:$0xff]  ;;  %v971_v30 = vld [vmem:[#allocation10 + $0x3f0] sm:$0xff] }
 0x301   : > { %v3387_v32 = vpack.c.bf16 %v905_v19, %v897_v11  ;;  %v3397_v1 = vpack.c.bf16 %v954_v63, %v946_v56  ;;  %v964_v11 = vld [vmem:[#allocation10 + $0x3b8] sm:$0xff]  ;;  %v985_v21 = vld [vmem:[#allocation10 + $0x460] sm:$0xff] }
 0x302   : > { %1553 = vmatmul.mubr.f32.vlgmr.msra.gmra.mrb[8].mxu1 %v4686_v34  ;;  %1731 = vmatmul.mubr.f32.vlgmr.msra.gmra.mrb[12].mxu0 %v4686_v34  ;;  %v972_v19 = vld [vmem:[#allocation10 + $0x3f8] sm:$0xff] }
 0x303   : > { %1558 = vmatprep.mubr.f32.mxu1 %v4690_v47  ;;  %1736 = vmatprep.mubr.f32.mxu0 %v4690_v47  ;;  %v1004_v29 = vld [vmem:[#allocation10 + $0x4f8] sm:$0xff] }
 0x304   : > { %3376 = vmatpush1.bf16.msra.mxu1 %v3375_v35  ;;  %3504 = vmatpush1.bf16.msra.mxu0 %v3503_v36  ;;  %v921_v35 = vld [vmem:[#allocation10 + $0x260] sm:$0xff]  ;;  %v3389_v36 = vpack.c.bf16 %v922_v28, %v914_v27  ;;  %v3529_v28 = vpack.c.bf16 %v972_v19, %v964_v11  ;;  %v3537_v63 = vpack.c.bf16 %v1004_v29, %v996_v51  ;;  %v1011_v11 = vld [vmem:[#allocation10 + $0x530] sm:$0xff] }
 0x305   : > { %3378 = vmatprep.subr.bf16.mxu1 %v3377_v43  ;;  %3506 = vmatprep.subr.bf16.mxu0 %v3505_v46  ;;  %v930_v43 = vld [vmem:[#allocation10 + $0x2a8] sm:$0xff]  ;;  %v3391_v50 = vpack.c.bf16 %v921_v35, %v913_v24  ;;  %v980_v24 = vld [vmem:[#allocation10 + $0x438] sm:$0xff]  ;;  %v1019_v19 = vld [vmem:[#allocation10 + $0x570] sm:$0xff] }
 0x306   : > { %1559 = vmatmul.mubr.f32.gmra.mrb[10].mxu1 %v4698_v52  ;;  %1737 = vmatmul.mubr.f32.gmra.mrb[14].mxu0 %v4698_v52  ;;  %v938_v46 = vld [vmem:[#allocation10 + $0x2e8] sm:$0xff]  ;;  %v988_v35 = vld [vmem:[#allocation10 + $0x478] sm:$0xff]  ;;  %v1043_v51 = vld [vmem:[#allocation10 + $0x630] sm:$0xff] }
 0x307   : > { %1564 = vmatprep.mubr.f32.mxu1 %v4702_v59  ;;  %1742 = vmatprep.mubr.f32.mxu0 %v4702_v59  ;;  %v3393_v9 = vpack.c.bf16 %v938_v46, %v930_v43  ;;  %v3533_v46 = vpack.c.bf16 %v988_v35, %v980_v24  ;;  %v1027_v24 = vld [vmem:[#allocation10 + $0x5b0] sm:$0xff] }
 0x308   : > { %3380 = vmatpush1.bf16.msra.mxu1 %v3379_v53  ;;  %3508 = vmatpush1.bf16.msra.mxu0 %v3507_v54  ;;  %v3521_v53 = vpack.c.bf16 %v940_v49, %v932_v22  ;;  %v931_v54 = vld [vmem:[#allocation10 + $0x2b0] sm:$0xff] }
 0x309   : > { %3382 = vmatprep.subr.bf16.mxu1 %v3381_v0  ;;  %3510 = vmatprep.subr.bf16.mxu0 %v3509_v3  ;;  %v948_v0 = vld [vmem:[#allocation10 + $0x338] sm:$0xff]  ;;  %v979_v22 = vld [vmem:[#allocation10 + $0x430] sm:$0xff] }
 0x30a   : > { %1565 = vmatmul.mubr.f32.gmra.mrb[12].mxu1 %v4710_v60  ;;  %1743 = vmatmul.mubr.f32.gmra.mrb[16].mxu0 %v4710_v60  ;;  %v956_v3 = vld [vmem:[#allocation10 + $0x378] sm:$0xff]  ;;  %v987_v49 = vld [vmem:[#allocation10 + $0x470] sm:$0xff] }
 0x30b   : > { %1570 = vmatprep.mubr.f32.mxu1 %v4714_v12  ;;  %1748 = vmatprep.mubr.f32.mxu0 %v4714_v12  ;;  %v3525_v7 = vpack.c.bf16 %v956_v3, %v948_v0  ;;  %v995_v0 = vld [vmem:[#allocation10 + $0x4b0] sm:$0xff] }
 0x30c   : > { %3384 = vmatpush1.bf16.msra.mxu1 %v3383_v38  ;;  %3512 = vmatpush1.bf16.msra.mxu0 %v3511_v10  ;;  %v962_v38 = vld [vmem:[#allocation10 + $0x3a8] sm:$0xff]  ;;  %v1003_v3 = vld [vmem:[#allocation10 + $0x4f0] sm:$0xff] }
 0x30d   : > { %3386 = vmatprep.subr.bf16.mxu1 %v3385_v13  ;;  %3514 = vmatprep.subr.bf16.mxu0 %v3513_v23  ;;  %v970_v10 = vld [vmem:[#allocation10 + $0x3e8] sm:$0xff]  ;;  %v3399_v13 = vpack.c.bf16 %v953_v6, %v945_v5  ;;  %v3527_v23 = vpack.c.bf16 %v955_v14, %v947_v8  ;;  %v1012_v5 = vld [vmem:[#allocation10 + $0x538] sm:$0xff]  ;;  %v1009_v8 = vld [vmem:[#allocation10 + $0x520] sm:$0xff] }
 0x30e   : > { %1571 = vmatmul.mubr.f32.gmra.mrb[14].mxu1 %v4720_v31  ;;  %1749 = vmatmul.mubr.f32.gmra.mrb[18].mxu0 %v4720_v31  ;;  %v3401_v27 = vpack.c.bf16 %v970_v10, %v962_v38  ;;  %v1020_v6 = vld [vmem:[#allocation10 + $0x578] sm:$0xff]  ;;  %v1017_v14 = vld [vmem:[#allocation10 + $0x560] sm:$0xff]  ;;  %v1035_v35 = vld [vmem:[#allocation10 + $0x5f0] sm:$0xff] }
 0x30f   : > { %1819 = vmatprep.mubr.f32.mxu1 %v4614_v37  ;;  %1997 = vmatprep.mubr.f32.mxu0 %v4614_v37  ;;  %v3523_v37 = vpack.c.bf16 %v939_v55, %v931_v54  ;;  %v993_v54 = vld [vmem:[#allocation10 + $0x4a0] sm:$0xff]  ;;  %v3541_v10 = vpack.c.bf16 %v1020_v6, %v1012_v5  ;;  %v1051_v29 = vld [vmem:[#allocation10 + $0x670] sm:$0xff] }
 0x310   : > { %3388 = vmatpush1.bf16.msra.mxu1 %v3387_v32  ;;  %3516 = vmatpush1.bf16.msra.mxu0 %v3515_v33  ;;  %v978_v32 = vld [vmem:[#allocation10 + $0x428] sm:$0xff]  ;;  %v1001_v55 = vld [vmem:[#allocation10 + $0x4e0] sm:$0xff]  ;;  %v1059_v5 = vld [vmem:[#allocation10 + $0x6b0] sm:$0xff] }
 0x311   : > { %3390 = vmatprep.subr.bf16.mxu1 %v3389_v36  ;;  %3518 = vmatprep.subr.bf16.mxu0 %v3517_v40  ;;  %v986_v33 = vld [vmem:[#allocation10 + $0x468] sm:$0xff]  ;;  %v3403_v36 = vpack.c.bf16 %v969_v26, %v961_v25  ;;  %v3531_v40 = vpack.c.bf16 %v971_v30, %v963_v61  ;;  %v1028_v25 = vld [vmem:[#allocation10 + $0x5b8] sm:$0xff]  ;;  %v1025_v61 = vld [vmem:[#allocation10 + $0x5a0] sm:$0xff] }
 0x312   : > { %v3405_v43 = vpack.c.bf16 %v986_v33, %v978_v32  ;;  %v1036_v26 = vld [vmem:[#allocation10 + $0x5f8] sm:$0xff]  ;;  %v1033_v30 = vld [vmem:[#allocation10 + $0x5e0] sm:$0xff]  ;;  %v1067_v6 = vld [vmem:[#allocation10 + $0x6f0] sm:$0xff] }
 0x313   : > { %v3545_v33 = vpack.c.bf16 %v1036_v26, %v1028_v25  ;;  %v1075_v25 = vld [vmem:[#allocation10 + $0x730] sm:$0xff] }
 0x314   : > { %3392 = vmatpush1.bf16.msra.mxu1 %v3391_v50  ;;  %3520 = vmatpush1.bf16.msra.mxu0 %v3519_v39  ;;  %v994_v50 = vld [vmem:[#allocation10 + $0x4a8] sm:$0xff]  ;;  %v1083_v26 = vld [vmem:[#allocation10 + $0x770] sm:$0xff] }
 0x315   : > { %3394 = vmatprep.subr.bf16.mxu1 %v3393_v9  ;;  %3522 = vmatprep.subr.bf16.mxu0 %v3521_v53  ;;  %v1002_v39 = vld [vmem:[#allocation10 + $0x4e8] sm:$0xff]  ;;  %v3407_v9 = vpack.c.bf16 %v985_v21, %v977_v41  ;;  %v3535_v53 = vpack.c.bf16 %v987_v49, %v979_v22  ;;  %v1044_v41 = vld [vmem:[#allocation10 + $0x638] sm:$0xff]  ;;  %v1041_v22 = vld [vmem:[#allocation10 + $0x620] sm:$0xff] }
 0x316   : > { %v3409_v56 = vpack.c.bf16 %v1002_v39, %v994_v50  ;;  %v1052_v21 = vld [vmem:[#allocation10 + $0x678] sm:$0xff]  ;;  %v1049_v49 = vld [vmem:[#allocation10 + $0x660] sm:$0xff] }
 0x317   : > { %v3549_v39 = vpack.c.bf16 %v1052_v21, %v1044_v41  ;;  %v1091_v41 = vld [vmem:[#allocation10 + $0x7b0] sm:$0xff] }
 0x318   : > { %3396 = vmatpush1.bf16.msra.mxu1 %v3395_v4  ;;  %3524 = vmatpush1.bf16.msra.mxu0 %v3523_v37  ;;  %v1010_v4 = vld [vmem:[#allocation10 + $0x528] sm:$0xff]  ;;  %v1099_v21 = vld [vmem:[#allocation10 + $0x7f0] sm:$0xff] }
 0x319   : > { %3398 = vmatprep.subr.bf16.mxu1 %v3397_v1  ;;  %3526 = vmatprep.subr.bf16.mxu0 %v3525_v7  ;;  %v1018_v37 = vld [vmem:[#allocation10 + $0x568] sm:$0xff]  ;;  %v3411_v1 = vpack.c.bf16 %v1001_v55, %v993_v54  ;;  %v3539_v7 = vpack.c.bf16 %v1003_v3, %v995_v0  ;;  %v1060_v54 = vld [vmem:[#allocation10 + $0x6b8] sm:$0xff]  ;;  %v1057_v0 = vld [vmem:[#allocation10 + $0x6a0] sm:$0xff] }
 0x31a   : > { %v3413_v38 = vpack.c.bf16 %v1018_v37, %v1010_v4  ;;  %v1068_v55 = vld [vmem:[#allocation10 + $0x6f8] sm:$0xff]  ;;  %v1065_v3 = vld [vmem:[#allocation10 + $0x6e0] sm:$0xff] }
 0x31b   : > { %v3553_v37 = vpack.c.bf16 %v1068_v55, %v1060_v54  ;;  %v1107_v54 = vld [vmem:[#allocation10 + $0x830] sm:$0xff] }
 0x31c   : > { %3400 = vmatpush1.bf16.msra.mxu1 %v3399_v13  ;;  %3528 = vmatpush1.bf16.msra.mxu0 %v3527_v23  ;;  %v1026_v13 = vld [vmem:[#allocation10 + $0x5a8] sm:$0xff]  ;;  %v1115_v55 = vld [vmem:[#allocation10 + $0x870] sm:$0xff] }
 0x31d   : > { %3402 = vmatprep.subr.bf16.mxu1 %v3401_v27  ;;  %3530 = vmatprep.subr.bf16.mxu0 %v3529_v28  ;;  %v1034_v23 = vld [vmem:[#allocation10 + $0x5e8] sm:$0xff]  ;;  %v3415_v27 = vpack.c.bf16 %v1017_v14, %v1009_v8  ;;  %v3543_v28 = vpack.c.bf16 %v1019_v19, %v1011_v11  ;;  %v1076_v8 = vld [vmem:[#allocation10 + $0x738] sm:$0xff]  ;;  %v1073_v11 = vld [vmem:[#allocation10 + $0x720] sm:$0xff] }
 0x31e   : > { %v3417_v32 = vpack.c.bf16 %v1034_v23, %v1026_v13  ;;  %v1084_v14 = vld [vmem:[#allocation10 + $0x778] sm:$0xff]  ;;  %v1081_v19 = vld [vmem:[#allocation10 + $0x760] sm:$0xff] }
 0x31f   : > { %v3557_v23 = vpack.c.bf16 %v1084_v14, %v1076_v8  ;;  %v1123_v8 = vld [vmem:[#allocation10 + $0x8b0] sm:$0xff] }
 0x320   : > { %3404 = vmatpush1.bf16.msra.mxu1 %v3403_v36  ;;  %3532 = vmatpush1.bf16.msra.mxu0 %v3531_v40  ;;  %v1042_v36 = vld [vmem:[#allocation10 + $0x628] sm:$0xff]  ;;  %v1131_v14 = vld [vmem:[#allocation10 + $0x8f0] sm:$0xff] }
 0x321   : > { %3406 = vmatprep.subr.bf16.mxu1 %v3405_v43  ;;  %3534 = vmatprep.subr.bf16.mxu0 %v3533_v46  ;;  %v1050_v40 = vld [vmem:[#allocation10 + $0x668] sm:$0xff]  ;;  %v3419_v43 = vpack.c.bf16 %v1033_v30, %v1025_v61  ;;  %v3547_v46 = vpack.c.bf16 %v1035_v35, %v1027_v24  ;;  %v1092_v61 = vld [vmem:[#allocation10 + $0x7b8] sm:$0xff]  ;;  %v1089_v24 = vld [vmem:[#allocation10 + $0x7a0] sm:$0xff] }
 0x322   : > { %v3421_v50 = vpack.c.bf16 %v1050_v40, %v1042_v36  ;;  %v1100_v30 = vld [vmem:[#allocation10 + $0x7f8] sm:$0xff]  ;;  %v1097_v35 = vld [vmem:[#allocation10 + $0x7e0] sm:$0xff] }
 0x323   : > { %v3561_v40 = vpack.c.bf16 %v1100_v30, %v1092_v61  ;;  %v1139_v61 = vld [vmem:[#allocation10 + $0x930] sm:$0xff] }
 0x324   : > { %3408 = vmatpush1.bf16.msra.mxu1 %v3407_v9  ;;  %3536 = vmatpush1.bf16.msra.mxu0 %v3535_v53  ;;  %v1058_v9 = vld [vmem:[#allocation10 + $0x6a8] sm:$0xff]  ;;  %v1147_v30 = vld [vmem:[#allocation10 + $0x970] sm:$0xff] }
 0x325   : > { %3410 = vmatprep.subr.bf16.mxu1 %v3409_v56  ;;  %3538 = vmatprep.subr.bf16.mxu0 %v3537_v63  ;;  %v1066_v53 = vld [vmem:[#allocation10 + $0x6e8] sm:$0xff]  ;;  %v3423_v56 = vpack.c.bf16 %v1049_v49, %v1041_v22  ;;  %v3551_v63 = vpack.c.bf16 %v1051_v29, %v1043_v51  ;;  %v1108_v22 = vld [vmem:[#allocation10 + $0x838] sm:$0xff] }
 0x326   : > { %v3425_v4 = vpack.c.bf16 %v1066_v53, %v1058_v9  ;;  %v1116_v49 = vld [vmem:[#allocation10 + $0x878] sm:$0xff]  ;;  %v1105_v9 = vld [vmem:[#allocation10 + $0x820] sm:$0xff] }
 0x327   : > { %v3565_v29 = vpack.c.bf16 %v1116_v49, %v1108_v22  ;;  %v1113_v53 = vld [vmem:[#allocation10 + $0x860] sm:$0xff]  ;;  %v1178_v22 = vld [vmem:[#allocation10 + $0xa68] sm:$0xff]  ;;  %v1172_v49 = vld [vmem:[#allocation10 + $0xa38] sm:$0xff] }
 0x328   : > { %3412 = vmatpush1.bf16.msra.mxu1 %v3411_v1  ;;  %3540 = vmatpush1.bf16.msra.mxu0 %v3539_v7  ;;  %v1074_v1 = vld [vmem:[#allocation10 + $0x728] sm:$0xff] }
 0x329   : > { %3414 = vmatprep.subr.bf16.mxu1 %v3413_v38  ;;  %3542 = vmatprep.subr.bf16.mxu0 %v3541_v10  ;;  %v1082_v7 = vld [vmem:[#allocation10 + $0x768] sm:$0xff]  ;;  %v3427_v38 = vpack.c.bf16 %v1065_v3, %v1057_v0  ;;  %v3555_v10 = vpack.c.bf16 %v1067_v6, %v1059_v5  ;;  %v1124_v0 = vld [vmem:[#allocation10 + $0x8b8] sm:$0xff]  ;;  %v1121_v5 = vld [vmem:[#allocation10 + $0x8a0] sm:$0xff] }
 0x32a   : > { %v3429_v13 = vpack.c.bf16 %v1082_v7, %v1074_v1  ;;  %v1132_v3 = vld [vmem:[#allocation10 + $0x8f8] sm:$0xff]  ;;  %v1129_v6 = vld [vmem:[#allocation10 + $0x8e0] sm:$0xff] }
 0x32b   : > { %v3569_v7 = vpack.c.bf16 %v1132_v3, %v1124_v0  ;;  %v1196_v0 = vld [vmem:[#allocation10 + $0xaf8] sm:$0xff] }
 0x32c   : > { %3416 = vmatpush1.bf16.msra.mxu1 %v3415_v27  ;;  %3544 = vmatpush1.bf16.msra.mxu0 %v3543_v28  ;;  %v1090_v27 = vld [vmem:[#allocation10 + $0x7a8] sm:$0xff] }
 0x32d   : > { %3418 = vmatprep.subr.bf16.mxu1 %v3417_v32  ;;  %3546 = vmatprep.subr.bf16.mxu0 %v3545_v33  ;;  %v1098_v28 = vld [vmem:[#allocation10 + $0x7e8] sm:$0xff]  ;;  %v3431_v32 = vpack.c.bf16 %v1081_v19, %v1073_v11  ;;  %v3559_v33 = vpack.c.bf16 %v1083_v26, %v1075_v25  ;;  %v1140_v11 = vld [vmem:[#allocation10 + $0x938] sm:$0xff]  ;;  %v1137_v25 = vld [vmem:[#allocation10 + $0x920] sm:$0xff] }
 0x32e   : > { %v3433_v36 = vpack.c.bf16 %v1098_v28, %v1090_v27  ;;  %v1148_v19 = vld [vmem:[#allocation10 + $0x978] sm:$0xff]  ;;  %v1145_v26 = vld [vmem:[#allocation10 + $0x960] sm:$0xff] }
 0x32f   : > { %v3573_v28 = vpack.c.bf16 %v1148_v19, %v1140_v11 }
 0x330   : > { %3420 = vmatpush1.bf16.msra.mxu1 %v3419_v43  ;;  %3548 = vmatpush1.bf16.msra.mxu0 %v3547_v46  ;;  %v1106_v43 = vld [vmem:[#allocation10 + $0x828] sm:$0xff] }
 0x331   : > { %3422 = vmatprep.subr.bf16.mxu1 %v3421_v50  ;;  %3550 = vmatprep.subr.bf16.mxu0 %v3549_v39  ;;  %v1114_v46 = vld [vmem:[#allocation10 + $0x868] sm:$0xff]  ;;  %v3435_v50 = vpack.c.bf16 %v1097_v35, %v1089_v24  ;;  %v3563_v39 = vpack.c.bf16 %v1099_v21, %v1091_v41  ;;  %v1164_v24 = vld [vmem:[#allocation10 + $0x9f8] sm:$0xff]  ;;  %v3575_v35 = vpack.c.bf16 %v1147_v30, %v1139_v61 }
 0x332   : > { %v3437_v51 = vpack.c.bf16 %v1114_v46, %v1106_v43  ;;  %v1155_v43 = vld [vmem:[#allocation10 + $0x9b0] sm:$0xff]  ;;  %v1220_v61 = vld [vmem:[#allocation10 + $0xbb8] sm:$0xff] }
 0x333   : > { %v1163_v46 = vld [vmem:[#allocation10 + $0x9f0] sm:$0xff]  ;;  %v1228_v30 = vld [vmem:[#allocation10 + $0xbf8] sm:$0xff] }
 0x334   : > { %3424 = vmatpush1.bf16.msra.mxu1 %v3423_v56  ;;  %3552 = vmatpush1.bf16.msra.mxu0 %v3551_v63  ;;  %v1122_v56 = vld [vmem:[#allocation10 + $0x8a8] sm:$0xff] }
 0x335   : > { %3426 = vmatprep.subr.bf16.mxu1 %v3425_v4  ;;  %3554 = vmatprep.subr.bf16.mxu0 %v3553_v37  ;;  %v1130_v63 = vld [vmem:[#allocation10 + $0x8e8] sm:$0xff]  ;;  %v3439_v4 = vpack.c.bf16 %v1113_v53, %v1105_v9  ;;  %v3567_v37 = vpack.c.bf16 %v1115_v55, %v1107_v54  ;;  %v1171_v9 = vld [vmem:[#allocation10 + $0xa30] sm:$0xff] }
 0x336   : > { %v3441_v1 = vpack.c.bf16 %v1130_v63, %v1122_v56  ;;  %v1179_v55 = vld [vmem:[#allocation10 + $0xa70] sm:$0xff]  ;;  %v1194_v56 = vld [vmem:[#allocation10 + $0xae8] sm:$0xff]  ;;  %v1188_v63 = vld [vmem:[#allocation10 + $0xab8] sm:$0xff] }
 0x337   : > { %v3583_v3 = vpack.c.bf16 %v1179_v55, %v1171_v9  ;;  %v1250_v9 = vld [vmem:[#allocation10 + $0xca8] sm:$0xff]  ;;  %v1260_v55 = vld [vmem:[#allocation10 + $0xcf8] sm:$0xff] }
 0x338   : > { %3428 = vmatpush1.bf16.msra.mxu1 %v3427_v38  ;;  %3556 = vmatpush1.bf16.msra.mxu0 %v3555_v10  ;;  %v1138_v38 = vld [vmem:[#allocation10 + $0x928] sm:$0xff] }
 0x339   : > { %3430 = vmatprep.subr.bf16.mxu1 %v3429_v13  ;;  %3558 = vmatprep.subr.bf16.mxu0 %v3557_v23  ;;  %v1146_v10 = vld [vmem:[#allocation10 + $0x968] sm:$0xff]  ;;  %v3443_v13 = vpack.c.bf16 %v1129_v6, %v1121_v5  ;;  %v3571_v23 = vpack.c.bf16 %v1131_v14, %v1123_v8  ;;  %v1193_v5 = vld [vmem:[#allocation10 + $0xae0] sm:$0xff]  ;;  %v1187_v6 = vld [vmem:[#allocation10 + $0xab0] sm:$0xff] }
 0x33a   : > { %v3445_v27 = vpack.c.bf16 %v1146_v10, %v1138_v38  ;;  %v1202_v8 = vld [vmem:[#allocation10 + $0xb28] sm:$0xff]  ;;  %v1204_v14 = vld [vmem:[#allocation10 + $0xb38] sm:$0xff] }
 0x33b   : > { %v1212_v38 = vld [vmem:[#allocation10 + $0xb78] sm:$0xff] }
 0x33c   : > { %3432 = vmatpush1.bf16.msra.mxu1 %v3431_v32  ;;  %3560 = vmatpush1.bf16.msra.mxu0 %v3559_v33  ;;  %v1162_v32 = vld [vmem:[#allocation10 + $0x9e8] sm:$0xff]  ;;  %v1156_v33 = vld [vmem:[#allocation10 + $0x9b8] sm:$0xff] }
 0x33d   : > { %3434 = vmatprep.subr.bf16.mxu1 %v3433_v36  ;;  %3562 = vmatprep.subr.bf16.mxu0 %v3561_v40  ;;  %v1153_v36 = vld [vmem:[#allocation10 + $0x9a0] sm:$0xff]  ;;  %v3577_v21 = vpack.c.bf16 %v1164_v24, %v1156_v33 }
 0x33e   : > { %v1161_v40 = vld [vmem:[#allocation10 + $0x9e0] sm:$0xff] }
 0x33f   : > { %v1217_v24 = vld [vmem:[#allocation10 + $0xba0] sm:$0xff] }
 0x340   : > { %3436 = vmatpush1.bf16.msra.mxu1 %v3435_v50  ;;  %3564 = vmatpush1.bf16.msra.mxu0 %v3563_v39  ;;  %v1180_v50 = vld [vmem:[#allocation10 + $0xa78] sm:$0xff]  ;;  %v3579_v39 = vpack.c.bf16 %v1163_v46, %v1155_v43 }
 0x341   : > { %3438 = vmatprep.subr.bf16.mxu1 %v3437_v51  ;;  %3566 = vmatprep.subr.bf16.mxu0 %v3565_v29  ;;  %v1169_v51 = vld [vmem:[#allocation10 + $0xa20] sm:$0xff]  ;;  %v3581_v54 = vpack.c.bf16 %v1180_v50, %v1172_v49  ;;  %v1236_v43 = vld [vmem:[#allocation10 + $0xc38] sm:$0xff] }
 0x342   : > { %v1177_v29 = vld [vmem:[#allocation10 + $0xa60] sm:$0xff]  ;;  %v1244_v46 = vld [vmem:[#allocation10 + $0xc78] sm:$0xff] }
 0x343   : > { %1820 = vmatmul.mubr.f32.vlgmr.msra.gmra.mrb[16].mxu1 %v4618_v44  ;;  %1998 = vmatmul.mubr.f32.vlgmr.msra.gmra.mrb[20].mxu0 %v4618_v44  ;;  %v1154_v44 = vld [vmem:[#allocation10 + $0x9a8] sm:$0xff]  ;;  %v1233_v50 = vld [vmem:[#allocation10 + $0xc20] sm:$0xff] }
 0x344   : > { %1825 = vmatprep.mubr.f32.mxu1 %v4629_v58  ;;  %3440 = vmatpush1.bf16.msra.mxu1 %v3439_v4  ;;  %v3449_v41 = vpack.c.bf16 %v1162_v32, %v1154_v44 }
 0x345   : > { %2003 = vmatprep.mubr.f32.mxu0 %v4629_v58  ;;  %3568 = vmatpush1.bf16.msra.mxu0 %v3567_v37  ;;  %v3447_v58 = vpack.c.bf16 %v1145_v26, %v1137_v25  ;;  %v1185_v37 = vld [vmem:[#allocation10 + $0xaa0] sm:$0xff]  ;;  %v3589_v25 = vpack.c.bf16 %v1212_v38, %v1204_v14  ;;  %v1211_v26 = vld [vmem:[#allocation10 + $0xb70] sm:$0xff] }
 0x346   : > { %3442 = vmatprep.subr.bf16.mxu1 %v3441_v1  ;;  %3570 = vmatprep.subr.bf16.mxu0 %v3569_v7  ;;  %v3585_v1 = vpack.c.bf16 %v1196_v0, %v1188_v63  ;;  %v1195_v7 = vld [vmem:[#allocation10 + $0xaf0] sm:$0xff]  ;;  %v3459_v10 = vpack.c.bf16 %v1193_v5, %v1185_v37  ;;  %v1249_v0 = vld [vmem:[#allocation10 + $0xca0] sm:$0xff]  ;;  %v1266_v5 = vld [vmem:[#allocation10 + $0xd28] sm:$0xff] }
 0x347   : > { %1826 = vmatmul.mubr.f32.gmra.mrb[18].mxu1 %v4633_v2  ;;  %2004 = vmatmul.mubr.f32.gmra.mrb[22].mxu0 %v4633_v2  ;;  %v1170_v2 = vld [vmem:[#allocation10 + $0xa28] sm:$0xff]  ;;  %v3587_v11 = vpack.c.bf16 %v1195_v7, %v1187_v6  ;;  %v1259_v37 = vld [vmem:[#allocation10 + $0xcf0] sm:$0xff]  ;;  %v1276_v7 = vld [vmem:[#allocation10 + $0xd78] sm:$0xff] }
 0x348   : > { %1831 = vmatprep.mubr.f32.mxu1 %v4650_v16  ;;  %3444 = vmatpush1.bf16.msra.mxu1 %v3443_v13  ;;  %v3453_v53 = vpack.c.bf16 %v1178_v22, %v1170_v2  ;;  %v1209_v13 = vld [vmem:[#allocation10 + $0xb60] sm:$0xff]  ;;  %v1274_v6 = vld [vmem:[#allocation10 + $0xd68] sm:$0xff] }
 0x349   : > { %2009 = vmatprep.mubr.f32.mxu0 %v4650_v16  ;;  %3572 = vmatpush1.bf16.msra.mxu0 %v3571_v23  ;;  %v3451_v16 = vpack.c.bf16 %v1161_v40, %v1153_v36  ;;  %v1203_v23 = vld [vmem:[#allocation10 + $0xb30] sm:$0xff]  ;;  %v3593_v36 = vpack.c.bf16 %v1228_v30, %v1220_v61  ;;  %v3477_v14 = vpack.c.bf16 %v1274_v6, %v1266_v5  ;;  %v1265_v38 = vld [vmem:[#allocation10 + $0xd20] sm:$0xff] }
 0x34a   : > { %3446 = vmatprep.subr.bf16.mxu1 %v3445_v27  ;;  %3574 = vmatprep.subr.bf16.mxu0 %v3573_v28  ;;  %v1218_v27 = vld [vmem:[#allocation10 + $0xba8] sm:$0xff]  ;;  %v3591_v32 = vpack.c.bf16 %v1211_v26, %v1203_v23  ;;  %v1227_v40 = vld [vmem:[#allocation10 + $0xbf0] sm:$0xff]  ;;  %v1292_v26 = vld [vmem:[#allocation10 + $0xdf8] sm:$0xff] }
 0x34b   : > { %1832 = vmatmul.mubr.f32.gmra.mrb[20].mxu1 %v4646_v15  ;;  %2010 = vmatmul.mubr.f32.gmra.mrb[24].mxu0 %v4646_v15  ;;  %v1186_v15 = vld [vmem:[#allocation10 + $0xaa8] sm:$0xff]  ;;  %v1281_v30 = vld [vmem:[#allocation10 + $0xda0] sm:$0xff] }
 0x34c   : > { %1837 = vmatprep.mubr.f32.mxu1 %v4666_v48  ;;  %3448 = vmatpush1.bf16.msra.mxu1 %v3447_v58  ;;  %v3457_v4 = vpack.c.bf16 %v1194_v56, %v1186_v15  ;;  %v1226_v28 = vld [vmem:[#allocation10 + $0xbe8] sm:$0xff]  ;;  %v1225_v58 = vld [vmem:[#allocation10 + $0xbe0] sm:$0xff] }
 0x34d   : > { %2015 = vmatprep.mubr.f32.mxu0 %v4666_v48  ;;  %3576 = vmatpush1.bf16.msra.mxu0 %v3575_v35  ;;  %v3455_v48 = vpack.c.bf16 %v1177_v29, %v1169_v51  ;;  %v3465_v33 = vpack.c.bf16 %v1226_v28, %v1218_v27  ;;  %v1219_v35 = vld [vmem:[#allocation10 + $0xbb0] sm:$0xff]  ;;  %v3467_v2 = vpack.c.bf16 %v1225_v58, %v1217_v24  ;;  %v1290_v23 = vld [vmem:[#allocation10 + $0xde8] sm:$0xff] }
 0x34e   : > { %3450 = vmatprep.subr.bf16.mxu1 %v3449_v41  ;;  %3578 = vmatprep.subr.bf16.mxu0 %v3577_v21  ;;  %v1234_v41 = vld [vmem:[#allocation10 + $0xc28] sm:$0xff]  ;;  %v3595_v22 = vpack.c.bf16 %v1227_v40, %v1219_v35  ;;  %v3597_v51 = vpack.c.bf16 %v1244_v46, %v1236_v43  ;;  %v1243_v29 = vld [vmem:[#allocation10 + $0xc70] sm:$0xff]  ;;  %v1308_v40 = vld [vmem:[#allocation10 + $0xe78] sm:$0xff] }
 0x34f   : > { %1838 = vmatmul.mubr.f32.gmra.mrb[22].mxu1 %v4662_v42  ;;  %2016 = vmatmul.mubr.f32.gmra.mrb[26].mxu0 %v4662_v42  ;;  %v1210_v42 = vld [vmem:[#allocation10 + $0xb68] sm:$0xff]  ;;  %v1291_v24 = vld [vmem:[#allocation10 + $0xdf0] sm:$0xff]  ;;  %v1297_v46 = vld [vmem:[#allocation10 + $0xe20] sm:$0xff] }
 0x350   : > { %3452 = vmatpush1.bf16.msra.mxu1 %v3451_v16  ;;  %1908 = vmatprep.mubr.f32.mxu1 %v4670_v62  ;;  %v3461_v19 = vpack.c.bf16 %v1210_v42, %v1202_v8  ;;  %v1242_v21 = vld [vmem:[#allocation10 + $0xc68] sm:$0xff]  ;;  %v1241_v16 = vld [vmem:[#allocation10 + $0xc60] sm:$0xff] }
 0x351   : > { %3580 = vmatpush1.bf16.msra.mxu0 %v3579_v39  ;;  %2086 = vmatprep.mubr.f32.mxu0 %v4670_v62  ;;  %v1201_v62 = vld [vmem:[#allocation10 + $0xb20] sm:$0xff]  ;;  %v3469_v49 = vpack.c.bf16 %v1242_v21, %v1234_v41  ;;  %v1235_v39 = vld [vmem:[#allocation10 + $0xc30] sm:$0xff]  ;;  %v3471_v15 = vpack.c.bf16 %v1241_v16, %v1233_v50  ;;  %v1298_v58 = vld [vmem:[#allocation10 + $0xe28] sm:$0xff] }
 0x352   : > { %3454 = vmatprep.subr.bf16.mxu1 %v3453_v53  ;;  %3582 = vmatprep.subr.bf16.mxu0 %v3581_v54  ;;  %v3463_v44 = vpack.c.bf16 %v1209_v13, %v1201_v62  ;;  %v1258_v53 = vld [vmem:[#allocation10 + $0xce8] sm:$0xff]  ;;  %v1252_v54 = vld [vmem:[#allocation10 + $0xcb8] sm:$0xff]  ;;  %v3599_v56 = vpack.c.bf16 %v1243_v29, %v1235_v39  ;;  %v1275_v62 = vld [vmem:[#allocation10 + $0xd70] sm:$0xff] }
 0x353   : > { %v3473_v63 = vpack.c.bf16 %v1258_v53, %v1250_v9  ;;  %v1282_v13 = vld [vmem:[#allocation10 + $0xda8] sm:$0xff]  ;;  %v1307_v50 = vld [vmem:[#allocation10 + $0xe70] sm:$0xff]  ;;  %v1324_v29 = vld [vmem:[#allocation10 + $0xef8] sm:$0xff] }
 0x354   : > { %3456 = vmatpush1.bf16.msra.mxu1 %v3455_v48  ;;  %v1257_v48 = vld [vmem:[#allocation10 + $0xce0] sm:$0xff]  ;;  %v3481_v61 = vpack.c.bf16 %v1290_v23, %v1282_v13  ;;  %v1306_v35 = vld [vmem:[#allocation10 + $0xe68] sm:$0xff] }
 0x355   : > { %3584 = vmatpush1.bf16.msra.mxu0 %v3583_v3  ;;  %3458 = vmatprep.subr.bf16.mxu1 %v3457_v4  ;;  %v1251_v3 = vld [vmem:[#allocation10 + $0xcb0] sm:$0xff]  ;;  %v3601_v4 = vpack.c.bf16 %v1260_v55, %v1252_v54  ;;  %v3475_v8 = vpack.c.bf16 %v1257_v48, %v1249_v0  ;;  %v3485_v43 = vpack.c.bf16 %v1306_v35, %v1298_v58  ;;  %v1314_v16 = vld [vmem:[#allocation10 + $0xea8] sm:$0xff]  ;;  %v1313_v55 = vld [vmem:[#allocation10 + $0xea0] sm:$0xff] }
 0x356   : > { %3586 = vmatprep.subr.bf16.mxu0 %v3585_v1  ;;  %v1268_v1 = vld [vmem:[#allocation10 + $0xd38] sm:$0xff]  ;;  %v3603_v42 = vpack.c.bf16 %v1259_v37, %v1251_v3  ;;  %v1322_v39 = vld [vmem:[#allocation10 + $0xee8] sm:$0xff]  ;;  %v1323_v0 = vld [vmem:[#allocation10 + $0xef0] sm:$0xff] }
 0x357   : > { %v3489_v54 = vpack.c.bf16 %v1322_v39, %v1314_v16  ;;  %v1330_v48 = vld [vmem:[#allocation10 + $0xf28] sm:$0xff]  ;;  %v1340_v37 = vld [vmem:[#allocation10 + $0xf78] sm:$0xff] }
 0x358   : > { %3460 = vmatpush1.bf16.msra.mxu1 %v3459_v10  ;;  %v1273_v10 = vld [vmem:[#allocation10 + $0xd60] sm:$0xff]  ;;  %v1338_v3 = vld [vmem:[#allocation10 + $0xf68] sm:$0xff] }
 0x359   : > { %3588 = vmatpush1.bf16.msra.mxu0 %v3587_v11  ;;  %3462 = vmatprep.subr.bf16.mxu1 %v3461_v19  ;;  %v1267_v11 = vld [vmem:[#allocation10 + $0xd30] sm:$0xff]  ;;  %v3605_v19 = vpack.c.bf16 %v1276_v7, %v1268_v1  ;;  %v3479_v27 = vpack.c.bf16 %v1273_v10, %v1265_v38  ;;  %v3493_v1 = vpack.c.bf16 %v1338_v3, %v1330_v48  ;;  %v1329_v7 = vld [vmem:[#allocation10 + $0xf20] sm:$0xff]  ;;  %v1346_v10 = vld [vmem:[#allocation10 + $0xfa8] sm:$0xff] }
 0x35a   : > { %3590 = vmatprep.subr.bf16.mxu0 %v3589_v25  ;;  %v1284_v25 = vld [vmem:[#allocation10 + $0xdb8] sm:$0xff]  ;;  %v3607_v28 = vpack.c.bf16 %v1275_v62, %v1267_v11  ;;  %v1339_v38 = vld [vmem:[#allocation10 + $0xf70] sm:$0xff]  ;;  %v1354_v11 = vld [vmem:[#allocation10 + $0xfe8] sm:$0xff] }
 0x35b   : > { %v1356_v62 = vld [vmem:[#allocation10 + $0xff8] sm:$0xff] }
 0x35c   : > { %3464 = vmatpush1.bf16.msra.mxu1 %v3463_v44  ;;  %v1289_v44 = vld [vmem:[#allocation10 + $0xde0] sm:$0xff] }
 0x35d   : > { %3592 = vmatpush1.bf16.msra.mxu0 %v3591_v32  ;;  %3466 = vmatprep.subr.bf16.mxu1 %v3465_v33  ;;  %v1283_v32 = vld [vmem:[#allocation10 + $0xdb0] sm:$0xff]  ;;  %v3609_v33 = vpack.c.bf16 %v1292_v26, %v1284_v25  ;;  %v3483_v41 = vpack.c.bf16 %v1289_v44, %v1281_v30  ;;  %v3497_v25 = vpack.c.bf16 %v1354_v11, %v1346_v10  ;;  %v1345_v26 = vld [vmem:[#allocation10 + $0xfa0] sm:$0xff] }
 0x35e   : > { %3594 = vmatprep.subr.bf16.mxu0 %v3593_v36  ;;  %v1300_v36 = vld [vmem:[#allocation10 + $0xe38] sm:$0xff]  ;;  %v3611_v21 = vpack.c.bf16 %v1291_v24, %v1283_v32  ;;  %v1355_v30 = vld [vmem:[#allocation10 + $0xff0] sm:$0xff]  ;;  %v2160_v32 = vld [vmem:[%s5309_s7 + $0x88] sm:$0xff] }
 0x35f   : > { %v2159_v44 = vld [vmem:[%s5309_s7 + $0x80] sm:$0xff]  ;;  %v2192_v24 = vld [vmem:[%s5309_s7 + $0x188] sm:$0xff]  ;;  %v2150_v11 = vld [vmem:[%s5309_s7 + $0x38] sm:$0xff] }
 0x360   : > { %3468 = vmatpush1.bf16.msra.mxu1 %v3467_v2  ;;  %v1305_v2 = vld [vmem:[#allocation10 + $0xe60] sm:$0xff] }
 0x361   : > { %3596 = vmatpush1.bf16.msra.mxu0 %v3595_v22  ;;  %3470 = vmatprep.subr.bf16.mxu1 %v3469_v49  ;;  %v1299_v22 = vld [vmem:[#allocation10 + $0xe30] sm:$0xff]  ;;  %v3613_v49 = vpack.c.bf16 %v1308_v40, %v1300_v36  ;;  %v3487_v9 = vpack.c.bf16 %v1305_v2, %v1297_v46  ;;  %v3629_v36 = vpack.c.bf16 %v2160_v32, %v2159_v44  ;;  %v2176_v46 = vld [vmem:[%s5309_s7 + $0x108] sm:$0xff]  ;;  %v2183_v44 = vld [vmem:[%s5309_s7 + $0x140] sm:$0xff] }
 0x362   : > { %3598 = vmatprep.subr.bf16.mxu0 %v3597_v51  ;;  %v1316_v51 = vld [vmem:[#allocation10 + $0xeb8] sm:$0xff]  ;;  %v3615_v53 = vpack.c.bf16 %v1307_v50, %v1299_v22  ;;  %v2161_v2 = vld [vmem:[%s5309_s7 + $0x90] sm:$0xff]  ;;  %v2184_v32 = vld [vmem:[%s5309_s7 + $0x148] sm:$0xff] }
 0x363   : > { %v2162_v22 = vld [vmem:[%s5309_s7 + $0x98] sm:$0xff] }
 0x364   : > { %3472 = vmatpush1.bf16.msra.mxu1 %v3471_v15  ;;  %v1321_v15 = vld [vmem:[#allocation10 + $0xee0] sm:$0xff]  ;;  %v2194_v50 = vld [vmem:[%s5309_s7 + $0x198] sm:$0xff] }
 0x365   : > { %3600 = vmatpush1.bf16.msra.mxu0 %v3599_v56  ;;  %3474 = vmatprep.subr.bf16.mxu1 %v3473_v63  ;;  %v1315_v56 = vld [vmem:[#allocation10 + $0xeb0] sm:$0xff]  ;;  %v3617_v63 = vpack.c.bf16 %v1324_v29, %v1316_v51  ;;  %v3491_v5 = vpack.c.bf16 %v1321_v15, %v1313_v55  ;;  %v3633_v51 = vpack.c.bf16 %v2162_v22, %v2161_v2  ;;  %v2163_v15 = vld [vmem:[%s5309_s7 + $0xa0] sm:$0xff] }
 0x366   : > { %3602 = vmatprep.subr.bf16.mxu0 %v3601_v4  ;;  %v1332_v4 = vld [vmem:[#allocation10 + $0xf38] sm:$0xff]  ;;  %v3619_v6 = vpack.c.bf16 %v1323_v0, %v1315_v56  ;;  %v2145_v29 = vld [vmem:[%s5309_s7 + $0x10] sm:$0xff]  ;;  %v2164_v56 = vld [vmem:[%s5309_s7 + $0xa8] sm:$0xff] }
 0x367   : > { %v2178_v55 = vld [vmem:[%s5309_s7 + $0x118] sm:$0xff]  ;;  %v2196_v0 = vld [vmem:[%s5309_s7 + $0x1a8] sm:$0xff]  ;;  %v2171_v22 = vld [vmem:[%s5309_s7 + $0xe0] sm:$0xff] }
 0x368   : > { %3476 = vmatpush1.bf16.msra.mxu1 %v3475_v8  ;;  %v1337_v8 = vld [vmem:[#allocation10 + $0xf60] sm:$0xff]  ;;  %v2186_v2 = vld [vmem:[%s5309_s7 + $0x158] sm:$0xff] }
 0x369   : > { %3604 = vmatpush1.bf16.msra.mxu0 %v3603_v42  ;;  %3478 = vmatprep.subr.bf16.mxu1 %v3477_v14  ;;  %v1331_v42 = vld [vmem:[#allocation10 + $0xf30] sm:$0xff]  ;;  %v3621_v14 = vpack.c.bf16 %v1340_v37, %v1332_v4  ;;  %v3495_v13 = vpack.c.bf16 %v1337_v8, %v1329_v7  ;;  %v3637_v4 = vpack.c.bf16 %v2164_v56, %v2163_v15  ;;  %v2148_v37 = vld [vmem:[%s5309_s7 + $0x28] sm:$0xff] }
 0x36a   : > { %3606 = vmatprep.subr.bf16.mxu0 %v3605_v19  ;;  %v1348_v19 = vld [vmem:[#allocation10 + $0xfb8] sm:$0xff]  ;;  %v3623_v23 = vpack.c.bf16 %v1339_v38, %v1331_v42  ;;  %v2197_v8 = vld [vmem:[%s5309_s7 + $0x1b0] sm:$0xff]  ;;  %v2188_v15 = vld [vmem:[%s5309_s7 + $0x168] sm:$0xff] }
 0x36b   : > { %v2166_v7 = vld [vmem:[%s5309_s7 + $0xb8] sm:$0xff]  ;;  %v2173_v56 = vld [vmem:[%s5309_s7 + $0xf0] sm:$0xff] }
 0x36c   : > { %3480 = vmatpush1.bf16.msra.mxu1 %v3479_v27  ;;  %v1353_v27 = vld [vmem:[#allocation10 + $0xfe0] sm:$0xff]  ;;  %v2198_v42 = vld [vmem:[%s5309_s7 + $0x1b8] sm:$0xff] }
 0x36d   : > { %3608 = vmatpush1.bf16.msra.mxu0 %v3607_v28  ;;  %3482 = vmatprep.subr.bf16.mxu1 %v3481_v61  ;;  %v1347_v28 = vld [vmem:[#allocation10 + $0xfb0] sm:$0xff]  ;;  %v3625_v61 = vpack.c.bf16 %v1356_v62, %v1348_v19  ;;  %v3499_v58 = vpack.c.bf16 %v1353_v27, %v1345_v26  ;;  %v2200_v26 = vld [vmem:[%s5309_s7 + $0x1c8] sm:$0xff] }
 0x36e   : > { %3610 = vmatprep.subr.bf16.mxu0 %v3609_v33  ;;  %v2191_v33 = vld [vmem:[%s5309_s7 + $0x180] sm:$0xff]  ;;  %v3627_v35 = vpack.c.bf16 %v1355_v30, %v1347_v28  ;;  %v2181_v19 = vld [vmem:[%s5309_s7 + $0x130] sm:$0xff]  ;;  %v2182_v62 = vld [vmem:[%s5309_s7 + $0x138] sm:$0xff] }
 0x36f   : > { %v3661_v40 = vpack.c.bf16 %v2192_v24, %v2191_v33  ;;  %v3675_v28 = vpack.c.bf16 %v2182_v62, %v2181_v19  ;;  %v2152_v30 = vld [vmem:[%s5309_s7 + $0x48] sm:$0xff]  ;;  %v2169_v33 = vld [vmem:[%s5309_s7 + $0xd0] sm:$0xff]  ;;  %v2170_v24 = vld [vmem:[%s5309_s7 + $0xd8] sm:$0xff] }
 0x370   : > { %3484 = vmatpush1.bf16.msra.mxu1 %v3483_v41  ;;  %v2143_v41 = vld [vmem:[%s5309_s7] sm:$0xff] }
 0x371   : > { %3612 = vmatpush1.bf16.msra.mxu0 %v3611_v21  ;;  %3486 = vmatprep.subr.bf16.mxu1 %v3485_v43  ;;  %v2144_v21 = vld [vmem:[%s5309_s7 + $0x8] sm:$0xff]  ;;  %v2175_v43 = vld [vmem:[%s5309_s7 + $0x100] sm:$0xff] }
 0x372   : > { %3614 = vmatprep.subr.bf16.mxu0 %v3613_v49  ;;  %v2193_v49 = vld [vmem:[%s5309_s7 + $0x190] sm:$0xff]  ;;  %v3631_v16 = vpack.c.bf16 %v2144_v21, %v2143_v41  ;;  %v3663_v39 = vpack.c.bf16 %v2176_v46, %v2175_v43  ;;  %v3649_v41 = vpack.c.bf16 %v2170_v24, %v2169_v33  ;;  %v4963_v19 = vld [vmem:[#allocation12] sm:$0xff] }
 0x373   : > { %v2153_v21 = vld [vmem:[%s5309_s7 + $0x50] sm:$0xff]  ;;  %v4973_v62 = vrot.slane %v4963_v19, %v641_v45 }
 0x374   : > { %3488 = vmatpush1.bf16.msra.mxu1 %v3487_v9  ;;  %v2146_v9 = vld [vmem:[%s5309_s7 + $0x18] sm:$0xff]  ;;  %v2185_v43 = vld [vmem:[%s5309_s7 + $0x150] sm:$0xff] }
 0x375   : > { %3616 = vmatpush1.bf16.msra.mxu0 %v3615_v53  ;;  %3490 = vmatprep.subr.bf16.mxu1 %v3489_v54  ;;  %v2177_v53 = vld [vmem:[%s5309_s7 + $0x110] sm:$0xff]  ;;  %v3665_v54 = vpack.c.bf16 %v2194_v50, %v2193_v49  ;;  %v3635_v48 = vpack.c.bf16 %v2146_v9, %v2145_v29  ;;  %v2172_v49 = vld [vmem:[%s5309_s7 + $0xe8] sm:$0xff]  ;;  %v2203_v50 = vld [vmem:[%s5309_s7 + $0x1e0] sm:$0xff] }
 0x376   : > { %3618 = vmatprep.subr.bf16.mxu0 %v3617_v63  ;;  %v2195_v63 = vld [vmem:[%s5309_s7 + $0x1a0] sm:$0xff]  ;;  %v3667_v3 = vpack.c.bf16 %v2178_v55, %v2177_v53  ;;  %v3653_v29 = vpack.c.bf16 %v2172_v49, %v2171_v22  ;;  %v2156_v53 = vld [vmem:[%s5309_s7 + $0x68] sm:$0xff] }
 0x377   : > { %v2155_v9 = vld [vmem:[%s5309_s7 + $0x60] sm:$0xff] }
 0x378   : > { %3492 = vmatpush1.bf16.msra.mxu1 %v3491_v5  ;;  %v2179_v5 = vld [vmem:[%s5309_s7 + $0x120] sm:$0xff] }
 0x379   : > { %3620 = vmatpush1.bf16.msra.mxu0 %v3619_v6  ;;  %3494 = vmatprep.subr.bf16.mxu1 %v3493_v1  ;;  %v2180_v6 = vld [vmem:[%s5309_s7 + $0x128] sm:$0xff]  ;;  %v2165_v1 = vld [vmem:[%s5309_s7 + $0xb0] sm:$0xff] }
 0x37a   : > { %3622 = vmatprep.subr.bf16.mxu0 %v3621_v14  ;;  %v3671_v38 = vpack.c.bf16 %v2180_v6, %v2179_v5  ;;  %v3641_v10 = vpack.c.bf16 %v2166_v7, %v2165_v1  ;;  %v2158_v5 = vld [vmem:[%s5309_s7 + $0x78] sm:$0xff]  ;;  %v2223_v7 = vld [vmem:[%s5309_s7 + $0x280] sm:$0xff] }
 0x37b   : > { %v2190_v1 = vld [vmem:[%s5309_s7 + $0x178] sm:$0xff] }
 0x37c   : > { %3496 = vmatpush1.bf16.msra.mxu1 %v3495_v13  ;;  %v2167_v13 = vld [vmem:[%s5309_s7 + $0xc0] sm:$0xff] }
 0x37d   : > { %3624 = vmatpush1.bf16.msra.mxu0 %v3623_v23  ;;  %3498 = vmatprep.subr.bf16.mxu1 %v3497_v25  ;;  %v2168_v23 = vld [vmem:[%s5309_s7 + $0xc8] sm:$0xff]  ;;  %v2199_v25 = vld [vmem:[%s5309_s7 + $0x1c0] sm:$0xff] }
 0x37e   : > { %3626 = vmatprep.subr.bf16.mxu0 %v3625_v61  ;;  %v3645_v61 = vpack.c.bf16 %v2168_v23, %v2167_v13  ;;  %v4978_v13 = vrot.slane %v4963_v19, %v637_v20  ;;  %v4983_v23 = vrot.slane %v4963_v19, %v645_v57  ;;  %v2239_v20 = vld [vmem:[%s5309_s7 + $0x300] sm:$0xff]  ;;  %v2225_v57 = vld [vmem:[%s5309_s7 + $0x290] sm:$0xff] }
 0x380   : > { %3500 = vmatpush1.bf16.msra.mxu1 %v3499_v58  ;;  %v2201_v58 = vld [vmem:[%s5309_s7 + $0x1d0] sm:$0xff] }
 0x381   : > { %3628 = vmatpush1.bf16.msra.mxu0 %v3627_v35  ;;  %3630 = vmatprep.subr.bf16.mxu1 %v3629_v36  ;;  %v2202_v35 = vld [vmem:[%s5309_s7 + $0x1d8] sm:$0xff] }
 0x382   : > { %3662 = vmatprep.subr.bf16.mxu0 %v3661_v40  ;;  %v3679_v40 = vpack.c.bf16 %v2184_v32, %v2183_v44  ;;  %v3681_v46 = vpack.c.bf16 %v2202_v35, %v2201_v58  ;;  %v2226_v44 = vld [vmem:[%s5309_s7 + $0x298] sm:$0xff]  ;;  %v5016_v58 = vld [vmem:[%s5309_s7 + $0x210] sm:$0xff] }
 0x383   : > { %1909 = vmatmul.mubr.f32.vlgmr.msra.gmra.mrb[16].mxu1 %v4686_v34  ;;  %v2258_v32 = vld [vmem:[%s5309_s7 + $0x398] sm:$0xff]  ;;  %v3697_v22 = vpack.c.bf16 %v2226_v44, %v2225_v57 }
 0x384   : > { %2087 = vmatmul.mubr.f32.vlgmr.msra.gmra.mrb[20].mxu0 %v4686_v34  ;;  %1914 = vmatprep.mubr.f32.mxu1 %v4690_v47  ;;  %v2147_v34 = vld [vmem:[%s5309_s7 + $0x20] sm:$0xff] }
 0x385   : > { %2092 = vmatprep.mubr.f32.mxu0 %v4690_v47  ;;  %3632 = vmatpush3.bf16.msra.mxu1 %v3631_v16  ;;  %v3669_v47 = vpack.c.bf16 %v2196_v0, %v2195_v63  ;;  %v3639_v14 = vpack.c.bf16 %v2148_v37, %v2147_v34  ;;  %v2204_v16 = vld [vmem:[%s5309_s7 + $0x1e8] sm:$0xff]  ;;  %v2174_v63 = vld [vmem:[%s5309_s7 + $0xf8] sm:$0xff]  ;;  %v2205_v0 = vld [vmem:[%s5309_s7 + $0x1f0] sm:$0xff] }
 0x386   : > { %3664 = vmatpush3.bf16.msra.mxu0 %v3663_v39  ;;  %3634 = vmatprep.subr.bf16.mxu1 %v3633_v51  ;;  %v3683_v51 = vpack.c.bf16 %v2186_v2, %v2185_v43  ;;  %v3685_v55 = vpack.c.bf16 %v2204_v16, %v2203_v50  ;;  %v3657_v34 = vpack.c.bf16 %v2174_v63, %v2173_v56  ;;  %v2157_v37 = vld [vmem:[%s5309_s7 + $0x70] sm:$0xff]  ;;  %v5036_v50 = vld [vmem:[%s5309_s7 + $0x2a0] sm:$0xff]  ;;  %v5041_v16 = vld [vmem:[%s5309_s7 + $0x2a8] sm:$0xff] }
 0x387   : > { %1915 = vmatmul.mubr.f32.gmra.mrb[18].mxu1 %v4698_v52  ;;  %3666 = vmatprep.subr.bf16.mxu0 %v3665_v54  ;;  %v2187_v54 = vld [vmem:[%s5309_s7 + $0x160] sm:$0xff] }
 0x388   : > { %2093 = vmatmul.mubr.f32.gmra.mrb[22].mxu0 %v4698_v52  ;;  %1920 = vmatprep.mubr.f32.mxu1 %v4702_v59  ;;  %v2149_v52 = vld [vmem:[%s5309_s7 + $0x30] sm:$0xff] }
 0x389   : > { %2098 = vmatprep.mubr.f32.mxu0 %v4702_v59  ;;  %3636 = vmatpush3.bf16.msra.mxu1 %v3635_v48  ;;  %v3673_v59 = vpack.c.bf16 %v2198_v42, %v2197_v8  ;;  %v3643_v27 = vpack.c.bf16 %v2150_v11, %v2149_v52  ;;  %v2206_v48 = vld [vmem:[%s5309_s7 + $0x1f8] sm:$0xff]  ;;  %v2224_v8 = vld [vmem:[%s5309_s7 + $0x288] sm:$0xff]  ;;  %v2255_v42 = vld [vmem:[%s5309_s7 + $0x380] sm:$0xff] }
 0x38a   : > { %3668 = vmatpush3.bf16.msra.mxu0 %v3667_v3  ;;  %3638 = vmatprep.subr.bf16.mxu1 %v3637_v4  ;;  %v3655_v3 = vpack.c.bf16 %v2156_v53, %v2155_v9  ;;  %v3687_v4 = vpack.c.bf16 %v2188_v15, %v2187_v54  ;;  %v3689_v6 = vpack.c.bf16 %v2206_v48, %v2205_v0  ;;  %v2260_v15 = vld [vmem:[%s5309_s7 + $0x3a8] sm:$0xff]  ;;  %v5056_v0 = vld [vmem:[%s5309_s7 + $0x220] sm:$0xff] }
 0x38b   : > { %1921 = vmatmul.mubr.f32.gmra.mrb[20].mxu1 %v4710_v60  ;;  %3670 = vmatprep.subr.bf16.mxu0 %v3669_v47  ;;  %v2189_v47 = vld [vmem:[%s5309_s7 + $0x170] sm:$0xff]  ;;  %v3693_v52 = vpack.c.bf16 %v2224_v8, %v2223_v7  ;;  %v3701_v7 = vpack.c.bf16 %v5041_v16, %v5036_v50 }
 0x38c   : > { %2099 = vmatmul.mubr.f32.gmra.mrb[24].mxu0 %v4710_v60  ;;  %1926 = vmatprep.mubr.f32.mxu1 %v4714_v12  ;;  %v2151_v60 = vld [vmem:[%s5309_s7 + $0x40] sm:$0xff] }
 0x38d   : > { %2104 = vmatprep.mubr.f32.mxu0 %v4714_v12  ;;  %3640 = vmatpush3.bf16.msra.mxu1 %v3639_v14  ;;  %v3677_v12 = vpack.c.bf16 %v2200_v26, %v2199_v25  ;;  %v3647_v36 = vpack.c.bf16 %v2152_v30, %v2151_v60  ;;  %v2256_v14 = vld [vmem:[%s5309_s7 + $0x388] sm:$0xff] }
 0x38e   : > { %3672 = vmatpush3.bf16.msra.mxu0 %v3671_v38  ;;  %3642 = vmatprep.subr.bf16.mxu1 %v3641_v10  ;;  %v3659_v38 = vpack.c.bf16 %v2158_v5, %v2157_v37  ;;  %v3691_v10 = vpack.c.bf16 %v2190_v1, %v2189_v47  ;;  %v4960_v11 = vpack.c.bf16 %v2256_v14, %v2255_v42  ;;  %v2208_v25 = vld [vmem:[%s5309_s7 + $0x208] sm:$0xff]  ;;  %v2229_v42 = vld [vmem:[%s5309_s7 + $0x2b0] sm:$0xff]  ;;  %v2230_v14 = vld [vmem:[%s5309_s7 + $0x2b8] sm:$0xff] }
 0x38f   : > { %1927 = vmatmul.mubr.f32.gmra.mrb[22].mxu1 %v4720_v31  ;;  %3674 = vmatprep.subr.bf16.mxu0 %v3673_v59  ;;  %v4968_v59 = vrot.slane %v4963_v19, %v633_v18  ;;  %v2207_v18 = vld [vmem:[%s5309_s7 + $0x200] sm:$0xff]  ;;  %v2244_v37 = vld [vmem:[%s5309_s7 + $0x328] sm:$0xff] }
 0x390   : > { %2105 = vmatmul.mubr.f32.gmra.mrb[26].mxu0 %v4720_v31  ;;  %v2154_v31 = vld [vmem:[%s5309_s7 + $0x58] sm:$0xff]  ;;  %v3695_v35 = vpack.c.bf16 %v2208_v25, %v2207_v18 }
 0x391   : > { %3644 = vmatpush3.bf16.msra.mxu1 %v3643_v27  ;;  %v3651_v39 = vpack.c.bf16 %v2154_v31, %v2153_v21  ;;  %v2240_v27 = vld [vmem:[%s5309_s7 + $0x308] sm:$0xff]  ;;  %v2242_v21 = vld [vmem:[%s5309_s7 + $0x318] sm:$0xff] }
 0x392   : > { %3676 = vmatpush3.bf16.msra.mxu0 %v3675_v28  ;;  %3646 = vmatprep.subr.bf16.mxu1 %v3645_v61 }
 0x393   : > { %3678 = vmatprep.subr.bf16.mxu0 %v3677_v12  ;;  %v2257_v12 = vld [vmem:[%s5309_s7 + $0x390] sm:$0xff] }
 0x394   : > { %v5031_v49 = vpack.c.bf16 %v2258_v32, %v2257_v12 }
 0x395   : > { %3648 = vmatpush3.bf16.msra.mxu1 %v3647_v36  ;;  %v5018_v36 = vpack.c.bf16 %v2240_v27, %v2239_v20  ;;  %v2262_v20 = vld [vmem:[%s5309_s7 + $0x3b8] sm:$0xff] }
 0x396   : > { %3680 = vmatpush3.bf16.msra.mxu0 %v3679_v40  ;;  %3650 = vmatprep.subr.bf16.mxu1 %v3649_v41  ;;  %v5023_v40 = vld [vmem:[%s5309_s7 + $0x218] sm:$0xff]  ;;  %v2241_v41 = vld [vmem:[%s5309_s7 + $0x310] sm:$0xff] }
 0x397   : > { %3682 = vmatprep.subr.bf16.mxu0 %v3681_v46  ;;  %v3699_v48 = vpack.c.bf16 %v5023_v40, %v5016_v58 }
 0x399   : > { %3652 = vmatpush3.bf16.msra.mxu1 %v3651_v39 }
 0x39a   : > { %3684 = vmatpush3.bf16.msra.mxu0 %v3683_v51  ;;  %3654 = vmatprep.subr.bf16.mxu1 %v3653_v29 }
 0x39b   : > { %3686 = vmatprep.subr.bf16.mxu0 %v3685_v55  ;;  %v2259_v55 = vld [vmem:[%s5309_s7 + $0x3a0] sm:$0xff] }
 0x39c   : > { %v5076_v8 = vpack.c.bf16 %v2260_v15, %v2259_v55 }
 0x39d   : > { %3656 = vmatpush3.bf16.msra.mxu1 %v3655_v3  ;;  %v5060_v3 = vpack.c.bf16 %v2242_v21, %v2241_v41 }
 0x39e   : > { %3688 = vmatpush3.bf16.msra.mxu0 %v3687_v4  ;;  %3658 = vmatprep.subr.bf16.mxu1 %v3657_v34  ;;  %v5065_v4 = vld [vmem:[%s5309_s7 + $0x228] sm:$0xff]  ;;  %v2243_v34 = vld [vmem:[%s5309_s7 + $0x320] sm:$0xff] }
 0x39f   : > { %3690 = vmatprep.subr.bf16.mxu0 %v3689_v6 }
 0x3a1   : > { %3660 = vmatpush3.bf16.msra.mxu1 %v3659_v38 }
 0x3a2   : > { %3692 = vmatpush3.bf16.msra.mxu0 %v3691_v10  ;;  %3694 = vmatprep.subr.bf16.mxu1 %v3693_v52 }
 0x3a3   : > { %3726 = vmatprep.subr.bf16.mxu0 %v4960_v11 }
 0x3d5   : > { %v1554_v45 = vpop.f32.mrb[8].mxu1  ;;  %v1732_v26 = vpop.f32.mrb[12].mxu0 }
 0x3d6   : > { %v3773_v28 = vadd.f32 %v1554_v45, %v4968_v59  ;;  %v3781_v61 = vadd.f32 %v1732_v26, %v4973_v62  ;;  %v1556_v60 = vpop.f32.mrb[9].mxu1  ;;  %v1734_v30 = vpop.f32.mrb[13].mxu0  ;;  %v2261_v26 = vld [vmem:[%s5309_s7 + $0x3b0] sm:$0xff] }
 0x3d7   : > { %v3774_v33 = vadd.f32 %v1556_v60, %v4978_v13  ;;  %v3782_v24 = vadd.f32 %v1734_v30, %v4983_v23  ;;  %v2213_v60 = vld [vmem:[%s5309_s7 + $0x230] sm:$0xff]  ;;  %v5106_v58 = vpack.c.bf16 %v2262_v20, %v2261_v26  ;;  %v2219_v20 = vld [vmem:[%s5309_s7 + $0x260] sm:$0xff] }
 0x3d8   : > { %v2111_v39 = vmax.f32 %v3773_v28, 0.0  ;;  %v2113_v51 = vmax.f32 %v3781_v61, 0.0  ;;  %v3703_v28 = vpack.c.bf16 %v5065_v4, %v5056_v0  ;;  %v5097_v61 = vpack.c.bf16 %v2244_v37, %v2243_v34  ;;  %v2248_v0 = vld [vmem:[%s5309_s7 + $0x348] sm:$0xff]  ;;  %v2234_v4 = vld [vmem:[%s5309_s7 + $0x2d8] sm:$0xff]  ;;  %v2265_v34 = vld [vmem:[%s5309_s7 + $0x3d0] sm:$0xff] }
 0x3d9   : > { %v2112_v31 = vmax.f32 %v3774_v33, 0.0  ;;  %v2114_v43 = vmax.f32 %v3782_v24, 0.0  ;;  %v1560_v46 = vpop.f32.mrb[10].mxu1  ;;  %v1738_v2 = vpop.f32.mrb[14].mxu0  ;;  %v3705_v33 = vpack.c.bf16 %v2230_v14, %v2229_v42  ;;  %v2214_v24 = vld [vmem:[%s5309_s7 + $0x238] sm:$0xff]  ;;  %v2249_v14 = vld [vmem:[%s5309_s7 + $0x350] sm:$0xff] }
 0x3da   : > { %v3775_v29 = vadd.f32 %v1560_v46, %v4968_v59  ;;  %v3783_v9 = vadd.f32 %v1738_v2, %v4973_v62  ;;  %v1562_v53 = vpop.f32.mrb[11].mxu1  ;;  %v1740_v54 = vpop.f32.mrb[15].mxu0  ;;  %v2246_v2 = vld [vmem:[%s5309_s7 + $0x338] sm:$0xff] }
 0x3db   : > { %v3776_v56 = vadd.f32 %v1562_v53, %v4978_v13  ;;  %v3784_v63 = vadd.f32 %v1740_v54, %v4983_v23  ;;  %2342 = vmatprep.mubr.f32.mxu1 %v2112_v31  ;;  %2427 = vmatprep.mubr.f32.mxu0 %v2114_v43  ;;  %v2216_v53 = vld [vmem:[%s5309_s7 + $0x248] sm:$0xff]  ;;  %v2266_v37 = vld [vmem:[%s5309_s7 + $0x3d8] sm:$0xff] }
 0x3dc   : > { %2343 = vmatmul.mubr.f32.vlgmr.msra.gmra.mrb[24].mxu1 %v2111_v39  ;;  %2428 = vmatmul.mubr.f32.vlgmr.msra.gmra.mrb[28].mxu0 %v2113_v51  ;;  %v2119_v38 = vmax.f32 %v3775_v29, 0.0  ;;  %v2121_v10 = vmax.f32 %v3783_v9, 0.0  ;;  %v2264_v39 = vld [vmem:[%s5309_s7 + $0x3c8] sm:$0xff]  ;;  %v2215_v9 = vld [vmem:[%s5309_s7 + $0x240] sm:$0xff]  ;;  %v5171_v42 = vpack.c.bf16 %v2266_v37, %v2265_v34 }
 0x3dd   : > { %v2120_v5 = vmax.f32 %v3776_v56, 0.0  ;;  %v2122_v47 = vmax.f32 %v3784_v63, 0.0  ;;  %v1566_v6 = vpop.f32.mrb[12].mxu1  ;;  %v1744_v1 = vpop.f32.mrb[16].mxu0  ;;  %3696 = vmatpush3.bf16.msra.mxu1 %v3695_v35  ;;  %3728 = vmatpush3.bf16.msra.mxu0 %v5018_v36  ;;  %v2245_v35 = vld [vmem:[%s5309_s7 + $0x330] sm:$0xff]  ;;  %v2247_v63 = vld [vmem:[%s5309_s7 + $0x340] sm:$0xff] }
 0x3de   : > { %v3777_v52 = vadd.f32 %v1566_v6, %v4968_v59  ;;  %v3785_v18 = vadd.f32 %v1744_v1, %v4973_v62  ;;  %v1568_v25 = vpop.f32.mrb[13].mxu1  ;;  %v1746_v45 = vpop.f32.mrb[17].mxu0  ;;  %3698 = vmatprep.subr.bf16.mxu1 %v3697_v22  ;;  %3730 = vmatprep.subr.bf16.mxu0 %v5031_v49  ;;  %v2231_v22 = vld [vmem:[%s5309_s7 + $0x2c0] sm:$0xff]  ;;  %v5132_v29 = vpack.c.bf16 %v2246_v2, %v2245_v35  ;;  %v2217_v6 = vld [vmem:[%s5309_s7 + $0x250] sm:$0xff]  ;;  %v2218_v1 = vld [vmem:[%s5309_s7 + $0x258] sm:$0xff] }
 0x3df   : > { %v3778_v27 = vadd.f32 %v1568_v25, %v4978_v13  ;;  %v3786_v57 = vadd.f32 %v1746_v45, %v4983_v23  ;;  %2347 = vmatprep.mubr.f32.mxu1 %v2120_v5  ;;  %2432 = vmatprep.mubr.f32.mxu0 %v2122_v47  ;;  %v3711_v5 = vpack.c.bf16 %v2216_v53, %v2215_v9  ;;  %v2268_v25 = vld [vmem:[%s5309_s7 + $0x3e8] sm:$0xff] }
 0x3e0   : > { %2348 = vmatmul.mubr.f32.gmra.mrb[26].mxu1 %v2119_v38  ;;  %2433 = vmatmul.mubr.f32.gmra.mrb[30].mxu0 %v2121_v10  ;;  %v2127_v40 = vmax.f32 %v3777_v52, 0.0  ;;  %v2129_v41 = vmax.f32 %v3785_v18, 0.0  ;;  %v5162_v47 = vpack.c.bf16 %v2248_v0, %v2247_v63  ;;  %v2250_v38 = vld [vmem:[%s5309_s7 + $0x358] sm:$0xff]  ;;  %v2235_v10 = vld [vmem:[%s5309_s7 + $0x2e0] sm:$0xff]  ;;  %v2236_v52 = vld [vmem:[%s5309_s7 + $0x2e8] sm:$0xff]  ;;  %v3715_v45 = vpack.c.bf16 %v2218_v1, %v2217_v6 }
 0x3e1   : > { %v2128_v30 = vmax.f32 %v3778_v27, 0.0  ;;  %v2130_v44 = vmax.f32 %v3786_v57, 0.0  ;;  %v1572_v12 = vpop.f32.mrb[14].mxu1  ;;  %v1750_v32 = vpop.f32.mrb[18].mxu0  ;;  %3700 = vmatpush3.bf16.msra.mxu1 %v3699_v48  ;;  %3732 = vmatpush3.bf16.msra.mxu0 %v5060_v3  ;;  %v2233_v48 = vld [vmem:[%s5309_s7 + $0x2d0] sm:$0xff]  ;;  %v2267_v18 = vld [vmem:[%s5309_s7 + $0x3e0] sm:$0xff]  ;;  %v5192_v26 = vpack.c.bf16 %v2250_v38, %v2249_v14  ;;  %v3717_v57 = vpack.c.bf16 %v2236_v52, %v2235_v10 }
 0x3e2   : > { %v3779_v21 = vadd.f32 %v1572_v12, %v4968_v59  ;;  %v3787_v31 = vadd.f32 %v1750_v32, %v4973_v62  ;;  %v1574_v43 = vpop.f32.mrb[15].mxu1  ;;  %v1752_v46 = vpop.f32.mrb[19].mxu0  ;;  %3702 = vmatprep.subr.bf16.mxu1 %v3701_v7  ;;  %3734 = vmatprep.subr.bf16.mxu0 %v5076_v8  ;;  %v2232_v59 = vld [vmem:[%s5309_s7 + $0x2c8] sm:$0xff]  ;;  %v2263_v62 = vld [vmem:[%s5309_s7 + $0x3c0] sm:$0xff]  ;;  %v3713_v7 = vpack.c.bf16 %v2234_v4, %v2233_v48  ;;  %v2238_v12 = vld [vmem:[%s5309_s7 + $0x2f8] sm:$0xff] }
 0x3e3   : > { %v3780_v50 = vadd.f32 %v1574_v43, %v4978_v13  ;;  %v3788_v16 = vadd.f32 %v1752_v46, %v4983_v23  ;;  %2352 = vmatprep.mubr.f32.mxu1 %v2128_v30  ;;  %2437 = vmatprep.mubr.f32.mxu0 %v2130_v44  ;;  %v3707_v23 = vpack.c.bf16 %v2214_v24, %v2213_v60  ;;  %v2220_v27 = vld [vmem:[%s5309_s7 + $0x268] sm:$0xff]  ;;  %v2251_v60 = vld [vmem:[%s5309_s7 + $0x360] sm:$0xff]  ;;  %v2237_v44 = vld [vmem:[%s5309_s7 + $0x2f0] sm:$0xff] }
 0x3e4   : > { %2353 = vmatmul.mubr.f32.gmra.mrb[28].mxu1 %v2127_v40  ;;  %2438 = vmatmul.mubr.f32.gmra.mrb[32].mxu0 %v2129_v41  ;;  %v2135_v54 = vmax.f32 %v3779_v21, 0.0  ;;  %v2137_v55 = vmax.f32 %v3787_v31, 0.0  ;;  %v3709_v15 = vpack.c.bf16 %v2232_v59, %v2231_v22  ;;  %v5141_v56 = vpack.c.bf16 %v2264_v39, %v2263_v62  ;;  %v2252_v30 = vld [vmem:[%s5309_s7 + $0x368] sm:$0xff]  ;;  %v2269_v32 = vld [vmem:[%s5309_s7 + $0x3f0] sm:$0xff]  ;;  %v2222_v21 = vld [vmem:[%s5309_s7 + $0x278] sm:$0xff] }
 0x3e5   : > { %v2136_v51 = vmax.f32 %v3780_v50, 0.0  ;;  %v2138_v13 = vmax.f32 %v3788_v16, 0.0  ;;  %3704 = vmatpush3.bf16.msra.mxu1 %v3703_v28  ;;  %3736 = vmatpush3.bf16.msra.mxu0 %v5097_v61  ;;  %v5201_v28 = vpack.c.bf16 %v2268_v25, %v2267_v18  ;;  %v3719_v24 = vpack.c.bf16 %v2220_v27, %v2219_v20  ;;  %v2221_v40 = vld [vmem:[%s5309_s7 + $0x270] sm:$0xff]  ;;  %v2254_v46 = vld [vmem:[%s5309_s7 + $0x378] sm:$0xff] }
 0x3e6   : > { %3706 = vmatprep.subr.bf16.mxu1 %v3705_v33  ;;  %3738 = vmatprep.subr.bf16.mxu0 %v5106_v58  ;;  %v2270_v33 = vld [vmem:[%s5309_s7 + $0x3f8] sm:$0xff]  ;;  %v5222_v35 = vpack.c.bf16 %v2252_v30, %v2251_v60  ;;  %v3721_v41 = vpack.c.bf16 %v2238_v12, %v2237_v44  ;;  %v2253_v43 = vld [vmem:[%s5309_s7 + $0x370] sm:$0xff]  ;;  %v3723_v2 = vpack.c.bf16 %v2222_v21, %v2221_v40  ;;  %v1377_v50 = vsub.s32 4, %v4592_v17 }
 0x3e7   : > { %2357 = vmatprep.mubr.f32.mxu1 %v2136_v51  ;;  %2442 = vmatprep.mubr.f32.mxu0 %v2138_v13  ;;  %v5231_v31 = vpack.c.bf16 %v2270_v33, %v2269_v32  ;;  %v5240_v22 = vpack.c.bf16 %v2254_v46, %v2253_v43  ;;  %v1385_v16 = vsub.s32 6, %v4592_v17  ;;  %v1381_v59 = vsub.s32 5, %v4592_v17 }
 0x3e8   : > { %2358 = vmatmul.mubr.f32.gmra.mrb[30].mxu1 %v2135_v54  ;;  %2443 = vmatmul.mubr.f32.gmra.mrb[34].mxu0 %v2137_v55  ;;  %v1389_v62 = vsub.s32 7, %v4592_v17  ;;  %v1378_v39 = vrot.slane %v4963_v19, %v1377_v50 }
 0x3e9   : > { %3708 = vmatpush3.bf16.msra.mxu1 %v3707_v23  ;;  %3740 = vmatpush3.bf16.msra.mxu0 %v5132_v29  ;;  %v5251_v51 = vrot.slane %v4963_v19, %v1385_v16  ;;  %v1382_v13 = vrot.slane %v4963_v19, %v1381_v59 }
 0x3ea   : > { %3710 = vmatprep.subr.bf16.mxu1 %v3709_v15  ;;  %3742 = vmatprep.subr.bf16.mxu0 %v5141_v56  ;;  %v5255_v23 = vrot.slane %v4963_v19, %v1389_v62 }
 0x3ed   : > { %3712 = vmatpush3.bf16.msra.mxu1 %v3711_v5  ;;  %3744 = vmatpush3.bf16.msra.mxu0 %v5162_v47 }
 0x3ee   : > { %3714 = vmatprep.subr.bf16.mxu1 %v3713_v7  ;;  %3746 = vmatprep.subr.bf16.mxu0 %v5171_v42 }
 0x3f1   : > { %3716 = vmatpush3.bf16.msra.mxu1 %v3715_v45  ;;  %3748 = vmatpush3.bf16.msra.mxu0 %v5192_v26 }
 0x3f2   : > { %3718 = vmatprep.subr.bf16.mxu1 %v3717_v57  ;;  %3750 = vmatprep.subr.bf16.mxu0 %v5201_v28 }
 0x3f5   : > { %3720 = vmatpush3.bf16.msra.mxu1 %v3719_v24  ;;  %3752 = vmatpush3.bf16.msra.mxu0 %v5222_v35 }
 0x3f6   : > { %3722 = vmatprep.subr.bf16.mxu1 %v3721_v41  ;;  %3754 = vmatprep.subr.bf16.mxu0 %v5231_v31 }
 0x3f9   : > { %3724 = vmatpush3.bf16.msra.mxu1 %v3723_v2  ;;  %3756 = vmatpush3.bf16.msra.mxu0 %v5240_v22 }
 0x3fa   : > { %3757 = vmatprep.subr.bf16.mxu1 %v4960_v11 }
 0x456   : > { %v1910_v9 = vpop.f32.mrb[16].mxu1 }
 0x457   : > { %v3789_v11 = vadd.f32 %v1910_v9, %v1378_v39  ;;  %v2088_v53 = vpop.f32.mrb[20].mxu0  ;;  %v1912_v54 = vpop.f32.mrb[17].mxu1 }
 0x458   : > { %v3797_v55 = vadd.f32 %v2088_v53, %v5251_v51  ;;  %v3790_v15 = vadd.f32 %v1912_v54, %v1382_v13  ;;  %v2090_v63 = vpop.f32.mrb[21].mxu0 }
 0x459   : > { %v3798_v17 = vadd.f32 %v2090_v63, %v5255_v23  ;;  %v2115_v4 = vmax.f32 %v3789_v11, 0.0 }
 0x45a   : > { %v2116_v0 = vmax.f32 %v3790_v15, 0.0  ;;  %v1916_v48 = vpop.f32.mrb[18].mxu1  ;;  %v2117_v1 = vmax.f32 %v3797_v55, 0.0 }
 0x45b   : > { %v2118_v34 = vmax.f32 %v3798_v17, 0.0  ;;  %v3791_v37 = vadd.f32 %v1916_v48, %v1378_v39  ;;  %v2094_v5 = vpop.f32.mrb[22].mxu0  ;;  %v1918_v6 = vpop.f32.mrb[19].mxu1 }
 0x45c   : > { %v3799_v19 = vadd.f32 %v2094_v5, %v5251_v51  ;;  %v3792_v7 = vadd.f32 %v1918_v6, %v1382_v13  ;;  %v2096_v14 = vpop.f32.mrb[23].mxu0  ;;  %2512 = vmatprep.mubr.f32.mxu1 %v2116_v0 }
 0x45d   : > { %v3800_v38 = vadd.f32 %v2096_v14, %v5255_v23  ;;  %2597 = vmatprep.mubr.f32.mxu0 %v2118_v34  ;;  %2513 = vmatmul.mubr.f32.vlgmr.msra.gmra.mrb[32].mxu1 %v2115_v4  ;;  %v2123_v18 = vmax.f32 %v3791_v37, 0.0 }
 0x45e   : > { %v2124_v10 = vmax.f32 %v3792_v7, 0.0  ;;  %3765 = vmatpush3.bf16.msra.mxu1 %v5018_v36  ;;  %2598 = vmatmul.mubr.f32.vlgmr.msra.gmra.mrb[36].mxu0 %v2117_v1  ;;  %v1922_v52 = vpop.f32.mrb[20].mxu1  ;;  %v2125_v57 = vmax.f32 %v3799_v19, 0.0 }
 0x45f   : > { %v2126_v25 = vmax.f32 %v3800_v38, 0.0  ;;  %v3793_v45 = vadd.f32 %v1922_v52, %v1378_v39  ;;  %v2100_v20 = vpop.f32.mrb[24].mxu0  ;;  %v1924_v27 = vpop.f32.mrb[21].mxu1  ;;  %3758 = vmatprep.subr.bf16.mxu1 %v5031_v49 }
 0x460   : > { %v3794_v60 = vadd.f32 %v1924_v27, %v1382_v13  ;;  %v2102_v30 = vpop.f32.mrb[25].mxu0  ;;  %2517 = vmatprep.mubr.f32.mxu1 %v2124_v10 }
 0x461   : > { %2602 = vmatprep.mubr.f32.mxu0 %v2126_v25  ;;  %2518 = vmatmul.mubr.f32.gmra.mrb[34].mxu1 %v2123_v18  ;;  %v2131_v12 = vmax.f32 %v3793_v45, 0.0  ;;  %v3802_v40 = vadd.f32 %v2102_v30, %v5255_v23 }
 0x462   : > { %v2132_v44 = vmax.f32 %v3794_v60, 0.0  ;;  %3766 = vmatpush3.bf16.msra.mxu1 %v5060_v3  ;;  %2603 = vmatmul.mubr.f32.gmra.mrb[38].mxu0 %v2125_v57  ;;  %v1928_v36 = vpop.f32.mrb[22].mxu1 }
 0x463   : > { %v3795_v32 = vadd.f32 %v1928_v36, %v1378_v39  ;;  %v2106_v33 = vpop.f32.mrb[26].mxu0  ;;  %v1930_v24 = vpop.f32.mrb[23].mxu1  ;;  %3759 = vmatprep.subr.bf16.mxu1 %v5076_v8  ;;  %v2134_v3 = vmax.f32 %v3802_v40, 0.0  ;;  %v3801_v8 = vadd.f32 %v2100_v20, %v5251_v51 }
 0x464   : > { %v3796_v49 = vadd.f32 %v1930_v24, %v1382_v13  ;;  %v2108_v41 = vpop.f32.mrb[27].mxu0  ;;  %2522 = vmatprep.mubr.f32.mxu1 %v2132_v44 }
 0x465   : > { %2523 = vmatmul.mubr.f32.gmra.mrb[36].mxu1 %v2131_v12  ;;  %v2139_v43 = vmax.f32 %v3795_v32, 0.0 }
 0x466   : > { %v2140_v21 = vmax.f32 %v3796_v49, 0.0  ;;  %3767 = vmatpush3.bf16.msra.mxu1 %v5097_v61  ;;  %v3804_v61 = vadd.f32 %v2108_v41, %v5255_v23 }
 0x467   : > { %3760 = vmatprep.subr.bf16.mxu1 %v5106_v58  ;;  %v2133_v58 = vmax.f32 %v3801_v8, 0.0 }
 0x468   : > { %2527 = vmatprep.mubr.f32.mxu1 %v2140_v21 }
 0x469   : > { %2528 = vmatmul.mubr.f32.gmra.mrb[38].mxu1 %v2139_v43 }
 0x46a   : > { %3768 = vmatpush3.bf16.msra.mxu1 %v5132_v29  ;;  %2607 = vmatprep.mubr.f32.mxu1 %v2134_v3  ;;  %v3803_v29 = vadd.f32 %v2106_v33, %v5251_v51 }
 0x46b   : > { %3761 = vmatprep.subr.bf16.mxu1 %v5141_v56  ;;  %v2142_v56 = vmax.f32 %v3804_v61, 0.0 }
 0x46e   : > { %3769 = vmatpush3.bf16.msra.mxu1 %v5162_v47  ;;  %v2141_v47 = vmax.f32 %v3803_v29, 0.0 }
 0x46f   : > { %3762 = vmatprep.subr.bf16.mxu1 %v5171_v42 }
 0x472   : > { %3770 = vmatpush3.bf16.msra.mxu1 %v5192_v26 }
 0x473   : > { %3763 = vmatprep.subr.bf16.mxu1 %v5201_v28  ;;  %v2783_v28 = vld [vmem:[#allocation13] ss:$0 sm:$0xff] }
 0x476   : > { %3771 = vmatpush3.bf16.msra.mxu1 %v5222_v35 }
 0x477   : > { %3764 = vmatprep.subr.bf16.mxu1 %v5231_v31 }
 0x47a   : > { %3772 = vmatpush3.bf16.msra.mxu1 %v5240_v22 }
 0x47d   : > { %2608 = vmatmul.mubr.f32.vlgmr.msra.gmra.mrb[40].mxu1 %v2133_v58 }
 0x47e   : > { %2612 = vmatprep.mubr.f32.mxu1 %v2142_v56 }
 0x481   : > { %2613 = vmatmul.mubr.f32.gmra.mrb[42].mxu1 %v2141_v47 }
 0x4af   : > { %v2839_v42 = vpop.f32.mrb[24].mxu1  ;;  %v2883_v26 = vpop.f32.mrb[28].mxu0 }
 0x4b0   : > { %v2840_v35 = vpop.f32.mrb[25].mxu1  ;;  %v2884_v46 = vpop.f32.mrb[29].mxu0 }
 0x4b1   : > { %v2841_v2 = vadd.f32 %v2840_v35, %v2839_v42  ;;  %v2885_v50 = vadd.f32 %v2884_v46, %v2883_v26 }
 0x4b3   : > { %v2345_v31 = vadd.f32 %v2841_v2, %v2783_v28  ;;  %v2842_v16 = vpop.f32.mrb[26].mxu1  ;;  %v2886_v59 = vpop.f32.mrb[30].mxu0 }
 0x4b4   : > { %v2843_v62 = vpop.f32.mrb[27].mxu1  ;;  %v2887_v22 = vpop.f32.mrb[31].mxu0 }
 0x4b5   : > { %v2430_v39 = vadd.f32 %v2885_v50, %v2345_v31  ;;  %v2844_v13 = vadd.f32 %v2843_v62, %v2842_v16  ;;  %v2888_v51 = vadd.f32 %v2887_v22, %v2886_v59 }
 0x4b7   : > { %v2350_v23 = vadd.f32 %v2844_v13, %v2783_v28  ;;  %v2845_v9 = vpop.f32.mrb[28].mxu1  ;;  %v2889_v11 = vpop.f32.mrb[32].mxu0 }
 0x4b8   : > { %v2846_v53 = vpop.f32.mrb[29].mxu1  ;;  %v2890_v54 = vpop.f32.mrb[33].mxu0 }
 0x4b9   : > { %v2435_v55 = vadd.f32 %v2888_v51, %v2350_v23  ;;  %v2847_v15 = vadd.f32 %v2846_v53, %v2845_v9  ;;  %v2891_v63 = vadd.f32 %v2890_v54, %v2889_v11 }
 0x4bb   : > { %v2355_v17 = vadd.f32 %v2847_v15, %v2783_v28  ;;  %v2848_v0 = vpop.f32.mrb[30].mxu1  ;;  %v2892_v48 = vpop.f32.mrb[34].mxu0 }
 0x4bc   : > { %v2849_v4 = vpop.f32.mrb[31].mxu1  ;;  %v2893_v34 = vpop.f32.mrb[35].mxu0 }
 0x4bd   : > { %v2440_v37 = vadd.f32 %v2891_v63, %v2355_v17  ;;  %v2850_v5 = vadd.f32 %v2849_v4, %v2848_v0  ;;  %v2894_v6 = vadd.f32 %v2893_v34, %v2892_v48 }
 0x4bf   : > { %v2360_v1 = vadd.f32 %v2850_v5, %v2783_v28 }
 0x4c1   : > { %v2445_v19 = vadd.f32 %v2894_v6, %v2360_v1 }
 0x530   : > { %v2927_v7 = vpop.f32.mrb[32].mxu1 }
 0x531   : > { %v2971_v14 = vpop.f32.mrb[36].mxu0  ;;  %v2928_v38 = vpop.f32.mrb[33].mxu1 }
 0x532   : > { %v2929_v10 = vadd.f32 %v2928_v38, %v2927_v7  ;;  %v2972_v52 = vpop.f32.mrb[37].mxu0 }
 0x533   : > { %v2973_v18 = vadd.f32 %v2972_v52, %v2971_v14 }
 0x534   : > { %v2515_v25 = vadd.f32 %v2929_v10, %v2430_v39  ;;  %v2930_v45 = vpop.f32.mrb[34].mxu1 }
 0x535   : > { %v2974_v20 = vpop.f32.mrb[38].mxu0  ;;  %v2931_v27 = vpop.f32.mrb[35].mxu1 }
 0x536   : > { %v2600_v57 = vadd.f32 %v2973_v18, %v2515_v25  ;;  %v2932_v60 = vadd.f32 %v2931_v27, %v2930_v45  ;;  %v2975_v30 = vpop.f32.mrb[39].mxu0 }
 0x537   : > { %v2976_v44 = vadd.f32 %v2975_v30, %v2974_v20 }
 0x538   : > { %2619 = vst.msk [vmem:[%s447_s21] sm:$0xff] %vm2618_vm0, %v2600_v57  ;;  %v2520_v36 = vadd.f32 %v2932_v60, %v2435_v55  ;;  %v2933_v12 = vpop.f32.mrb[36].mxu1 }
 0x539   : > { %v2934_v32 = vpop.f32.mrb[37].mxu1 }
 0x53a   : > { %v2605_v33 = vadd.f32 %v2976_v44, %v2520_v36  ;;  %v2935_v24 = vadd.f32 %v2934_v32, %v2933_v12 }
 0x53c   : > { %2620 = vst.msk [vmem:[%s447_s21 + $0x8] sm:$0xff] %vm2618_vm0, %v2605_v33  ;;  %v2525_v40 = vadd.f32 %v2935_v24, %v2440_v37  ;;  %v2936_v49 = vpop.f32.mrb[38].mxu1 }
 0x53d   : > { %v2937_v41 = vpop.f32.mrb[39].mxu1 }
 0x53e   : > { %v2938_v21 = vadd.f32 %v2937_v41, %v2936_v49 }
 0x540   : > { %v2530_v43 = vadd.f32 %v2938_v21, %v2445_v19 }
 0x550   : > { %v2977_v3 = vpop.f32.mrb[40].mxu1 }
 0x551   : > { %v2978_v8 = vpop.f32.mrb[41].mxu1 }
 0x552   : > { %v2979_v61 = vadd.f32 %v2978_v8, %v2977_v3 }
 0x554   : > { %v2610_v58 = vadd.f32 %v2979_v61, %v2525_v40  ;;  %v2980_v29 = vpop.f32.mrb[42].mxu1 }
 0x555   : > { %v2981_v56 = vpop.f32.mrb[43].mxu1 }
 0x556   : > { %2621 = vst.msk [vmem:[%s447_s21 + $0x10] sm:$0xff] %vm2618_vm0, %v2610_v58  ;;  %v2982_v47 = vadd.f32 %v2981_v56, %v2980_v29 }
 0x558   : > { %v2615_v42 = vadd.f32 %v2982_v47, %v2530_v43 }
 0x55a   : > { %2622 = vst.msk [vmem:[%s447_s21 + $0x18] sm:$0xff] %vm2618_vm0, %v2615_v42 }
 0x55b PF: > { %p23_p5 = scmp.ge.s32.totalorder %s4491_s28, 4   ;;  %s5336_s30 = smov %s4222_s10 }
 0x55c   : > { %s5337_s10 = smov %s4226_s11  ;;  %s5338_s11 = smov %s4502_s29 }
 0x55d   : > { %s5339_s12 = smov %s4491_s28  ;;  %25 = sbr.rel (!%p23_p5) target bundleno = 11 (0xb), region = 124 }
 0x564   :  { %2645 = vsyncpa [#allocation3], 1 }
 0x565   :  { %2647 = vsyncpa [#allocation3 + $0x1], 1 }
 0x566   :  { %2648 = vsyncpa [#allocation5], 1 }
 0x567   :  { %2649 = vsyncpa [#allocation8], 1 }
 0x568   :  { %2650 = vsyncpa [#allocation11], 1 }
 0x569   :  { %2651 = vsyncpa [#allocation14], 1 }

</bundles_post_ra>
